<compile_context>
chip_gen: v5e
topology: v5e:2x2
jax: 0.10.0
libtpu: 0.0.40
codegen_flags: <defaults>
</compile_context>

<pallas_src>
import functools

import jax
import jax.numpy as jnp
import numpy as np
from jax.experimental import pallas as pl
from jax.experimental.pallas import tpu as pltpu


# ----------------------------------------------------------------------------
# Helpers
# ----------------------------------------------------------------------------
def _ceil_to(x, m):
    return ((x + m - 1) // m) * m


def _vmem_budget():
    """Returns (vmem_limit_bytes for CompilerParams, tile-picking budget)."""
    try:
        cap = int(pltpu.get_tpu_info().vmem_capacity_bytes)  # 64 MiB v7x, 128 MiB v5e/v6e
    except Exception:
        cap = 64 << 20                                       # conservative fallback (v7x)
    limit = min((cap * 3) // 4, 96 << 20)
    return int(limit), int(limit - (4 << 20))


def _const_spec(shape):
    """Full-array block that never changes across the (1-D) grid."""
    nd = len(shape)
    if nd == 2:
        return pl.BlockSpec(shape, lambda b: (0, 0))
    assert nd == 3
    return pl.BlockSpec(shape, lambda b: (0, 0, 0))


# ----------------------------------------------------------------------------
# Kernel 1: fused title+content CNN (+ReLU) + additive attention pooling.
# One grid step processes TB news items (titles AND contents of those items).
# ----------------------------------------------------------------------------
def _encode_group(x_ref, cw_ref, cb_ref, a1w_ref, a1b_ref, a2_ref, o_ref, n_valid):
    TB, Lp, E = x_ref.shape
    W, _, C = cw_ref.shape
    A = a1w_ref.shape[1]
    L = Lp - (W - 1)          # padded-to-8 sequence length
    N = TB * L

    # Conv1d ('same') as W accumulated matmuls over static shifted slices (bf16 in, f32 acc).
    conv = jnp.dot(x_ref[:, pl.ds(0, L), :].reshape(N, E), cw_ref[0],
                   preferred_element_type=jnp.float32)
    for k in range(1, W):
        xk = x_ref[:, pl.ds(k, L), :].reshape(N, E)
        conv = conv + jnp.dot(xk, cw_ref[k], preferred_element_type=jnp.float32)
    conv = jnp.maximum(conv + cb_ref[...], 0.0)                        # (N, C) f32

    # Additive attention (f32).
    h = jnp.tanh(jnp.dot(conv, a1w_ref[...], preferred_element_type=jnp.float32)
                 + a1b_ref[...])                                       # (N, A)
    a2row = a2_ref[...].reshape(1, 1, A)
    s2 = jnp.sum(h.reshape(TB, L, A) * a2row, axis=2)                  # (TB, L)

    # In-kernel length mask: positions >= n_valid get -1e30 (exp underflows to exactly 0).
    pos = jax.lax.broadcasted_iota(jnp.int32, (1, L), 1)
    s2 = jnp.where(pos < n_valid, s2, -1e30)

    m = jnp.max(s2, axis=1, keepdims=True)                             # exact per-item max
    e = jnp.exp(s2 - m)                                                # (TB, L)
    den = jnp.sum(e, axis=1, keepdims=True)                            # (TB, 1)
    num = jnp.sum(conv.reshape(TB, L, C) * e[:, :, None], axis=1)      # (TB, C)
    o_ref[...] = num * pl.reciprocal(den, approx=True)


def text_pair_kernel(xt_ref, xc_ref,
                     cwt_ref, cbt_ref, a1wt_ref, a1bt_ref, a2t_ref,
                     cwc_ref, cbc_ref, a1wc_ref, a1bc_ref, a2c_ref,
                     ot_ref, oc_ref, *, lt_valid, lc_valid):
    _encode_group(xt_ref, cwt_ref, cbt_ref, a1wt_ref, a1bt_ref, a2t_ref, ot_ref, lt_valid)
    _encode_group(xc_ref, cwc_ref, cbc_ref, a1wc_ref, a1bc_ref, a2c_ref, oc_ref, lc_valid)


def _prep_text(x, w_win, l_pad_to, bnp):
    """(BN, L0, E) f32 -> (bnp, l_pad_to + W - 1, E) bf16 with conv 'same' left pad."""
    bn, l0, _ = x.shape
    pad_l = (w_win - 1) // 2
    lp = l_pad_to + w_win - 1
    x = x.astype(jnp.bfloat16)
    return jnp.pad(x, ((0, bnp - bn), (pad_l, lp - pad_l - l0), (0, 0)))


def _pick_tb(bnp, lpt, lpc, e, c, a, w, budget):
    """Largest multiple-of-8 batch tile whose full per-step VMEM footprint fits the budget."""
    lt, lc = lpt - (w - 1), lpc - (w - 1)

    def step_bytes(tb):
        inp = 2 * tb * (lpt + lpc) * e * 2                  # bf16 inputs, double-buffered
        out = 2 * 2 * tb * c * 4                            # two f32 output blocks, double-buffered
        wts = 2 * 2 * (w * e * c * 2 + c * 4 + c * a * 4 + 2 * a * 4)

        def grp(l):
            n = tb * l
            return (n * e * 2                               # one shifted input slice (bf16)
                    + 2 * n * c * 4                         # conv + weighted product
                    + n * a * 4                             # attention hidden
                    + 2 * tb * l * 4)                       # scores + exp
        tmp = 2 * max(grp(lt), grp(lc))                     # 2x safety margin for temporaries
        return inp + out + wts + tmp

    for tb in (512, 256, 128, 64, 32, 16, 8):
        if bnp % tb == 0 and step_bytes(tb) <= budget:
            return tb
    return 8


def text_encode_pair(title_w, content_w, params):
    """Encode title and content with a single pallas_call. Returns (t_rep, c_rep) at BNp rows."""
    BN, Lt0, E = title_w.shape
    Lc0 = content_w.shape[1]
    W, _, C = params["title_conv_w"].shape
    A = params["title_att1_w"].shape[1]

    BNp = _ceil_to(BN, 8)
    Lt, Lc = _ceil_to(Lt0, 8), _ceil_to(Lc0, 8)
    Lpt, Lpc = Lt + W - 1, Lc + W - 1

    xt = _prep_text(title_w, W, Lt, BNp)                    # (BNp, Lpt, E) bf16
    xc = _prep_text(content_w, W, Lc, BNp)                  # (BNp, Lpc, E) bf16

    vmem_limit, budget = _vmem_budget()
    TB = _pick_tb(BNp, Lpt, Lpc, E, C, A, W, budget)
    nb = BNp // TB

    bf = jnp.bfloat16
    wargs = (params["title_conv_w"].astype(bf), params["title_conv_b"],
             params["title_att1_w"], params["title_att1_b"], params["title_att2_w"],
             params["content_conv_w"].astype(bf), params["content_conv_b"],
             params["content_att1_w"], params["content_att1_b"], params["content_att2_w"])

    kernel = functools.partial(text_pair_kernel, lt_valid=Lt0, lc_valid=Lc0)

    in_specs = ([pl.BlockSpec((TB, Lpt, E), lambda b: (b, 0, 0)),
                 pl.BlockSpec((TB, Lpc, E), lambda b: (b, 0, 0))]
                + [_const_spec(w.shape) for w in wargs])
    out_specs = [pl.BlockSpec((TB, C), lambda b: (b, 0)),
                 pl.BlockSpec((TB, C), lambda b: (b, 0))]

    t_rep, c_rep = pl.pallas_call(
        kernel,
        out_shape=(jax.ShapeDtypeStruct((BNp, C), jnp.float32),
                   jax.ShapeDtypeStruct((BNp, C), jnp.float32)),
        grid=(nb,),
        in_specs=in_specs,
        out_specs=out_specs,
        compiler_params=pltpu.CompilerParams(
            dimension_semantics=("parallel",),
            vmem_limit_bytes=vmem_limit),
    )(xt, xc, *wargs)
    return t_rep, c_rep


# ----------------------------------------------------------------------------
# Kernel 2: category/subcategory affines + 4-way fusion attention +
#           Event_Extract_dec_naml2 (MLP stacks, softmaxes, per-row MSE, event_rep).
# Batch-gridded; all (2C,C) "dense on concat" weights are passed pre-split.
# ----------------------------------------------------------------------------
def fusion_event_kernel(t_ref, c_ref, cat_ref, sub_ref,
                        catw, catb, subw, subb,
                        f1w, f1b, f2w,
                        e1w, e1b, e2wa, e2wb, e2b, e3wa, e3wb, e3b,
                        d1w, d1b, d2wa, d2wb, d2b, d3wa, d3wb, d3b,
                        s1w, s1b, s2wa, s2wb, s2b, s3wa, s3wb, s3b,
                        ecw, ecb, ccwa, ccwb, ccb,
                        ed_ref, erep_ref, ch_ref, sd_ref, sq_ref, ss_ref):
    def mm(x, w):
        return jnp.dot(x, w, preferred_element_type=jnp.float32)

    def relu(v):
        return jnp.maximum(v, 0.0)

    def softmax_last(v):
        v = v - jnp.max(v, axis=-1, keepdims=True)
        e = jnp.exp(v)
        return e * pl.reciprocal(jnp.sum(e, axis=-1, keepdims=True), approx=True)

    title = t_ref[...]
    content = c_ref[...]
    TBf, C = title.shape
    K = ecw.shape[1]

    cat_rep = relu(mm(cat_ref[...], catw[...]) + catb[...])
    sub_rep = relu(mm(sub_ref[...], subw[...]) + subb[...])

    # NAML fusion attention: one stacked matmul pair for all 4 feature channels.
    feats = jnp.concatenate([title, content, cat_rep, sub_rep], axis=0)   # (4*TBf, C)
    h = jnp.tanh(mm(feats, f1w[...]) + f1b[...])
    s = mm(h, f2w[...])                                                   # (4*TBf, 1)
    s_t, s_c, s_k, s_s = s[0:TBf], s[TBf:2 * TBf], s[2 * TBf:3 * TBf], s[3 * TBf:4 * TBf]
    m = jnp.maximum(jnp.maximum(s_t, s_c), jnp.maximum(s_k, s_s))
    e_t = jnp.exp(s_t - m)
    e_c = jnp.exp(s_c - m)
    e_k = jnp.exp(s_k - m)
    e_s = jnp.exp(s_s - m)
    inv = pl.reciprocal(e_t + e_c + e_k + e_s, approx=True)               # (TBf, 1)
    news = ((e_t * inv) * title + (e_c * inv) * content
            + (e_k * inv) * cat_rep + (e_s * inv) * sub_rep)              # (TBf, C)

    def dense(x, w, b):
        return relu(mm(x, w[...]) + b[...])

    def dense2(x, y, wa, wb, b):            # Linear(cat([x, y])) with split weights
        return relu(mm(x, wa[...]) + mm(y, wb[...]) + b[...])

    # Event_Extract_dec_naml2 (dropout = identity in eval mode)
    eh1 = dense(news, e1w, e1b)
    eh2 = dense2(news, eh1, e2wa, e2wb, e2b)
    eh3 = dense2(news, eh2, e3wa, e3wb, e3b)

    dh1 = dense(eh3, d1w, d1b)
    dh2 = dense2(eh3, dh1, d2wa, d2wb, d2b)
    event_dec = dense2(eh3, dh2, d3wa, d3wb, d3b)

    sh1 = dense(eh3, s1w, s1b)
    sh2 = dense2(eh3, sh1, s2wa, s2wb, s2b)
    style_dec = dense2(eh3, sh2, s3wa, s3wb, s3b)

    ch = softmax_last(mm(event_dec, ecw[...]) + ecb[...])                  # (TBf, K)
    ss = softmax_last(mm(style_dec, ecw[...]) + ecb[...])                  # (TBf, K)

    all_feat = mm(event_dec, ccwa[...]) + mm(style_dec, ccwb[...]) + ccb[...]
    diff = all_feat - news
    sq_ref[...] = jnp.sum(diff * diff, axis=-1, keepdims=True)             # per-row SSE

    ed_ref[...] = event_dec
    sd_ref[...] = style_dec
    ch_ref[...] = ch
    ss_ref[...] = ss
    # lane-dense (TBf, K*C) slab -> unmasked full-vreg stores; reshaped outside for free.
    erep_ref[...] = (ch[:, :, None] * event_dec[:, None, :]).reshape(TBf, K * C)


def _pick_fusion_tb(bnp):
    for tb in (256, 128, 64, 32, 16, 8):
        if bnp % tb == 0:
            return tb
    return 8


def fusion_event(t_rep, c_rep, cat_e, sub_e, p):
    BNp, C = t_rep.shape
    BN = cat_e.shape[0]
    K = p["ec_w"].shape[1]

    cat_p = jnp.pad(cat_e, ((0, BNp - BN), (0, 0)))
    sub_p = jnp.pad(sub_e, ((0, BNp - BN), (0, 0)))

    def halves(name):
        w = p[f"{name}_w"]
        return w[:C], w[C:]

    e2a, e2c = halves("e2")
    e3a, e3c = halves("e3")
    d2a, d2c = halves("d2")
    d3a, d3c = halves("d3")
    s2a, s2c = halves("s2")
    s3a, s3c = halves("s3")
    cca, ccc = halves("cc")

    act = (t_rep, c_rep, cat_p, sub_p)
    wts = (p["cat_w"], p["cat_b"], p["sub_w"], p["sub_b"],
           p["f1_w"], p["f1_b"], p["f2_w"],
           p["e1_w"], p["e1_b"], e2a, e2c, p["e2_b"], e3a, e3c, p["e3_b"],
           p["d1_w"], p["d1_b"], d2a, d2c, p["d2_b"], d3a, d3c, p["d3_b"],
           p["s1_w"], p["s1_b"], s2a, s2c, p["s2_b"], s3a, s3c, p["s3_b"],
           p["ec_w"], p["ec_b"], cca, ccc, p["cc_b"])

    TBf = _pick_fusion_tb(BNp)
    nb = BNp // TBf

    in_specs = ([pl.BlockSpec((TBf, a.shape[1]), lambda i: (i, 0)) for a in act]
                + [_const_spec(w.shape) for w in wts])
    out_shape = (
        jax.ShapeDtypeStruct((BNp, C), jnp.float32),        # event_decoder
        jax.ShapeDtypeStruct((BNp, K * C), jnp.float32),    # event_rep (lane-dense)
        jax.ShapeDtypeStruct((BNp, K), jnp.float32),        # channel_softmax
        jax.ShapeDtypeStruct((BNp, C), jnp.float32),        # style_decoder
        jax.ShapeDtypeStruct((BNp, 1), jnp.float32),        # per-row squared-error sum
        jax.ShapeDtypeStruct((BNp, K), jnp.float32),        # style_softmax
    )
    out_specs = [
        pl.BlockSpec((TBf, C), lambda i: (i, 0)),
        pl.BlockSpec((TBf, K * C), lambda i: (i, 0)),
        pl.BlockSpec((TBf, K), lambda i: (i, 0)),
        pl.BlockSpec((TBf, C), lambda i: (i, 0)),
        pl.BlockSpec((TBf, 1), lambda i: (i, 0)),
        pl.BlockSpec((TBf, K), lambda i: (i, 0)),
    ]
    return pl.pallas_call(
        fusion_event_kernel,
        out_shape=out_shape,
        grid=(nb,),
        in_specs=in_specs,
        out_specs=out_specs,
        compiler_params=pltpu.CompilerParams(dimension_semantics=("parallel",)),
    )(*act, *wts)


# ----------------------------------------------------------------------------
# Full forward (glue in plain JAX: embedding gathers, padding, reshapes)
# ----------------------------------------------------------------------------
def event_naml_dsc2_forward(params, title_text, title_mask, title_entity,
                            content_text, content_mask, content_entity,
                            category, subCategory, user_embedding, cfg):
    B, N = title_text.shape[:2]
    BN = B * N
    E, C, K = cfg["E"], cfg["C"], cfg["K"]

    title_w = params["word_emb"][title_text].reshape(BN, cfg["Lt"], E)
    content_w = params["word_emb"][content_text].reshape(BN, cfg["Lc"], E)

    t_rep, c_rep = text_encode_pair(title_w, content_w, params)         # (BNp, C) each

    cat_e = params["cat_emb"][category].reshape(BN, -1)
    sub_e = params["sub_emb"][subCategory].reshape(BN, -1)

    ed, erep2d, ch, sd, sq, ss = fusion_event(t_rep, c_rep, cat_e, sub_e, params)

    loss = jnp.sum(sq[:BN, 0]) / jnp.float32(BN * C)                    # exact MSE over real rows
    return [ed[:BN].reshape(B, N, C),
            erep2d[:BN].reshape(B, N, K, C),
            ch[:BN].reshape(B, N, K),
            sd[:BN].reshape(B, N, C),
            loss,
            ss[:BN].reshape(B, N, K)]


# ----------------------------------------------------------------------------
# Pure-JAX reference (mirrors the PyTorch forward semantics)
# ----------------------------------------------------------------------------
def ref_forward(params, title_text, content_text, category, subCategory, cfg):
    B, N = title_text.shape[:2]
    BN = B * N
    E, C, A, K = cfg["E"], cfg["C"], cfg["A"], cfg["K"]

    def enc(x, pre):
        conv_w = params[f"{pre}_conv_w"]
        conv_b = params[f"{pre}_conv_b"]
        W = conv_w.shape[0]
        pad = (W - 1) // 2
        L = x.shape[1]
        xp = jnp.pad(x, ((0, 0), (pad, W - 1 - pad), (0, 0)))
        out = jnp.zeros((x.shape[0], L, C), jnp.float32)
        for k in range(W):
            out = out + jnp.einsum("ble,ec->blc", xp[:, k:k + L], conv_w[k])
        conv = jnp.maximum(out + conv_b[None], 0.0)
        h = jnp.tanh(jnp.einsum("blc,ca->bla", conv, params[f"{pre}_att1_w"])
                     + params[f"{pre}_att1_b"][None])
        s = jnp.einsum("bla,ao->bl", h, params[f"{pre}_att2_w"])
        alpha = jax.nn.softmax(s, axis=-1)
        return jnp.einsum("bl,blc->bc", alpha, conv)

    tw = params["word_emb"][title_text].reshape(BN, cfg["Lt"], E)
    cw = params["word_emb"][content_text].reshape(BN, cfg["Lc"], E)
    t_rep = enc(tw, "title")
    c_rep = enc(cw, "content")

    cat_e = params["cat_emb"][category].reshape(BN, -1)
    sub_e = params["sub_emb"][subCategory].reshape(BN, -1)
    cat_rep = jax.nn.relu(cat_e @ params["cat_w"] + params["cat_b"])
    sub_rep = jax.nn.relu(sub_e @ params["sub_w"] + params["sub_b"])

    feature = jnp.stack([t_rep, c_rep, cat_rep, sub_rep], axis=1)         # (BN, 4, C)
    scr = jnp.einsum("bfa,ao->bf",
                     jnp.tanh(jnp.einsum("bfc,ca->bfa", feature, params["f1_w"])
                              + params["f1_b"][None]),
                     params["f2_w"])
    alpha = jax.nn.softmax(scr, axis=1)[..., None]
    news = (feature * alpha).sum(axis=1)

    def lin(x, nm):
        return x @ params[f"{nm}_w"] + params[f"{nm}_b"]

    eh1 = jax.nn.relu(lin(news, "e1"))
    eh2 = jax.nn.relu(lin(jnp.concatenate([news, eh1], -1), "e2"))
    eh3 = jax.nn.relu(lin(jnp.concatenate([news, eh2], -1), "e3"))
    dh1 = jax.nn.relu(lin(eh3, "d1"))
    dh2 = jax.nn.relu(lin(jnp.concatenate([eh3, dh1], -1), "d2"))
    event_dec = jax.nn.relu(lin(jnp.concatenate([eh3, dh2], -1), "d3"))
    sh1 = jax.nn.relu(lin(eh3, "s1"))
    sh2 = jax.nn.relu(lin(jnp.concatenate([eh3, sh1], -1), "s2"))
    style_dec = jax.nn.relu(lin(jnp.concatenate([eh3, sh2], -1), "s3"))
    ch = jax.nn.softmax(lin(event_dec, "ec"), axis=-1)
    ss = jax.nn.softmax(lin(style_dec, "ec"), axis=-1)
    all_feat = lin(jnp.concatenate([event_dec, style_dec], -1), "cc")
    loss = jnp.mean((all_feat - news) ** 2)
    event_rep = ch[:, :, None] * event_dec[:, None, :]
    return [event_dec.reshape(B, N, C), event_rep.reshape(B, N, K, C),
            ch.reshape(B, N, K), style_dec.reshape(B, N, C), loss,
            ss.reshape(B, N, K)]


# ----------------------------------------------------------------------------
# Deterministic parameter init
# ----------------------------------------------------------------------------
def init_params(key, cfg):
    keys = iter(jax.random.split(key, 64))

    def nrm(shape, scale=0.05):
        return jax.random.normal(next(keys), shape, jnp.float32) * scale

    E, C, A, K, W = cfg["E"], cfg["C"], cfg["A"], cfg["K"], cfg["W"]
    p = {}
    p["word_emb"] = nrm((cfg["vocab"], E), 0.1)
    p["cat_emb"] = nrm((cfg["n_cat"], cfg["cat_dim"]), 0.1)
    p["sub_emb"] = nrm((cfg["n_sub"], cfg["sub_dim"]), 0.1)
    for name in ("title", "content"):
        p[f"{name}_conv_w"] = nrm((W, E, C))
        p[f"{name}_conv_b"] = nrm((1, C))
        p[f"{name}_att1_w"] = nrm((C, A))
        p[f"{name}_att1_b"] = nrm((1, A))
        p[f"{name}_att2_w"] = nrm((A, 1))
    p["cat_w"] = nrm((cfg["cat_dim"], C)); p["cat_b"] = nrm((1, C))
    p["sub_w"] = nrm((cfg["sub_dim"], C)); p["sub_b"] = nrm((1, C))
    p["f1_w"] = nrm((C, A)); p["f1_b"] = nrm((1, A))
    p["f2_w"] = nrm((A, 1))
    for nm in ("e1", "d1", "s1"):
        p[f"{nm}_w"] = nrm((C, C)); p[f"{nm}_b"] = nrm((1, C))
    for nm in ("e2", "e3", "d2", "d3", "s2", "s3", "cc"):
        p[f"{nm}_w"] = nrm((2 * C, C)); p[f"{nm}_b"] = nrm((1, C))
    p["ec_w"] = nrm((C, K)); p["ec_b"] = nrm((1, K))
    return p


# ----------------------------------------------------------------------------
if __name__ == "__main__":
    cfg = dict(vocab=100, E=32, C=64, W=3, A=32, K=8,
               cat_dim=16, sub_dim=16, n_cat=10, n_sub=12,
               Lt=16, Lc=24, B=2, N=3)

    key = jax.random.PRNGKey(0)
    pkey, ikey = jax.random.split(key)
    params = init_params(pkey, cfg)

    k1, k2, k3, k4 = jax.random.split(ikey, 4)
    title_text = jax.random.randint(k1, (cfg["B"], cfg["N"], cfg["Lt"]), 0, cfg["vocab"])
    content_text = jax.random.randint(k2, (cfg["B"], cfg["N"], cfg["Lc"]), 0, cfg["vocab"])
    category = jax.random.randint(k3, (cfg["B"], cfg["N"]), 0, cfg["n_cat"])
    subCategory = jax.random.randint(k4, (cfg["B"], cfg["N"]), 0, cfg["n_sub"])

    outputs = event_naml_dsc2_forward(params, title_text, None, None,
                                      content_text, None, None,
                                      category, subCategory, None, cfg)
    jax.block_until_ready(outputs)

    refs = ref_forward(params, title_text, content_text, category, subCategory, cfg)
    for o, r in zip(outputs, refs):
        np.testing.assert_allclose(np.asarray(o), np.asarray(r), rtol=5e-2, atol=3e-3)

    print("KERNEL_OK")
</pallas_src>

<mosaic_0001>
module attributes {stable_mosaic.version = 11 : i64} {
  func.func @text_pair_kernel(%arg0: i32, %arg1: memref<8x18x32xbf16, #tpu.memory_space<vmem>>, %arg2: memref<8x26x32xbf16, #tpu.memory_space<vmem>>, %arg3: memref<3x32x64xbf16, #tpu.memory_space<vmem>>, %arg4: memref<1x64xf32, #tpu.memory_space<vmem>>, %arg5: memref<64x32xf32, #tpu.memory_space<vmem>>, %arg6: memref<1x32xf32, #tpu.memory_space<vmem>>, %arg7: memref<32x1xf32, #tpu.memory_space<vmem>>, %arg8: memref<3x32x64xbf16, #tpu.memory_space<vmem>>, %arg9: memref<1x64xf32, #tpu.memory_space<vmem>>, %arg10: memref<64x32xf32, #tpu.memory_space<vmem>>, %arg11: memref<1x32xf32, #tpu.memory_space<vmem>>, %arg12: memref<32x1xf32, #tpu.memory_space<vmem>>, %arg13: memref<8x64xf32, #tpu.memory_space<vmem>>, %arg14: memref<8x64xf32, #tpu.memory_space<vmem>>) attributes {dimension_semantics = [#tpu.dimension_semantics<parallel>], iteration_bounds = array<i64: 1>, scalar_prefetch = 0 : i64, scratch_operands = 0 : i64, tpu.core_type = #tpu.core_type<tc>, window_params = [{transform_indices = @transform_0, window_bounds = array<i64: 8, 18, 32>}, {transform_indices = @transform_1, window_bounds = array<i64: 8, 26, 32>}, {pipeline_mode = #tpu.pipeline_mode<synchronous>, transform_indices = @transform_2, window_bounds = array<i64: 3, 32, 64>}, {pipeline_mode = #tpu.pipeline_mode<synchronous>, transform_indices = @transform_3, window_bounds = array<i64: 1, 64>}, {pipeline_mode = #tpu.pipeline_mode<synchronous>, transform_indices = @transform_4, window_bounds = array<i64: 64, 32>}, {pipeline_mode = #tpu.pipeline_mode<synchronous>, transform_indices = @transform_5, window_bounds = array<i64: 1, 32>}, {pipeline_mode = #tpu.pipeline_mode<synchronous>, transform_indices = @transform_6, window_bounds = array<i64: 32, 1>}, {pipeline_mode = #tpu.pipeline_mode<synchronous>, transform_indices = @transform_7, window_bounds = array<i64: 3, 32, 64>}, {pipeline_mode = #tpu.pipeline_mode<synchronous>, transform_indices = @transform_8, window_bounds = array<i64: 1, 64>}, {pipeline_mode = #tpu.pipeline_mode<synchronous>, transform_indices = @transform_9, window_bounds = array<i64: 64, 32>}, {pipeline_mode = #tpu.pipeline_mode<synchronous>, transform_indices = @transform_10, window_bounds = array<i64: 1, 32>}, {pipeline_mode = #tpu.pipeline_mode<synchronous>, transform_indices = @transform_11, window_bounds = array<i64: 32, 1>}, {transform_indices = @transform_12, window_bounds = array<i64: 8, 64>}, {transform_indices = @transform_13, window_bounds = array<i64: 8, 64>}]} {
    %c0 = arith.constant 0 : index
    %c0_0 = arith.constant 0 : index
    %c0_1 = arith.constant 0 : index
    %0 = vector.load %arg1[%c0, %c0_0, %c0_1] : memref<8x18x32xbf16, #tpu.memory_space<vmem>>, vector<8x16x32xbf16>
    %1 = vector.shape_cast %0 : vector<8x16x32xbf16> to vector<128x32xbf16>
    %c0_2 = arith.constant 0 : index
    %c0_3 = arith.constant 0 : index
    %c0_4 = arith.constant 0 : index
    %2 = vector.load %arg3[%c0_2, %c0_3, %c0_4] : memref<3x32x64xbf16, #tpu.memory_space<vmem>>, vector<1x32x64xbf16>
    %3 = vector.shape_cast %2 : vector<1x32x64xbf16> to vector<32x64xbf16>
    %cst = arith.constant dense<0.000000e+00> : vector<128x64xf32>
    %4 = tpu.matmul %1, %3, %cst {dimension_numbers = #tpu.dot_dimension_numbers<[1], [0], [0], [1], [0, 0, 1, 1], [], []>} : vector<128x32xbf16>, vector<32x64xbf16>, vector<128x64xf32> -> vector<128x64xf32>
    %c0_5 = arith.constant 0 : index
    %c1 = arith.constant 1 : index
    %c0_6 = arith.constant 0 : index
    %5 = vector.load %arg1[%c0_5, %c1, %c0_6] : memref<8x18x32xbf16, #tpu.memory_space<vmem>>, vector<8x16x32xbf16>
    %6 = vector.shape_cast %5 : vector<8x16x32xbf16> to vector<128x32xbf16>
    %c1_7 = arith.constant 1 : index
    %c0_8 = arith.constant 0 : index
    %c0_9 = arith.constant 0 : index
    %7 = vector.load %arg3[%c1_7, %c0_8, %c0_9] : memref<3x32x64xbf16, #tpu.memory_space<vmem>>, vector<1x32x64xbf16>
    %8 = vector.shape_cast %7 : vector<1x32x64xbf16> to vector<32x64xbf16>
    %cst_10 = arith.constant dense<0.000000e+00> : vector<128x64xf32>
    %9 = tpu.matmul %6, %8, %cst_10 {dimension_numbers = #tpu.dot_dimension_numbers<[1], [0], [0], [1], [0, 0, 1, 1], [], []>} : vector<128x32xbf16>, vector<32x64xbf16>, vector<128x64xf32> -> vector<128x64xf32>
    %10 = arith.addf %4, %9 : vector<128x64xf32>
    %c0_11 = arith.constant 0 : index
    %c2 = arith.constant 2 : index
    %c0_12 = arith.constant 0 : index
    %11 = vector.load %arg1[%c0_11, %c2, %c0_12] : memref<8x18x32xbf16, #tpu.memory_space<vmem>>, vector<8x16x32xbf16>
    %12 = vector.shape_cast %11 : vector<8x16x32xbf16> to vector<128x32xbf16>
    %c2_13 = arith.constant 2 : index
    %c0_14 = arith.constant 0 : index
    %c0_15 = arith.constant 0 : index
    %13 = vector.load %arg3[%c2_13, %c0_14, %c0_15] : memref<3x32x64xbf16, #tpu.memory_space<vmem>>, vector<1x32x64xbf16>
    %14 = vector.shape_cast %13 : vector<1x32x64xbf16> to vector<32x64xbf16>
    %cst_16 = arith.constant dense<0.000000e+00> : vector<128x64xf32>
    %15 = tpu.matmul %12, %14, %cst_16 {dimension_numbers = #tpu.dot_dimension_numbers<[1], [0], [0], [1], [0, 0, 1, 1], [], []>} : vector<128x32xbf16>, vector<32x64xbf16>, vector<128x64xf32> -> vector<128x64xf32>
    %16 = arith.addf %10, %15 : vector<128x64xf32>
    %c0_17 = arith.constant 0 : index
    %c0_18 = arith.constant 0 : index
    %17 = vector.load %arg4[%c0_17, %c0_18] : memref<1x64xf32, #tpu.memory_space<vmem>>, vector<1x64xf32>
    %18 = vector.broadcast %17 : vector<1x64xf32> to vector<128x64xf32>
    %19 = arith.addf %16, %18 : vector<128x64xf32>
    %cst_19 = arith.constant 0.000000e+00 : f32
    %20 = vector.broadcast %cst_19 : f32 to vector<128x64xf32>
    %21 = arith.maximumf %19, %20 : vector<128x64xf32>
    %c0_20 = arith.constant 0 : index
    %c0_21 = arith.constant 0 : index
    %22 = vector.load %arg5[%c0_20, %c0_21] : memref<64x32xf32, #tpu.memory_space<vmem>>, vector<64x32xf32>
    %cst_22 = arith.constant dense<0.000000e+00> : vector<128x32xf32>
    %23 = tpu.matmul %21, %22, %cst_22 {dimension_numbers = #tpu.dot_dimension_numbers<[1], [0], [0], [1], [0, 0, 1, 1], [], []>} : vector<128x64xf32>, vector<64x32xf32>, vector<128x32xf32> -> vector<128x32xf32>
    %c0_23 = arith.constant 0 : index
    %c0_24 = arith.constant 0 : index
    %24 = vector.load %arg6[%c0_23, %c0_24] : memref<1x32xf32, #tpu.memory_space<vmem>>, vector<1x32xf32>
    %25 = vector.broadcast %24 : vector<1x32xf32> to vector<128x32xf32>
    %26 = arith.addf %23, %25 : vector<128x32xf32>
    %27 = math.tanh %26 : vector<128x32xf32>
    %c0_25 = arith.constant 0 : index
    %c0_26 = arith.constant 0 : index
    %28 = vector.load %arg7[%c0_25, %c0_26] : memref<32x1xf32, #tpu.memory_space<vmem>>, vector<32x1xf32>
    %29 = vector.shape_cast %28 : vector<32x1xf32> to vector<1x1x32xf32>
    %30 = vector.shape_cast %27 : vector<128x32xf32> to vector<8x16x32xf32>
    %31 = vector.broadcast %29 : vector<1x1x32xf32> to vector<8x16x32xf32>
    %32 = arith.mulf %30, %31 : vector<8x16x32xf32>
    %cst_27 = arith.constant dense<0.000000e+00> : vector<8x16xf32>
    %33 = vector.multi_reduction <add>, %32, %cst_27 [2] : vector<8x16x32xf32> to vector<8x16xf32>
    %34 = tpu.iota {dimensions = array<i32: 1>} : vector<1x16xi32>
    %c16_i32 = arith.constant 16 : i32
    %35 = vector.broadcast %c16_i32 : i32 to vector<1x16xi32>
    %36 = arith.cmpi slt, %34, %35 : vector<1x16xi32>
    %cst_28 = arith.constant -1.000000e+30 : f32
    %37 = vector.shape_cast %36 : vector<1x16xi1> to vector<1x16xi1>
    %38 = vector.broadcast %37 : vector<1x16xi1> to vector<8x16xi1>
    %39 = vector.broadcast %cst_28 : f32 to vector<8x16xf32>
    %40 = arith.select %38, %33, %39 : vector<8x16xi1>, vector<8x16xf32>
    %cst_29 = arith.constant dense<0xFF800000> : vector<8xf32>
    %41 = vector.multi_reduction <maximumf>, %40, %cst_29 [1] : vector<8x16xf32> to vector<8xf32>
    %42 = vector.shape_cast %41 : vector<8xf32> to vector<8x1xf32>
    %43 = vector.broadcast %42 : vector<8x1xf32> to vector<8x16xf32>
    %44 = arith.subf %40, %43 : vector<8x16xf32>
    %45 = math.exp %44 : vector<8x16xf32>
    %cst_30 = arith.constant dense<0.000000e+00> : vector<8xf32>
    %46 = vector.multi_reduction <add>, %45, %cst_30 [1] : vector<8x16xf32> to vector<8xf32>
    %47 = vector.shape_cast %46 : vector<8xf32> to vector<8x1xf32>
    %48 = vector.shape_cast %21 : vector<128x64xf32> to vector<8x16x64xf32>
    %49 = vector.shape_cast %45 : vector<8x16xf32> to vector<8x16x1xf32>
    %50 = vector.broadcast %49 : vector<8x16x1xf32> to vector<8x16x64xf32>
    %51 = arith.mulf %48, %50 : vector<8x16x64xf32>
    %cst_31 = arith.constant dense<0.000000e+00> : vector<8x64xf32>
    %52 = vector.multi_reduction <add>, %51, %cst_31 [1] : vector<8x16x64xf32> to vector<8x64xf32>
    %53 = tpu.reciprocal %47 {approx = true} : vector<8x1xf32> -> vector<8x1xf32>
    %54 = vector.broadcast %53 : vector<8x1xf32> to vector<8x64xf32>
    %55 = arith.mulf %52, %54 : vector<8x64xf32>
    %c0_32 = arith.constant 0 : index
    %c0_33 = arith.constant 0 : index
    %56 = vector.load %arg13[%c0_32, %c0_33] : memref<8x64xf32, #tpu.memory_space<vmem>>, vector<8x64xf32>
    tpu.vector_store %arg13[%c0_32, %c0_33], %55 {strides = array<i32>} : memref<8x64xf32, #tpu.memory_space<vmem>>, vector<8x64xf32>,
    %c0_34 = arith.constant 0 : index
    %c0_35 = arith.constant 0 : index
    %c0_36 = arith.constant 0 : index
    %57 = vector.load %arg2[%c0_34, %c0_35, %c0_36] : memref<8x26x32xbf16, #tpu.memory_space<vmem>>, vector<8x24x32xbf16>
    %58 = vector.shape_cast %57 : vector<8x24x32xbf16> to vector<192x32xbf16>
    %c0_37 = arith.constant 0 : index
    %c0_38 = arith.constant 0 : index
    %c0_39 = arith.constant 0 : index
    %59 = vector.load %arg8[%c0_37, %c0_38, %c0_39] : memref<3x32x64xbf16, #tpu.memory_space<vmem>>, vector<1x32x64xbf16>
    %60 = vector.shape_cast %59 : vector<1x32x64xbf16> to vector<32x64xbf16>
    %cst_40 = arith.constant dense<0.000000e+00> : vector<192x64xf32>
    %61 = tpu.matmul %58, %60, %cst_40 {dimension_numbers = #tpu.dot_dimension_numbers<[1], [0], [0], [1], [0, 0, 1, 1], [], []>} : vector<192x32xbf16>, vector<32x64xbf16>, vector<192x64xf32> -> vector<192x64xf32>
    %c0_41 = arith.constant 0 : index
    %c1_42 = arith.constant 1 : index
    %c0_43 = arith.constant 0 : index
    %62 = vector.load %arg2[%c0_41, %c1_42, %c0_43] : memref<8x26x32xbf16, #tpu.memory_space<vmem>>, vector<8x24x32xbf16>
    %63 = vector.shape_cast %62 : vector<8x24x32xbf16> to vector<192x32xbf16>
    %c1_44 = arith.constant 1 : index
    %c0_45 = arith.constant 0 : index
    %c0_46 = arith.constant 0 : index
    %64 = vector.load %arg8[%c1_44, %c0_45, %c0_46] : memref<3x32x64xbf16, #tpu.memory_space<vmem>>, vector<1x32x64xbf16>
    %65 = vector.shape_cast %64 : vector<1x32x64xbf16> to vector<32x64xbf16>
    %cst_47 = arith.constant dense<0.000000e+00> : vector<192x64xf32>
    %66 = tpu.matmul %63, %65, %cst_47 {dimension_numbers = #tpu.dot_dimension_numbers<[1], [0], [0], [1], [0, 0, 1, 1], [], []>} : vector<192x32xbf16>, vector<32x64xbf16>, vector<192x64xf32> -> vector<192x64xf32>
    %67 = arith.addf %61, %66 : vector<192x64xf32>
    %c0_48 = arith.constant 0 : index
    %c2_49 = arith.constant 2 : index
    %c0_50 = arith.constant 0 : index
    %68 = vector.load %arg2[%c0_48, %c2_49, %c0_50] : memref<8x26x32xbf16, #tpu.memory_space<vmem>>, vector<8x24x32xbf16>
    %69 = vector.shape_cast %68 : vector<8x24x32xbf16> to vector<192x32xbf16>
    %c2_51 = arith.constant 2 : index
    %c0_52 = arith.constant 0 : index
    %c0_53 = arith.constant 0 : index
    %70 = vector.load %arg8[%c2_51, %c0_52, %c0_53] : memref<3x32x64xbf16, #tpu.memory_space<vmem>>, vector<1x32x64xbf16>
    %71 = vector.shape_cast %70 : vector<1x32x64xbf16> to vector<32x64xbf16>
    %cst_54 = arith.constant dense<0.000000e+00> : vector<192x64xf32>
    %72 = tpu.matmul %69, %71, %cst_54 {dimension_numbers = #tpu.dot_dimension_numbers<[1], [0], [0], [1], [0, 0, 1, 1], [], []>} : vector<192x32xbf16>, vector<32x64xbf16>, vector<192x64xf32> -> vector<192x64xf32>
    %73 = arith.addf %67, %72 : vector<192x64xf32>
    %c0_55 = arith.constant 0 : index
    %c0_56 = arith.constant 0 : index
    %74 = vector.load %arg9[%c0_55, %c0_56] : memref<1x64xf32, #tpu.memory_space<vmem>>, vector<1x64xf32>
    %75 = vector.broadcast %74 : vector<1x64xf32> to vector<192x64xf32>
    %76 = arith.addf %73, %75 : vector<192x64xf32>
    %cst_57 = arith.constant 0.000000e+00 : f32
    %77 = vector.broadcast %cst_57 : f32 to vector<192x64xf32>
    %78 = arith.maximumf %76, %77 : vector<192x64xf32>
    %c0_58 = arith.constant 0 : index
    %c0_59 = arith.constant 0 : index
    %79 = vector.load %arg10[%c0_58, %c0_59] : memref<64x32xf32, #tpu.memory_space<vmem>>, vector<64x32xf32>
    %cst_60 = arith.constant dense<0.000000e+00> : vector<192x32xf32>
    %80 = tpu.matmul %78, %79, %cst_60 {dimension_numbers = #tpu.dot_dimension_numbers<[1], [0], [0], [1], [0, 0, 1, 1], [], []>} : vector<192x64xf32>, vector<64x32xf32>, vector<192x32xf32> -> vector<192x32xf32>
    %c0_61 = arith.constant 0 : index
    %c0_62 = arith.constant 0 : index
    %81 = vector.load %arg11[%c0_61, %c0_62] : memref<1x32xf32, #tpu.memory_space<vmem>>, vector<1x32xf32>
    %82 = vector.broadcast %81 : vector<1x32xf32> to vector<192x32xf32>
    %83 = arith.addf %80, %82 : vector<192x32xf32>
    %84 = math.tanh %83 : vector<192x32xf32>
    %c0_63 = arith.constant 0 : index
    %c0_64 = arith.constant 0 : index
    %85 = vector.load %arg12[%c0_63, %c0_64] : memref<32x1xf32, #tpu.memory_space<vmem>>, vector<32x1xf32>
    %86 = vector.shape_cast %85 : vector<32x1xf32> to vector<1x1x32xf32>
    %87 = vector.shape_cast %84 : vector<192x32xf32> to vector<8x24x32xf32>
    %88 = vector.broadcast %86 : vector<1x1x32xf32> to vector<8x24x32xf32>
    %89 = arith.mulf %87, %88 : vector<8x24x32xf32>
    %cst_65 = arith.constant dense<0.000000e+00> : vector<8x24xf32>
    %90 = vector.multi_reduction <add>, %89, %cst_65 [2] : vector<8x24x32xf32> to vector<8x24xf32>
    %91 = tpu.iota {dimensions = array<i32: 1>} : vector<1x24xi32>
    %c24_i32 = arith.constant 24 : i32
    %92 = vector.broadcast %c24_i32 : i32 to vector<1x24xi32>
    %93 = arith.cmpi slt, %91, %92 : vector<1x24xi32>
    %cst_66 = arith.constant -1.000000e+30 : f32
    %94 = vector.shape_cast %93 : vector<1x24xi1> to vector<1x24xi1>
    %95 = vector.broadcast %94 : vector<1x24xi1> to vector<8x24xi1>
    %96 = vector.broadcast %cst_66 : f32 to vector<8x24xf32>
    %97 = arith.select %95, %90, %96 : vector<8x24xi1>, vector<8x24xf32>
    %cst_67 = arith.constant dense<0xFF800000> : vector<8xf32>
    %98 = vector.multi_reduction <maximumf>, %97, %cst_67 [1] : vector<8x24xf32> to vector<8xf32>
    %99 = vector.shape_cast %98 : vector<8xf32> to vector<8x1xf32>
    %100 = vector.broadcast %99 : vector<8x1xf32> to vector<8x24xf32>
    %101 = arith.subf %97, %100 : vector<8x24xf32>
    %102 = math.exp %101 : vector<8x24xf32>
    %cst_68 = arith.constant dense<0.000000e+00> : vector<8xf32>
    %103 = vector.multi_reduction <add>, %102, %cst_68 [1] : vector<8x24xf32> to vector<8xf32>
    %104 = vector.shape_cast %103 : vector<8xf32> to vector<8x1xf32>
    %105 = vector.shape_cast %78 : vector<192x64xf32> to vector<8x24x64xf32>
    %106 = vector.shape_cast %102 : vector<8x24xf32> to vector<8x24x1xf32>
    %107 = vector.broadcast %106 : vector<8x24x1xf32> to vector<8x24x64xf32>
    %108 = arith.mulf %105, %107 : vector<8x24x64xf32>
    %cst_69 = arith.constant dense<0.000000e+00> : vector<8x64xf32>
    %109 = vector.multi_reduction <add>, %108, %cst_69 [1] : vector<8x24x64xf32> to vector<8x64xf32>
    %110 = tpu.reciprocal %104 {approx = true} : vector<8x1xf32> -> vector<8x1xf32>
    %111 = vector.broadcast %110 : vector<8x1xf32> to vector<8x64xf32>
    %112 = arith.mulf %109, %111 : vector<8x64xf32>
    %c0_70 = arith.constant 0 : index
    %c0_71 = arith.constant 0 : index
    %113 = vector.load %arg14[%c0_70, %c0_71] : memref<8x64xf32, #tpu.memory_space<vmem>>, vector<8x64xf32>
    tpu.vector_store %arg14[%c0_70, %c0_71], %112 {strides = array<i32>} : memref<8x64xf32, #tpu.memory_space<vmem>>, vector<8x64xf32>,
    return
  }
  func.func @transform_0(%arg0: i32) -> (i32, i32, i32) {
    %c0_i32 = arith.constant 0 : i32
    %c0_i32_0 = arith.constant 0 : i32
    %c0_i32_1 = arith.constant 0 : i32
    return %arg0, %c0_i32, %c0_i32_0 : i32, i32, i32
  }
  func.func @transform_1(%arg0: i32) -> (i32, i32, i32) {
    %c0_i32 = arith.constant 0 : i32
    %c0_i32_0 = arith.constant 0 : i32
    %c0_i32_1 = arith.constant 0 : i32
    return %arg0, %c0_i32, %c0_i32_0 : i32, i32, i32
  }
  func.func @transform_2(%arg0: i32) -> (i32, i32, i32) {
    %c0_i32 = arith.constant 0 : i32
    %c0_i32_0 = arith.constant 0 : i32
    %c0_i32_1 = arith.constant 0 : i32
    %c0_i32_2 = arith.constant 0 : i32
    return %c0_i32, %c0_i32_0, %c0_i32_1 : i32, i32, i32
  }
  func.func @transform_3(%arg0: i32) -> (i32, i32) {
    %c0_i32 = arith.constant 0 : i32
    %c0_i32_0 = arith.constant 0 : i32
    %c0_i32_1 = arith.constant 0 : i32
    return %c0_i32, %c0_i32_0 : i32, i32
  }
  func.func @transform_4(%arg0: i32) -> (i32, i32) {
    %c0_i32 = arith.constant 0 : i32
    %c0_i32_0 = arith.constant 0 : i32
    %c0_i32_1 = arith.constant 0 : i32
    return %c0_i32, %c0_i32_0 : i32, i32
  }
  func.func @transform_5(%arg0: i32) -> (i32, i32) {
    %c0_i32 = arith.constant 0 : i32
    %c0_i32_0 = arith.constant 0 : i32
    %c0_i32_1 = arith.constant 0 : i32
    return %c0_i32, %c0_i32_0 : i32, i32
  }
  func.func @transform_6(%arg0: i32) -> (i32, i32) {
    %c0_i32 = arith.constant 0 : i32
    %c0_i32_0 = arith.constant 0 : i32
    %c0_i32_1 = arith.constant 0 : i32
    return %c0_i32, %c0_i32_0 : i32, i32
  }
  func.func @transform_7(%arg0: i32) -> (i32, i32, i32) {
    %c0_i32 = arith.constant 0 : i32
    %c0_i32_0 = arith.constant 0 : i32
    %c0_i32_1 = arith.constant 0 : i32
    %c0_i32_2 = arith.constant 0 : i32
    return %c0_i32, %c0_i32_0, %c0_i32_1 : i32, i32, i32
  }
  func.func @transform_8(%arg0: i32) -> (i32, i32) {
    %c0_i32 = arith.constant 0 : i32
    %c0_i32_0 = arith.constant 0 : i32
    %c0_i32_1 = arith.constant 0 : i32
    return %c0_i32, %c0_i32_0 : i32, i32
  }
  func.func @transform_9(%arg0: i32) -> (i32, i32) {
    %c0_i32 = arith.constant 0 : i32
    %c0_i32_0 = arith.constant 0 : i32
    %c0_i32_1 = arith.constant 0 : i32
    return %c0_i32, %c0_i32_0 : i32, i32
  }
  func.func @transform_10(%arg0: i32) -> (i32, i32) {
    %c0_i32 = arith.constant 0 : i32
    %c0_i32_0 = arith.constant 0 : i32
    %c0_i32_1 = arith.constant 0 : i32
    return %c0_i32, %c0_i32_0 : i32, i32
  }
  func.func @transform_11(%arg0: i32) -> (i32, i32) {
    %c0_i32 = arith.constant 0 : i32
    %c0_i32_0 = arith.constant 0 : i32
    %c0_i32_1 = arith.constant 0 : i32
    return %c0_i32, %c0_i32_0 : i32, i32
  }
  func.func @transform_12(%arg0: i32) -> (i32, i32) {
    %c0_i32 = arith.constant 0 : i32
    %c0_i32_0 = arith.constant 0 : i32
    return %arg0, %c0_i32 : i32, i32
  }
  func.func @transform_13(%arg0: i32) -> (i32, i32) {
    %c0_i32 = arith.constant 0 : i32
    %c0_i32_0 = arith.constant 0 : i32
    return %arg0, %c0_i32 : i32, i32
  }
}

</mosaic_0001>

<bundles_post_ra>
// kernel: tpu_custom_call.1
= control target key start
LH: loop header
LB: loop body
LE: loop exit
PB: predicated region body
PF: predicated region fallthrough
CT: control target
= control target key end

     0   :  { %19 = vsyncpa [#allocation3], 0  ;;  %vm533_vm0 = vcmask 1042432   ;;  %vm534_vm1 = vcmask 1046532   ;;  %vm310_vm2 = vcmask 261120   ;;  %s5053_s0 = inlined_call_operand.vmem [shape: bf16[8,18,32], index: 0, kind: input, shape index: {}]   ;;  %s5054_s1 = inlined_call_operand.vmem [shape: bf16[8,26,32], index: 1, kind: input, shape index: {}]   ;;  %s5055_s2 = inlined_call_operand.vmem [shape: bf16[3,32,64], index: 2, kind: input, shape index: {}]   ;;  %s5056_s3 = inlined_call_operand.vmem [shape: f32[1,64], index: 3, kind: input, shape index: {}]   ;;  %s5057_s4 = inlined_call_operand.vmem [shape: f32[64,32], index: 4, kind: input, shape index: {}]   ;;  %s5058_s5 = inlined_call_operand.vmem [shape: f32[1,32], index: 5, kind: input, shape index: {}]   ;;  %s5059_s6 = inlined_call_operand.vmem [shape: f32[32,1], index: 6, kind: input, shape index: {}]   ;;  %s5060_s7 = inlined_call_operand.vmem [shape: bf16[3,32,64], index: 7, kind: input, shape index: {}]   ;;  %s5061_s8 = inlined_call_operand.vmem [shape: f32[1,64], index: 8, kind: input, shape index: {}]   ;;  %s5062_s9 = inlined_call_operand.vmem [shape: f32[64,32], index: 9, kind: input, shape index: {}]   ;;  %s5063_s10 = inlined_call_operand.vmem [shape: f32[1,32], index: 10, kind: input, shape index: {}]   ;;  %s5064_s11 = inlined_call_operand.vmem [shape: f32[32,1], index: 11, kind: input, shape index: {}]   ;;  %s5065_s12 = inlined_call_operand.hbm [shape: f32[8,64], index: 12, kind: output, shape index: {0}]   ;;  %s5066_s13 = inlined_call_operand.hbm [shape: f32[8,64], index: 13, kind: output, shape index: {1}]  }
   0x1   :  { %v3324_v0 = vld [vmem:[%s5055_s2 + $0x8] sm:$0xff]  ;;  %v3326_v2 = vld [vmem:[%s5055_s2 + $0x18] sm:$0xff]  ;;  %v3323_v3 = vld [vmem:[%s5055_s2] sm:$0xff]  ;;  %vm74_vm3 = vsmask.f32 3328 }
   0x2   :  { %v3328_v1 = vld [vmem:[%s5055_s2 + $0x28] sm:$0xff]  ;;  %v3327_v4 = vld [vmem:[%s5055_s2 + $0x20] sm:$0xff]  ;;  %466 = vmatpush.bf16.msra.mxu1 %v3324_v0  ;;  %341 = vmatpush.bf16.msra.mxu0 %v3326_v2  ;;  %vm3620_vm4 = vmor %vm533_vm0, %vm534_vm1  ;;  %vm75_vm5 = vsmask.f32 7440 }
   0x3   :  { %663 = vmatpush.bf16.msra.mxu2 %v3328_v1  ;;  %v47_v5 = vld [vmem:[%s5053_s0 + $0x4] sm:$0xf]  ;;  %v66_v6 = vld [vmem:[%s5053_s0 + $0x8] sm:$0x1]  ;;  %v509_v7 = vld [vmem:[%s5053_s0] sm:$0xe] }
   0x4   :  { %v3123_v9 = vrot.slane %v509_v7, 9  ;;  %v538_v10 = vrot.slane %v47_v5, 5  ;;  %v541_v11 = vrot.slane %v66_v6, 5  ;;  %v3325_v12 = vld [vmem:[%s5055_s2 + $0x10] sm:$0xff]  ;;  %v46_v13 = vld [vmem:[%s5053_s0] sm:$0xf]  ;;  %vm3661_vm6 = vmor %vm74_vm3, %vm75_vm5 }
   0x5   :  { %v78_v14 = vshrl.u32 %v46_v13, 16  ;;  %v81_v15 = vshll.u32 %v46_v13, 16  ;;  %v87_v16 = vshll.u32 %v47_v5, 16  ;;  %v3346_v17 = vld [vmem:[%s5060_s7 + $0x28] sm:$0xff]  ;;  %v3315_v18 = vld [vmem:[%s5053_s0] sm:$0xff]  ;;  %v91_v21 = vshrl.u32 %v47_v5, 16 }
   0x6   :  { %v539_v19 = vsel %vm3620_vm4, %v3123_v9, %v538_v10  ;;  %v540_v20 = vrot.slane %v538_v10, 4  ;;  %v97_v22 = vshll.u32 %v66_v6, 16  ;;  %v3344_v23 = vld [vmem:[%s5060_s7 + $0x18] sm:$0xff]  ;;  %v3342_v24 = vld [vmem:[%s5060_s7 + $0x8] sm:$0xff]  ;;  %467 = vmatpush.bf16.msra.mxu1 %v3323_v3  ;;  %v49_v29 = vld [vmem:[%s5053_s0 + $0x10] sm:$0xf]  ;;  %342 = vmatpush.bf16.msra.mxu0 %v3325_v12 }
   0x7   :  { %664 = vmatpush.bf16.msra.mxu2 %v3327_v4  ;;  %v597_v25 = vunpack.c.l.b16 %v539_v19  ;;  %v80_v26 = vrot.slane %v78_v14, 4  ;;  %v83_v27 = vrot.slane %v81_v15, 5  ;;  %v89_v28 = vrot.slane %v87_v16, 5  ;;  %v67_v32 = vld [vmem:[%s5053_s0 + $0x14] sm:$0x1] }
   0x8   :  { %v542_v30 = vsel %vm3620_vm4, %v540_v20, %v541_v11  ;;  %v93_v31 = vrot.slane %v91_v21, 4  ;;  %v510_v33 = vld [vmem:[%s5053_s0 + $0xc] sm:$0xe]  ;;  %v545_v36 = vrot.slane %v49_v29, 5  ;;  %v99_v40 = vrot.slane %v97_v22, 5 }
   0x9   :  { %v598_v34 = vunpack.c.l.b16 %v542_v30  ;;  %v84_v35 = vor.u32 %v83_v27, %v80_v26  ;;  %v48_v37 = vld [vmem:[%s5053_s0 + $0xc] sm:$0xf]  ;;  %3115 = vmatmul.msk.bf16.vlgmr.msra.gmra.mxu1 %vm310_vm2, %v3315_v18  ;;  %v3124_v45 = vrot.slane %v510_v33, 9  ;;  %v548_v46 = vrot.slane %v67_v32, 5 }
   0xa   :  { %1719 = vmatpush.bf16.msrb.mxu0 %v3344_v23  ;;  %1896 = vmatpush.bf16.msrb.mxu1 %v3342_v24  ;;  %v94_v39 = vor.u32 %v93_v31, %v89_v28  ;;  %v102_v41 = vshrl.u32 %v48_v37, 16  ;;  %v105_v42 = vshll.u32 %v48_v37, 16  ;;  %v547_v48 = vrot.slane %v545_v36, 4 }
   0xb   :  { %2158 = vmatpush.bf16.msrb.mxu2 %v3346_v17  ;;  %v613_v43 = vpack.c.b16 %v598_v34, %v597_v25  ;;  %v85_v44 = vrot.slane %v84_v35, 4  ;;  %v111_v52 = vshll.u32 %v49_v29, 16  ;;  %v115_v53 = vshrl.u32 %v49_v29, 16 }
   0xc   :  { %v95_v47 = vrot.slane %v94_v39, 4  ;;  %v104_v49 = vrot.slane %v102_v41, 4  ;;  %v107_v50 = vrot.slane %v105_v42, 5 }
   0xd   :  { %3143 = vmatmul.msk.bf16.vlgmr.msra.gmra.mxu2 %vm310_vm2, %v613_v43  ;;  %v90_v51 = vsel %vm3661_vm6, %v85_v44, %v89_v28 }
   0xe   :  { %v100_v54 = vsel %vm3661_vm6, %v95_v47, %v99_v40  ;;  %v274_v55 = vunpack.c.l.b16 %v90_v51 }
   0xf   :  { %20 = vsyncpa [#allocation5], 0  ;;  %v275_v56 = vunpack.c.l.b16 %v100_v54  ;;  %v108_v57 = vor.u32 %v107_v50, %v104_v49  ;;  %v113_v58 = vrot.slane %v111_v52, 5  ;;  %v117_v59 = vrot.slane %v115_v53, 4  ;;  %v50_v4 = vld [vmem:[%s5053_s0 + $0x18] sm:$0xf] }
  0x10   :  { %v121_v60 = vshll.u32 %v67_v32, 16  ;;  %v546_v63 = vsel %vm3620_vm4, %v3124_v45, %v545_v36  ;;  %v549_v0 = vsel %vm3620_vm4, %v547_v48, %v548_v46  ;;  %v51_v7 = vld [vmem:[%s5053_s0 + $0x1c] sm:$0xf]  ;;  %v3316_v9 = vld [vmem:[%s5053_s0 + $0xc] sm:$0xff]  ;;  %v126_v11 = vshrl.u32 %v50_v4, 16  ;;  %v3340_v8 = vld [vmem:[%s5054_s1 + $0x74] sm:$0xff] }
  0x11   :  { %v290_v61 = vpack.c.b16 %v275_v56, %v274_v55  ;;  %v118_v62 = vor.u32 %v117_v59, %v113_v58  ;;  %v109_v1 = vrot.slane %v108_v57, 4  ;;  %v599_v5 = vunpack.c.l.b16 %v546_v63  ;;  %v68_v20 = vld [vmem:[%s5053_s0 + $0x20] sm:$0x1]  ;;  %v511_v21 = vld [vmem:[%s5053_s0 + $0x18] sm:$0xe]  ;;  %s3524_s23 = smov [#allocation2]  }
  0x12   :  { %v123_v3 = vrot.slane %v121_v60, 5  ;;  %v600_v6 = vunpack.c.l.b16 %v549_v0  ;;  %v129_v13 = vshll.u32 %v50_v4, 16  ;;  %v135_v14 = vshll.u32 %v51_v7, 16  ;;  %v53_v35 = vld [vmem:[%s5053_s0 + $0x28] sm:$0xf]  ;;  %v3317_v43 = vld [vmem:[%s5053_s0 + $0x18] sm:$0xff] }
  0x13   :  { %3067 = vmatmul.msk.bf16.vlgmr.msra.gmra.mxu0 %vm310_vm2, %v290_v61  ;;  %v119_v2 = vrot.slane %v118_v62, 4  ;;  %v114_v10 = vsel %vm3661_vm6, %v109_v1, %v113_v58  ;;  %v139_v15 = vshrl.u32 %v51_v7, 16  ;;  %v552_v17 = vrot.slane %v51_v7, 5  ;;  %v52_v36 = vld [vmem:[%s5053_s0 + $0x24] sm:$0xf]  ;;  %s3028_s24 = sshll.u32 %s3524_s23, 4  ;;  %s3029_s24 = int_to_ptr.vmem [resolvable:$true] %s3028_s24 }
  0x14   :  { %v614_v16 = vpack.c.b16 %v600_v6, %v599_v5  ;;  %v276_v18 = vunpack.c.l.b16 %v114_v10  ;;  %v128_v22 = vrot.slane %v126_v11, 4  ;;  %v131_v23 = vrot.slane %v129_v13, 5  ;;  %v512_v52 = vld [vmem:[%s5053_s0 + $0x24] sm:$0xe]  ;;  %v69_v59 = vld [vmem:[%s5053_s0 + $0x2c] sm:$0x1] }
  0x15   :  { %v124_v12 = vsel %vm3661_vm6, %v119_v2, %v123_v3  ;;  %v137_v24 = vrot.slane %v135_v14, 5  ;;  %v141_v25 = vrot.slane %v139_v15, 4  ;;  %v3125_v26 = vrot.slane %v511_v21, 9  ;;  %v3343_v10 = vld [vmem:[%s5060_s7 + $0x10] sm:$0xff]  ;;  %v3341_v11 = vld [vmem:[%s5060_s7] sm:$0xff]  ;;  %s3041_s26 = sshll.u32 %s5066_s13, 4  ;;  %s3042_s26 = int_to_ptr.hbm [resolvable:$true] %s3041_s26 }
  0x16   :  { %v277_v19 = vunpack.c.l.b16 %v124_v12  ;;  %v554_v27 = vrot.slane %v552_v17, 4  ;;  %v555_v28 = vrot.slane %v68_v20, 5  ;;  %v132_v30 = vor.u32 %v131_v23, %v128_v22  ;;  %v55_v12 = vld [vmem:[%s5053_s0 + $0x34] sm:$0xf]  ;;  %v54_v13 = vld [vmem:[%s5053_s0 + $0x30] sm:$0xf]  ;;  %1720 = vmatpush.bf16.msrb.mxu0 %v3343_v10  ;;  %1897 = vmatpush.bf16.msrb.mxu1 %v3341_v11 }
  0x17   :  { %v142_v31 = vor.u32 %v141_v25, %v137_v24  ;;  %v145_v32 = vshll.u32 %v68_v20, 16  ;;  %v553_v33 = vsel %vm3620_vm4, %v3125_v26, %v552_v17  ;;  %v150_v44 = vshrl.u32 %v52_v36, 16  ;;  %v70_v26 = vld [vmem:[%s5053_s0 + $0x38] sm:$0x1] }
  0x18   :  { %v291_v29 = vpack.c.b16 %v277_v19, %v276_v18  ;;  %v556_v34 = vsel %vm3620_vm4, %v554_v27, %v555_v28  ;;  %v133_v37 = vrot.slane %v132_v30, 4  ;;  %v601_v41 = vunpack.c.l.b16 %v553_v33  ;;  %v513_v28 = vld [vmem:[%s5053_s0 + $0x30] sm:$0xe] }
  0x19   :  { %3116 = vmatmul.msk.bf16.gmra.mxu1 %vm310_vm2, %v3316_v9  ;;  %v143_v39 = vrot.slane %v142_v31, 4  ;;  %v147_v40 = vrot.slane %v145_v32, 5  ;;  %v602_v42 = vunpack.c.l.b16 %v556_v34  ;;  %v153_v45 = vshll.u32 %v52_v36, 16  ;;  %v3345_v9 = vld [vmem:[%s5060_s7 + $0x20] sm:$0xff] }
  0x1a   :  { %v159_v46 = vshll.u32 %v53_v35, 16  ;;  %v163_v47 = vshrl.u32 %v53_v35, 16  ;;  %v138_v48 = vsel %vm3661_vm6, %v133_v37, %v137_v24  ;;  %v559_v51 = vrot.slane %v53_v35, 5  ;;  %2159 = vmatpush.bf16.msrb.mxu2 %v3345_v9 }
  0x1b   :  { %v148_v49 = vsel %vm3661_vm6, %v143_v39, %v147_v40  ;;  %v615_v50 = vpack.c.b16 %v602_v42, %v601_v41  ;;  %v152_v53 = vrot.slane %v150_v44, 4  ;;  %v155_v54 = vrot.slane %v153_v45, 5 }
  0x1c   :  { %v161_v55 = vrot.slane %v159_v46, 5  ;;  %v165_v56 = vrot.slane %v163_v47, 4  ;;  %v278_v57 = vunpack.c.l.b16 %v138_v48  ;;  %v279_v58 = vunpack.c.l.b16 %v148_v49  ;;  %v57_v48 = vld [vmem:[%s5053_s0 + $0x40] sm:$0xf]  ;;  %v56_v49 = vld [vmem:[%s5053_s0 + $0x3c] sm:$0xf] }
  0x1d   :  { %3144 = vmatmul.msk.bf16.gmra.mxu2 %vm310_vm2, %v614_v16  ;;  %v3126_v60 = vrot.slane %v512_v52, 9  ;;  %v561_v61 = vrot.slane %v559_v51, 4  ;;  %v562_v62 = vrot.slane %v69_v59, 5  ;;  %v156_v63 = vor.u32 %v155_v54, %v152_v53  ;;  %v3318_v16 = vld [vmem:[%s5053_s0 + $0x24] sm:$0xff] }
  0x1e   :  { %v166_v0 = vor.u32 %v165_v56, %v161_v55  ;;  %v169_v1 = vshll.u32 %v69_v59, 16  ;;  %v292_v2 = vpack.c.b16 %v279_v58, %v278_v57  ;;  %v174_v19 = vshrl.u32 %v54_v13, 16 }
  0x1f   :  { %v560_v3 = vsel %vm3620_vm4, %v3126_v60, %v559_v51  ;;  %v563_v4 = vsel %vm3620_vm4, %v561_v61, %v562_v62  ;;  %v157_v5 = vrot.slane %v156_v63, 4  ;;  %v177_v20 = vshll.u32 %v54_v13, 16  ;;  %v71_v61 = vld [vmem:[%s5053_s0 + $0x44] sm:$0x1]  ;;  %v514_v62 = vld [vmem:[%s5053_s0 + $0x3c] sm:$0xe] }
  0x20   :  { %v167_v6 = vrot.slane %v166_v0, 4  ;;  %v171_v7 = vrot.slane %v169_v1, 5  ;;  %v603_v14 = vunpack.c.l.b16 %v560_v3  ;;  %v604_v15 = vunpack.c.l.b16 %v563_v4  ;;  %v59_v13 = vld [vmem:[%s5053_s0 + $0x4c] sm:$0xf] }
  0x21   :  { %v162_v17 = vsel %vm3661_vm6, %v157_v5, %v161_v55  ;;  %v183_v21 = vshll.u32 %v55_v12, 16  ;;  %v187_v22 = vshrl.u32 %v55_v12, 16  ;;  %v566_v27 = vrot.slane %v55_v12, 5 }
  0x22   :  { %v172_v18 = vsel %vm3661_vm6, %v167_v6, %v171_v7  ;;  %v616_v23 = vpack.c.b16 %v604_v15, %v603_v14  ;;  %v280_v24 = vunpack.c.l.b16 %v162_v17  ;;  %v179_v30 = vrot.slane %v177_v20, 5  ;;  %v58_v14 = vld [vmem:[%s5053_s0 + $0x48] sm:$0xf]  ;;  %v3320_v20 = vld [vmem:[%s5053_s0 + $0x3c] sm:$0xff] }
  0x23   :  { %3068 = vmatmul.msk.bf16.gmra.mxu0 %vm310_vm2, %v291_v29  ;;  %v281_v25 = vunpack.c.l.b16 %v172_v18  ;;  %v176_v29 = vrot.slane %v174_v19, 4  ;;  %v185_v31 = vrot.slane %v183_v21, 5  ;;  %v189_v32 = vrot.slane %v187_v22, 4 }
  0x24   :  { %v3127_v33 = vrot.slane %v513_v28, 9  ;;  %v568_v34 = vrot.slane %v566_v27, 4  ;;  %v569_v35 = vrot.slane %v70_v26, 5  ;;  %v193_v40 = vshll.u32 %v70_v26, 16 }
  0x25   :  { %v293_v36 = vpack.c.b16 %v281_v25, %v280_v24  ;;  %v180_v37 = vor.u32 %v179_v30, %v176_v29  ;;  %v190_v39 = vor.u32 %v189_v32, %v185_v31  ;;  %v198_v53 = vshrl.u32 %v56_v49, 16  ;;  %v515_v29 = vld [vmem:[%s5053_s0 + $0x48] sm:$0xe] }
  0x26   :  { %v567_v41 = vsel %vm3620_vm4, %v3127_v33, %v566_v27  ;;  %v570_v42 = vsel %vm3620_vm4, %v568_v34, %v569_v35  ;;  %v195_v45 = vrot.slane %v193_v40, 5  ;;  %v201_v54 = vshll.u32 %v56_v49, 16 }
  0x27   :  { %v191_v44 = vrot.slane %v190_v39, 4  ;;  %v605_v46 = vunpack.c.l.b16 %v567_v41  ;;  %v606_v47 = vunpack.c.l.b16 %v570_v42  ;;  %v207_v55 = vshll.u32 %v57_v48, 16 }
  0x28   :  { %v211_v56 = vshrl.u32 %v57_v48, 16  ;;  %v573_v58 = vrot.slane %v57_v48, 5  ;;  %v200_v63 = vrot.slane %v198_v53, 4  ;;  %v203_v0 = vrot.slane %v201_v54, 5 }
  0x29   :  { %3117 = vmatmul.msk.bf16.gmra.mxu1 %vm310_vm2, %v3317_v43  ;;  %v181_v43 = vrot.slane %v180_v37, 4  ;;  %v196_v52 = vsel %vm3661_vm6, %v191_v44, %v195_v45  ;;  %v617_v57 = vpack.c.b16 %v606_v47, %v605_v46  ;;  %v209_v1 = vrot.slane %v207_v55, 5  ;;  %v3321_v55 = vld [vmem:[%s5053_s0 + $0x48] sm:$0xff] }
  0x2a   :  { %v283_v60 = vunpack.c.l.b16 %v196_v52  ;;  %v3128_v3 = vrot.slane %v514_v62, 9  ;;  %v575_v4 = vrot.slane %v573_v58, 4  ;;  %v576_v5 = vrot.slane %v71_v61, 5  ;;  %v60_v52 = vld [vmem:[%s5053_s0 + $0x54] sm:$0xf] }
  0x2b   :  { %v186_v51 = vsel %vm3661_vm6, %v181_v43, %v185_v31  ;;  %v204_v7 = vor.u32 %v203_v0, %v200_v63  ;;  %v217_v10 = vshll.u32 %v71_v61, 16  ;;  %v222_v21 = vshrl.u32 %v58_v14, 16  ;;  %v764_v62 = vld [vmem:[%s5057_s4 + $0x30] sm:$0xff]  ;;  %v763_v63 = vld [vmem:[%s5057_s4 + $0x28] sm:$0xff] }
  0x2c   :  { %v282_v59 = vunpack.c.l.b16 %v186_v51  ;;  %v574_v11 = vsel %vm3620_vm4, %v3128_v3, %v573_v58  ;;  %v577_v12 = vsel %vm3620_vm4, %v575_v4, %v576_v5  ;;  %v225_v22 = vshll.u32 %v58_v14, 16  ;;  %v61_v51 = vld [vmem:[%s5053_s0 + $0x58] sm:$0xf]  ;;  %v73_v3 = vld [vmem:[%s5053_s0 + $0x5c] sm:$0x1] }
  0x2d   :  { %3145 = vmatmul.msk.bf16.gmra.mxu2 %vm310_vm2, %v615_v50  ;;  %v3319_v50 = vld [vmem:[%s5053_s0 + $0x30] sm:$0xff]  ;;  %v205_v15 = vrot.slane %v204_v7, 4  ;;  %v219_v17 = vrot.slane %v217_v10, 5  ;;  %v607_v18 = vunpack.c.l.b16 %v574_v11  ;;  %v608_v19 = vunpack.c.l.b16 %v577_v12 }
  0x2e   :  { %v294_v6 = vpack.c.b16 %v283_v60, %v282_v59  ;;  %v235_v24 = vshrl.u32 %v59_v13, 16  ;;  %v580_v28 = vrot.slane %v59_v13, 5  ;;  %v224_v30 = vrot.slane %v222_v21, 4  ;;  %v516_v5 = vld [vmem:[%s5053_s0 + $0x54] sm:$0xe] }
  0x2f   :  { %v210_v25 = vsel %vm3661_vm6, %v205_v15, %v209_v1  ;;  %v618_v27 = vpack.c.b16 %v608_v19, %v607_v18  ;;  %v227_v31 = vrot.slane %v225_v22, 5  ;;  %v3129_v37 = vrot.slane %v515_v29, 9  ;;  %v762_v18 = vld [vmem:[%s5057_s4 + $0x20] sm:$0xff]  ;;  %v761_v19 = vld [vmem:[%s5057_s4 + $0x18] sm:$0xff] }
  0x30   :  { %v237_v33 = vrot.slane %v235_v24, 4  ;;  %v284_v34 = vunpack.c.l.b16 %v210_v25  ;;  %v582_v39 = vrot.slane %v580_v28, 4  ;;  %v246_v58 = vshrl.u32 %v60_v52, 16  ;;  %v760_v25 = vld [vmem:[%s5057_s4 + $0x10] sm:$0xff]  ;;  %v1316_v29 = vld [vmem:[%s5054_s1] sm:$0xf] }
  0x31   :  { %v228_v41 = vor.u32 %v227_v31, %v224_v30  ;;  %v581_v45 = vsel %vm3620_vm4, %v3129_v37, %v580_v28  ;;  %v249_v59 = vshll.u32 %v60_v52, 16  ;;  %v255_v60 = vshll.u32 %v61_v51, 16  ;;  %v1317_v28 = vld [vmem:[%s5054_s1 + $0x4] sm:$0xf]  ;;  %v759_v30 = vld [vmem:[%s5057_s4 + $0x8] sm:$0xff]  ;;  %v3322_v31 = vld [vmem:[%s5053_s0 + $0x54] sm:$0xff] }
  0x32   :  { %v609_v53 = vunpack.c.l.b16 %v581_v45  ;;  %v259_v61 = vshrl.u32 %v61_v51, 16  ;;  %v587_v4 = vrot.slane %v61_v51, 5  ;;  %v3130_v11 = vrot.slane %v516_v5, 9  ;;  %v1959_v45 = vld [vmem:[%s5054_s1] sm:$0xe] }
  0x33   :  { %3069 = vmatmul.msk.bf16.gmra.mxu0 %vm310_vm2, %v292_v2  ;;  %v213_v2 = vrot.slane %v211_v56, 4  ;;  %v229_v47 = vrot.slane %v228_v41, 4  ;;  %v251_v7 = vrot.slane %v249_v59, 5  ;;  %v1362_v37 = vshll.u32 %v1317_v28, 16  ;;  %v1319_v59 = vld [vmem:[%s5054_s1 + $0x10] sm:$0xf] }
  0x34   :  { %v261_v10 = vrot.slane %v259_v61, 4  ;;  %v589_v12 = vrot.slane %v587_v4, 4  ;;  %v1985_v41 = vrot.slane %v1317_v28, 5  ;;  %v1387_v5 = vshrl.u32 %v1319_v59, 16 }
  0x35   :  { %v214_v9 = vor.u32 %v213_v2, %v209_v1  ;;  %vm770_vm7 = vcmask 523264   ;;  %vm925_vm8 = vcmask 130112   ;;  %vm929_vm9 = vcmask 195712  }
  0x36   :  { %v1987_v51 = vrot.slane %v1985_v41, 4  ;;  %vm933_vm10 = vcmask 261312   ;;  %vm935_vm11 = vcmask 1041409   ;;  %vm936_vm12 = vcmask 1042434  }
  0x37   :  { %vm938_vm13 = vcmask 1043459   ;;  %vm940_vm14 = vcmask 1044484   ;;  %vm942_vm15 = vcmask 1045509   ;;  %vm944_vm0 = vcmask 1046534  }
  0x38   :  { %vm946_vm1 = vcmask 1047559   ;;  %vm2700_vm5 = vcmask 195584  }
  0x39   :  { %3118 = vmatmul.msk.bf16.gmra.mxu1 %vm310_vm2, %v3318_v16  ;;  %v215_v16 = vrot.slane %v214_v9, 4  ;;  %v257_v9 = vrot.slane %v255_v60, 5 }
  0x3b   :  { %v220_v26 = vsel %vm3661_vm6, %v215_v16, %v219_v17  ;;  %v262_v16 = vor.u32 %v261_v10, %v257_v9  ;;  %v265_v17 = vshll.u32 %v73_v3, 16  ;;  %v902_v10 = vld [vmem:[%s5059_s6 + $0x10] sm:$0xff] }
  0x3c   :  { %v285_v35 = vunpack.c.l.b16 %v220_v26 }
  0x3d   :  { %3146 = vmatmul.msk.bf16.gmra.mxu2 %vm310_vm2, %v616_v23  ;;  %v231_v23 = vshll.u32 %v59_v13, 16  ;;  %v590_v13 = vrot.slane %v73_v3, 5  ;;  %v267_v24 = vrot.slane %v265_v17, 5  ;;  %v3329_v3 = vld [vmem:[%s5054_s1] sm:$0xff] }
  0x3e   :  { %v295_v44 = vpack.c.b16 %v285_v35, %v284_v34  ;;  %v758_v34 = vld [vmem:[%s5057_s4] sm:$0xff]  ;;  %v1353_v35 = vshrl.u32 %v1316_v29, 16 }
  0x3f   :  { %v233_v32 = vrot.slane %v231_v23, 5  ;;  %v591_v21 = vsel %vm3620_vm4, %v589_v12, %v590_v13  ;;  %v263_v23 = vrot.slane %v262_v16, 4  ;;  %v1960_v16 = vld [vmem:[%s5054_s1 + $0x10] sm:$0xe] }
  0x41   :  { %v238_v42 = vor.u32 %v237_v33, %v233_v32  ;;  %v234_v56 = vsel %vm3661_vm6, %v229_v47, %v233_v32  ;;  %v268_v33 = vsel %vm3661_vm6, %v263_v23, %v267_v24  ;;  %v3260_v24 = vrot.slane %v1960_v16, 9 }
  0x42   :  { %v286_v1 = vunpack.c.l.b16 %v234_v56 }
  0x43   :  { %3070 = vmatmul.msk.bf16.gmra.mxu0 %vm310_vm2, %v293_v36  ;;  %v72_v36 = vld [vmem:[%s5053_s0 + $0x50] sm:$0x1]  ;;  %v239_v48 = vrot.slane %v238_v42, 4 }
  0x44   :  { %v583_v40 = vrot.slane %v72_v36, 5  ;;  %v241_v43 = vshll.u32 %v72_v36, 16  ;;  %v1356_v36 = vshll.u32 %v1316_v29, 16 }
  0x46   :  { %v584_v46 = vsel %vm3620_vm4, %v582_v39, %v583_v40  ;;  %v243_v49 = vrot.slane %v241_v43, 5  ;;  %v1366_v39 = vshrl.u32 %v1317_v28, 16  ;;  %v289_v43 = vunpack.c.l.b16 %v268_v33 }
  0x47   :  { %v610_v54 = vunpack.c.l.b16 %v584_v46  ;;  %v1355_v46 = vrot.slane %v1353_v35, 4  ;;  %v1358_v47 = vrot.slane %v1356_v36, 5 }
  0x49   :  { %3119 = vmatmul.msk.bf16.gmra.mxu1 %vm310_vm2, %v3319_v50  ;;  %v765_v50 = vld [vmem:[%s5057_s4 + $0x38] sm:$0xff]  ;;  %v619_v0 = vpack.c.b16 %v610_v54, %v609_v53  ;;  %v1359_v54 = vor.u32 %v1358_v47, %v1355_v46  ;;  %v3197_v46 = vld [vmem:[%s5054_s1 + $0x8] sm:$0xf]  ;;  %v3330_v47 = vld [vmem:[%s5054_s1 + $0xc] sm:$0xf0] }
  0x4a   :  { %827 = vmatpush.msra.mxu3 %v765_v50  ;;  %v3259_v50 = vrot.slane %v1959_v45, 9 }
  0x4b   :  { %v1360_v60 = vrot.slane %v1359_v54, 4  ;;  %v3198_v54 = vor.u32 %v3330_v47, %v3197_v46 }
  0x4c   :  { %828 = vmatpush.msra.mxu3 %v764_v62 }
  0x4d   :  { %3147 = vmatmul.msk.bf16.gmra.mxu2 %vm310_vm2, %v617_v57  ;;  %v244_v57 = vsel %vm3661_vm6, %v239_v48, %v243_v49  ;;  %v1364_v48 = vrot.slane %v1362_v37, 5  ;;  %v1368_v49 = vrot.slane %v1366_v39, 4  ;;  %v3933_v37 = vld [vmem:[%s5056_s3] ss:$0 sm:$0xff] }
  0x4e   :  { %v287_v2 = vunpack.c.l.b16 %v244_v57  ;;  %829 = vmatpush.msra.mxu3 %v763_v63  ;;  %v1986_v57 = vsel %vm3620_vm4, %v3259_v50, %v1985_v41 }
  0x4f   :  { %v2068_v63 = vunpack.c.l.b16 %v1986_v57 }
  0x50   :  { %v296_v14 = vpack.c.b16 %v287_v2, %v286_v1  ;;  %830 = vmatpush.msra.mxu3 %v762_v18  ;;  %v3523_v1 = vmov 0   ;;  %v900_v2 = vld [vmem:[%s5059_s6] sm:$0xff]  ;;  %v1389_v18 = vrot.slane %v1387_v5, 4  ;;  %v1345_v5 = vld [vmem:[%s5054_s1 + $0x1c] sm:$0x1] }
  0x51   :  { %3350 = vset.pattern.permute.xlu0 %v3523_v1  ;;  %3351 = vset.pattern.permute.xlu1 %v3523_v1 }
  0x52   :  { %831 = vmatpush.msra.mxu3 %v761_v19  ;;  %909 = vperm.xlu0 %3350, %v900_v2  }
  0x53   :  { %3071 = vmatmul.msk.bf16.gmra.mxu0 %vm310_vm2, %v294_v6  ;;  %v248_v6 = vrot.slane %v246_v58, 4  ;;  %3352 = vset.pattern.permute.xlu2 %v3523_v1 }
  0x54   :  { %832 = vmatpush.msra.mxu3 %v760_v25  ;;  %915 = vperm.xlu1 %3351, %v902_v10  }
  0x55   :  { %v252_v15 = vor.u32 %v251_v7, %v248_v6  ;;  %v1390_v6 = vshll.u32 %v1319_v59, 16 }
  0x56   :  { %833 = vmatpush.msra.mxu3 %v759_v30 }
  0x57   :  { %v253_v22 = vrot.slane %v252_v15, 4  ;;  %v1344_v15 = vld [vmem:[%s5054_s1 + $0xc] sm:$0x1]  ;;  %v1392_v19 = vrot.slane %v1390_v6, 5 }
  0x58   :  { %834 = vmatpush.msra.mxu3 %v758_v34  ;;  %v1991_v23 = vrot.slane %v1344_v15, 5  ;;  %v1382_v29 = vshll.u32 %v1344_v15, 16 }
  0x59   :  { %3120 = vmatmul.msk.bf16.gmra.mxu1 %vm310_vm2, %v3320_v20  ;;  %v588_v20 = vsel %vm3620_vm4, %v3130_v11, %v587_v4  ;;  %v258_v32 = vsel %vm3661_vm6, %v253_v22, %v257_v9  ;;  %v2304_v9 = vld [vmem:[%s5062_s9 + $0x38] sm:$0xff]  ;;  %v1365_v11 = vsel %vm3661_vm6, %v1360_v60, %v1364_v48  ;;  %v1393_v30 = vor.u32 %v1392_v19, %v1389_v18  ;;  %v2303_v60 = vld [vmem:[%s5062_s9 + $0x30] sm:$0xff] }
  0x5a   :  { %v611_v26 = vunpack.c.l.b16 %v588_v20  ;;  %v288_v42 = vunpack.c.l.b16 %v258_v32  ;;  %2389 = vmatpush.msrb.mxu3 %v2304_v9  ;;  %v1629_v20 = vunpack.c.l.b16 %v1365_v11  ;;  %v1416_v19 = vshll.u32 %v1345_v5, 16 }
  0x5c   :  { %v297_v53 = vpack.c.b16 %v289_v43, %v288_v42  ;;  %v1384_v42 = vrot.slane %v1382_v29, 5  ;;  %v1394_v43 = vrot.slane %v1393_v30, 4  ;;  %2390 = vmatpush.msrb.mxu3 %v2303_v60 }
  0x5d   :  { %3148 = vmatmul.msk.bf16.gmra.mxu2 %vm310_vm2, %v618_v27  ;;  %v612_v27 = vunpack.c.l.b16 %v591_v21 }
  0x5f   :  { %v620_v40 = vpack.c.b16 %v612_v27, %v611_v26  ;;  %v901_v26 = vld [vmem:[%s5059_s6 + $0x8] sm:$0xff]  ;;  %v903_v27 = vld [vmem:[%s5059_s6 + $0x18] sm:$0xff]  ;;  %s3030_s6 = sshll.u32 %s5065_s12, 4  ;;  %s3525_s12 = smov [#allocation4]   ;;  %s3031_s6 = int_to_ptr.hbm [resolvable:$true] %s3030_s6 }
  0x60   :  { %912 = vperm.xlu0 %3350, %v901_v26   ;;  %918 = vperm.xlu1 %3351, %v903_v27   ;;  %s3039_s3 = sshll.u32 %s3525_s12, 4  ;;  %s3040_s3 = int_to_ptr.vmem [resolvable:$true] %s3039_s3 }
  0x63   :  { %3072 = vmatmul.msk.bf16.gmra.mxu0 %vm310_vm2, %v295_v44  ;;  %v1318_v44 = vld [vmem:[%s5054_s1 + $0x8] sm:$0xf] }
  0x64   :  { %v1988_v52 = vrot.slane %v1318_v44, 5  ;;  %v1372_v56 = vshll.u32 %v1318_v44, 16  ;;  %v1376_v4 = vshrl.u32 %v1318_v44, 16 }
  0x66   :  { %v1989_v58 = vsel %vm3620_vm4, %v1987_v51, %v1988_v52  ;;  %v1374_v62 = vrot.slane %v1372_v56, 5  ;;  %v1378_v17 = vrot.slane %v1376_v4, 4  ;;  %v1990_v22 = vrot.slane %v1988_v52, 4 }
  0x68   :  { %v1379_v28 = vor.u32 %v1378_v17, %v1374_v62  ;;  %v1992_v39 = vsel %vm3620_vm4, %v1990_v22, %v1991_v23 }
  0x69   :  { %3121 = vmatmul.msk.bf16.gmra.mxu1 %vm310_vm2, %v3321_v55  ;;  %v1369_v55 = vor.u32 %v1368_v49, %v1364_v48  ;;  %v1321_v48 = vld [vmem:[%s5054_s1 + $0x18] sm:$0xf]  ;;  %v2070_v50 = vunpack.c.l.b16 %v1992_v39 }
  0x6a   :  { %v1380_v41 = vrot.slane %v1379_v28, 4  ;;  %v1410_v59 = vshrl.u32 %v1321_v48, 16  ;;  %v1418_v28 = vrot.slane %v1416_v19, 5 }
  0x6b   :  { %v1370_v61 = vrot.slane %v1369_v55, 4 }
  0x6c   :  { %v1385_v52 = vsel %vm3661_vm6, %v1380_v41, %v1384_v42  ;;  %v1412_v9 = vrot.slane %v1410_v59, 4  ;;  %v2302_v41 = vld [vmem:[%s5062_s9 + $0x28] sm:$0xff] }
  0x6d   :  { %3149 = vmatmul.msk.bf16.gmra.mxu2 %vm310_vm2, %v619_v0  ;;  %v2069_v0 = vunpack.c.l.b16 %v1989_v58  ;;  %v1375_v12 = vsel %vm3661_vm6, %v1370_v61, %v1374_v62  ;;  %v1406_v58 = vshll.u32 %v1321_v48, 16  ;;  %v1631_v1 = vunpack.c.l.b16 %v1385_v52  ;;  %2391 = vmatpush.msrb.mxu3 %v2302_v41 }
  0x6e   :  { %v1630_v21 = vunpack.c.l.b16 %v1375_v12 }
  0x6f   :  { %v2092_v13 = vpack.c.b16 %v2069_v0, %v2068_v63 }
  0x70   :  { %v1653_v32 = vpack.c.b16 %v1630_v21, %v1629_v20 }
  0x73   :  { %3073 = vmatmul.msk.bf16.gmra.mxu0 %vm310_vm2, %v296_v14  ;;  %v3912_v14 = vld [vmem:[%s5054_s1 + $0x14] sm:$0xf] }
  0x74   :  { %v1995_v25 = vrot.slane %v3912_v14, 5  ;;  %v1400_v57 = vshrl.u32 %v3912_v14, 16 }
  0x76   :  { %v1402_v6 = vrot.slane %v1400_v57, 4  ;;  %v1997_v12 = vrot.slane %v1995_v25, 4  ;;  %v1961_v57 = vld [vmem:[%s5054_s1 + $0x20] sm:$0xe] }
  0x79   :  { %3122 = vmatmul.msk.bf16.gmra.mxu1 %vm310_vm2, %v3322_v31  ;;  %v1396_v31 = vshll.u32 %v3912_v14, 16  ;;  %v2001_v14 = vrot.slane %v1345_v5, 5 }
  0x7b   :  { %v1398_v44 = vrot.slane %v1396_v31, 5 }
  0x7d   :  { %3150 = vmatmul.msk.bf16.gmra.mxu2 %vm310_vm2, %v620_v40  ;;  %v1996_v40 = vsel %vm3620_vm4, %v3260_v24, %v1995_v25  ;;  %v1403_v17 = vor.u32 %v1402_v6, %v1398_v44 }
  0x7e   :  { %v2071_v51 = vunpack.c.l.b16 %v1996_v40 }
  0x7f   :  { %v1404_v26 = vrot.slane %v1403_v17, 4 }
  0x80   :  { %v2093_v0 = vpack.c.b16 %v2071_v51, %v2070_v50 }
  0x83   :  { %3074 = vmatmul.msk.bf16.gmra.mxu0 %vm310_vm2, %v297_v53  ;;  %v1399_v53 = vsel %vm3661_vm6, %v1394_v43, %v1398_v44 }
  0x84   :  { %v1632_v2 = vunpack.c.l.b16 %v1399_v53 }
  0x86   :  { %v469_v7 = vpop.f32.mrf.mxu1  ;;  %v1654_v11 = vpack.c.b16 %v1632_v2, %v1631_v1 }
  0x89   :  { %3247 = vmatmul.msk.bf16.vlgmr.msrb.gmra.mxu1 %vm310_vm2, %v3329_v3  ;;  %v1998_v3 = vrot.slane %v1321_v48, 5 }
  0x8b   :  { %v1999_v23 = vsel %vm3620_vm4, %v1997_v12, %v1998_v3 }
  0x8c   :  { %v2072_v30 = vunpack.c.l.b16 %v1999_v23 }
  0x8d   :  { %3279 = vmatmul.msk.bf16.vlgmr.msrb.gmra.mxu2 %vm310_vm2, %v2092_v13  ;;  %v2000_v13 = vrot.slane %v1998_v3, 4 }
  0x8e   :  { %v471_v33 = vpop.f32.mrf.mxu1 }
  0x8f   :  { %v2002_v24 = vsel %vm3620_vm4, %v2000_v13, %v2001_v14 }
  0x90   :  { %v344_v34 = vpop.f32.mrf.mxu0  ;;  %v666_v35 = vpop.f32.mrf.mxu2  ;;  %v2073_v31 = vunpack.c.l.b16 %v2002_v24 }
  0x91   :  { %v470_v36 = vadd.f32 %v469_v7, %v344_v34  ;;  %v1408_v7 = vrot.slane %v1406_v58, 5  ;;  %v3331_v34 = vld [vmem:[%s5054_s1 + $0x14] sm:$0xff] }
  0x92   :  { %v2094_v50 = vpack.c.b16 %v2073_v31, %v2072_v30  ;;  %v2497_v31 = vld [vmem:[%s5064_s11 + $0x18] sm:$0xff] }
  0x93   :  { %v706_v45 = vadd.f32 %v666_v35, %v470_v36  ;;  %3179 = vmatmul.msk.bf16.vlgmr.msrb.gmra.mxu0 %vm310_vm2, %v1653_v32  ;;  %v1413_v18 = vor.u32 %v1412_v9, %v1408_v7  ;;  %v1323_v32 = vld [vmem:[%s5054_s1 + $0x24] sm:$0xf]  ;;  %v1409_v39 = vsel %vm3661_vm6, %v1404_v26, %v1408_v7 }
  0x94   :  { %v1430_v46 = vshll.u32 %v1323_v32, 16  ;;  %v1434_v47 = vshrl.u32 %v1323_v32, 16  ;;  %v2005_v51 = vrot.slane %v1323_v32, 5  ;;  %v1633_v53 = vunpack.c.l.b16 %v1409_v39 }
  0x95   :  { %v3950_v49 = vadd.f32 %v3933_v37, %v706_v45  ;;  %v1414_v27 = vrot.slane %v1413_v18, 4  ;;  %v1325_v18 = vld [vmem:[%s5054_s1 + $0x30] sm:$0xf] }
  0x96   :  { %v474_v56 = vpop.f32.mrf.mxu1  ;;  %v1432_v60 = vrot.slane %v1430_v46, 5  ;;  %v2007_v1 = vrot.slane %v2005_v51, 4  ;;  %v1458_v30 = vshll.u32 %v1325_v18, 16 }
  0x97   :  { %v5075_v55 = vmax.f32 %v3950_v49, 0.0  ;;  %v1419_v40 = vsel %vm3661_vm6, %v1414_v27, %v1418_v28  ;;  %v3332_v27 = vld [vmem:[%s5054_s1 + $0x20] sm:$0xff]  ;;  %v1455_v28 = vshrl.u32 %v1325_v18, 16  ;;  %v3209_v18 = vld [vmem:[%s5054_s1 + $0x28] sm:$0xf] }
  0x98   :  { %v346_v61 = vpop.f32.mrf.mxu0  ;;  %v668_v62 = vpop.f32.mrf.mxu2 }
  0x99   :  { %v472_v63 = vadd.f32 %v471_v33, %v346_v61  ;;  %3151 = vmatmul.msk.f32.vlgmr.msra.gmra.mxu3 %vm770_vm7, %v5075_v55  ;;  %3248 = vmatmul.msk.bf16.gmra.mxu1 %vm310_vm2, %v3198_v54  ;;  %v1322_v33 = vld [vmem:[%s5054_s1 + $0x20] sm:$0xf]  ;;  %v1634_v54 = vunpack.c.l.b16 %v1419_v40  ;;  %v1436_v61 = vrot.slane %v1434_v47, 4  ;;  %v1962_v47 = vld [vmem:[%s5054_s1 + $0x30] sm:$0xe] }
  0x9a   :  { %v1421_v44 = vshrl.u32 %v1322_v33, 16  ;;  %v1424_v45 = vshll.u32 %v1322_v33, 16 }
  0x9b   :  { %v707_v4 = vadd.f32 %v668_v62, %v472_v63  ;;  %v2494_v63 = vld [vmem:[%s5064_s11] sm:$0xff] }
  0x9c   :  { %v1423_v58 = vrot.slane %v1421_v44, 4  ;;  %v1426_v59 = vrot.slane %v1424_v45, 5  ;;  %2503 = vperm.xlu1 %3351, %v2494_v63   ;;  %v4061_v44 = vld [vmem:[%s5054_s1 + $0x34] sm:$0xf]  ;;  %v1346_v45 = vld [vmem:[%s5054_s1 + $0x2c] sm:$0x1] }
  0x9d   :  { %v3969_v10 = vadd.f32 %v3933_v37, %v707_v4  ;;  %3280 = vmatmul.msk.bf16.gmra.mxu2 %vm310_vm2, %v2093_v0  ;;  %v3261_v0 = vrot.slane %v1961_v57, 9  ;;  %v1655_v4 = vpack.c.b16 %v1634_v54, %v1633_v53  ;;  %v2011_v57 = vrot.slane %v1346_v45, 5 }
  0x9e   :  { %v476_v16 = vpop.f32.mrf.mxu1  ;;  %v1427_v9 = vor.u32 %v1426_v59, %v1423_v58  ;;  %v3262_v58 = vrot.slane %v1962_v47, 9  ;;  %v2015_v59 = vrot.slane %v4061_v44, 5  ;;  %v1347_v47 = vld [vmem:[%s5054_s1 + $0x3c] sm:$0x1] }
  0x9f   :  { %v5079_v15 = vmax.f32 %v3969_v10, 0.0  ;;  %v2006_v14 = vsel %vm3620_vm4, %v3261_v0, %v2005_v51  ;;  %v1464_v0 = vshll.u32 %v4061_v44, 16 }
  0xa0   :  { %v349_v20 = vpop.f32.mrf.mxu0  ;;  %v671_v21 = vpop.f32.mrf.mxu2  ;;  %v1428_v19 = vrot.slane %v1427_v9, 4  ;;  %v2074_v23 = vunpack.c.l.b16 %v2006_v14 }
  0xa1   :  { %v475_v22 = vadd.f32 %v474_v56, %v349_v20  ;;  %3152 = vmatmul.msk.f32.gmra.mxu3 %vm770_vm7, %v5079_v15  ;;  %v4008_v56 = vld [vmem:[%s5054_s1 + $0x28] sm:$0xf] }
  0xa2   :  { %v2008_v2 = vrot.slane %v4008_v56, 5  ;;  %v1440_v12 = vshll.u32 %v4008_v56, 16  ;;  %v1444_v26 = vshrl.u32 %v4008_v56, 16  ;;  %v1433_v40 = vsel %vm3661_vm6, %v1428_v19, %v1432_v60  ;;  %v3333_v19 = vld [vmem:[%s5054_s1 + $0x2c] sm:$0xf0] }
  0xa3   :  { %v708_v25 = vadd.f32 %v671_v21, %v475_v22  ;;  %3180 = vmatmul.msk.bf16.gmra.mxu0 %vm310_vm2, %v1654_v11  ;;  %v1437_v11 = vor.u32 %v1436_v61, %v1432_v60  ;;  %v1450_v61 = vshll.u32 %v1346_v45, 16 }
  0xa4   :  { %v1442_v21 = vrot.slane %v1440_v12, 5  ;;  %2512 = vperm.xlu1 %3351, %v2497_v31   ;;  %v1446_v46 = vrot.slane %v1444_v26, 4  ;;  %v2010_v54 = vrot.slane %v2008_v2, 4  ;;  %v1468_v31 = vshrl.u32 %v4061_v44, 16 }
  0xa5   :  { %v3982_v29 = vadd.f32 %v3933_v37, %v708_v25  ;;  %v1438_v20 = vrot.slane %v1437_v11, 4  ;;  %v2496_v25 = vld [vmem:[%s5064_s11 + $0x10] sm:$0xff]  ;;  %v2016_v11 = vsel %vm3620_vm4, %v3262_v58, %v2015_v59 }
  0xa6   :  { %v479_v36 = vpop.f32.mrf.mxu1  ;;  %2509 = vperm.xlu0 %3350, %v2496_v25   ;;  %v1447_v60 = vor.u32 %v1446_v46, %v1442_v21  ;;  %v2012_v9 = vsel %vm3620_vm4, %v2010_v54, %v2011_v57  ;;  %v2017_v57 = vrot.slane %v2015_v59, 4 }
  0xa7   :  { %v5106_v35 = vmax.f32 %v3982_v29, 0.0  ;;  %v1443_v41 = vsel %vm3661_vm6, %v1438_v20, %v1442_v21  ;;  %v1327_v20 = vld [vmem:[%s5054_s1 + $0x38] sm:$0xf] }
  0xa8   :  { %v351_v42 = vpop.f32.mrf.mxu0  ;;  %v673_v43 = vpop.f32.mrf.mxu2  ;;  %v1636_v53 = vunpack.c.l.b16 %v1443_v41  ;;  %v1448_v12 = vrot.slane %v1447_v60, 4  ;;  %v2018_v44 = vrot.slane %v1327_v20, 5  ;;  %v2021_v60 = vrot.slane %v1347_v47, 5 }
  0xa9   :  { %v477_v48 = vadd.f32 %v476_v16, %v351_v42  ;;  %3153 = vmatmul.msk.f32.gmra.mxu3 %vm770_vm7, %v5106_v35  ;;  %3249 = vmatmul.msk.bf16.gmra.mxu1 %vm310_vm2, %v3331_v34  ;;  %v2009_v16 = vsel %vm3620_vm4, %v2007_v1, %v2008_v2  ;;  %v2301_v34 = vld [vmem:[%s5062_s9 + $0x20] sm:$0xff] }
  0xaa   :  { %v2075_v24 = vunpack.c.l.b16 %v2009_v16  ;;  %2392 = vmatpush.msrb.mxu3 %v2301_v34  ;;  %v1466_v16 = vrot.slane %v1464_v0, 5  ;;  %v1478_v34 = vshrl.u32 %v1327_v20, 16  ;;  %v2020_v58 = vrot.slane %v2018_v44, 4 }
  0xab   :  { %v709_v52 = vadd.f32 %v673_v43, %v477_v48  ;;  %v1457_v48 = vrot.slane %v1455_v28, 4 }
  0xac   :  { %v2095_v43 = vpack.c.b16 %v2075_v24, %v2074_v23  ;;  %v2076_v23 = vunpack.c.l.b16 %v2012_v9  ;;  %v2077_v24 = vunpack.c.l.b16 %v2016_v11  ;;  %v2019_v9 = vsel %vm3620_vm4, %v2017_v57, %v2018_v44 }
  0xad   :  { %v4014_v62 = vadd.f32 %v3933_v37, %v709_v52  ;;  %3281 = vmatmul.msk.bf16.gmra.mxu2 %vm310_vm2, %v2094_v50  ;;  %v1460_v50 = vrot.slane %v1458_v30, 5  ;;  %v1635_v52 = vunpack.c.l.b16 %v1433_v40  ;;  %v2022_v59 = vsel %vm3620_vm4, %v2020_v58, %v2021_v60 }
  0xae   :  { %v481_v5 = vpop.f32.mrf.mxu1 }
  0xaf   :  { %v5105_v3 = vmax.f32 %v4014_v62, 0.0  ;;  %v1461_v63 = vor.u32 %v1460_v50, %v1457_v48  ;;  %v1470_v48 = vrot.slane %v1468_v31, 4 }
  0xb0   :  { %v354_v6 = vpop.f32.mrf.mxu0  ;;  %v676_v7 = vpop.f32.mrf.mxu2 }
  0xb1   :  { %v480_v13 = vadd.f32 %v479_v36, %v354_v6  ;;  %3154 = vmatmul.msk.f32.gmra.mxu3 %vm770_vm7, %v5105_v3  ;;  %v1462_v14 = vrot.slane %v1461_v63, 4  ;;  %v1471_v0 = vor.u32 %v1470_v48, %v1466_v16  ;;  %v1963_v48 = vld [vmem:[%s5054_s1 + $0x40] sm:$0xe] }
  0xb2   :  { %v3263_v58 = vrot.slane %v1963_v48, 9 }
  0xb3   :  { %v710_v17 = vadd.f32 %v676_v7, %v480_v13  ;;  %3181 = vmatmul.msk.bf16.gmra.mxu0 %vm310_vm2, %v1655_v4  ;;  %v1656_v4 = vpack.c.b16 %v1636_v53, %v1635_v52  ;;  %v1452_v13 = vrot.slane %v1450_v61, 5  ;;  %v1467_v26 = vsel %vm3661_vm6, %v1462_v14, %v1466_v16  ;;  %v2495_v52 = vld [vmem:[%s5064_s11 + $0x8] sm:$0xff] }
  0xb4   :  { %v1638_v45 = vunpack.c.l.b16 %v1467_v26  ;;  %2506 = vperm.xlu2 %3352, %v2495_v52  }
  0xb5   :  { %v4035_v22 = vadd.f32 %v3933_v37, %v710_v17  ;;  %v1453_v25 = vsel %vm3661_vm6, %v1448_v12, %v1452_v13  ;;  %v1472_v12 = vrot.slane %v1471_v0, 4 }
  0xb6   :  { %v484_v33 = vpop.f32.mrf.mxu1 }
  0xb7   :  { %v5104_v32 = vmax.f32 %v4035_v22, 0.0 }
  0xb8   :  { %v356_v36 = vpop.f32.mrf.mxu0  ;;  %v678_v39 = vpop.f32.mrf.mxu2 }
  0xb9   :  { %v482_v42 = vadd.f32 %v481_v5, %v356_v36  ;;  %3155 = vmatmul.msk.f32.gmra.mxu3 %vm770_vm7, %v5104_v32  ;;  %3250 = vmatmul.msk.bf16.gmra.mxu1 %vm310_vm2, %v3332_v27  ;;  %v3210_v27 = vor.u32 %v3333_v19, %v3209_v18  ;;  %v2300_v36 = vld [vmem:[%s5062_s9 + $0x18] sm:$0xff]  ;;  %v2079_v18 = vunpack.c.l.b16 %v2022_v59  ;;  %v1329_v19 = vld [vmem:[%s5054_s1 + $0x44] sm:$0xf] }
  0xba   :  { %2393 = vmatpush.msrb.mxu3 %v2300_v36 }
  0xbb   :  { %v711_v51 = vadd.f32 %v678_v39, %v482_v42  ;;  %v2096_v42 = vpack.c.b16 %v2077_v24, %v2076_v23  ;;  %v3334_v23 = vld [vmem:[%s5054_s1 + $0x34] sm:$0xff] }
  0xbd   :  { %v4071_v56 = vadd.f32 %v3933_v37, %v711_v51  ;;  %3282 = vmatmul.msk.bf16.gmra.mxu2 %vm310_vm2, %v2095_v43  ;;  %v1637_v43 = vunpack.c.l.b16 %v1453_v25  ;;  %v1480_v51 = vrot.slane %v1478_v34, 4 }
  0xbe   :  { %v486_v5 = vpop.f32.mrf.mxu1 }
  0xbf   :  { %v5099_v1 = vmax.f32 %v4071_v56, 0.0  ;;  %v1657_v54 = vpack.c.b16 %v1638_v45, %v1637_v43  ;;  %v2025_v43 = vrot.slane %v1329_v19, 5 }
  0xc0   :  { %v359_v6 = vpop.f32.mrf.mxu0  ;;  %v681_v2 = vpop.f32.mrf.mxu2 }
  0xc1   :  { %v485_v7 = vadd.f32 %v484_v33, %v359_v6  ;;  %3156 = vmatmul.msk.f32.gmra.mxu3 %vm770_vm7, %v5099_v1  ;;  %v1474_v33 = vshll.u32 %v1327_v20, 16  ;;  %v1328_v20 = vld [vmem:[%s5054_s1 + $0x40] sm:$0xf]  ;;  %v2027_v60 = vrot.slane %v2025_v43, 4 }
  0xc2   :  { %v1489_v34 = vshrl.u32 %v1328_v20, 16  ;;  %v1492_v36 = vshll.u32 %v1328_v20, 16 }
  0xc3   :  { %v712_v17 = vadd.f32 %v681_v2, %v485_v7  ;;  %3182 = vmatmul.msk.bf16.gmra.mxu0 %vm310_vm2, %v1656_v4  ;;  %v1476_v50 = vrot.slane %v1474_v33, 5 }
  0xc5   :  { %v4095_v21 = vadd.f32 %v3933_v37, %v712_v17  ;;  %v1481_v4 = vor.u32 %v1480_v51, %v1476_v50  ;;  %v2078_v17 = vunpack.c.l.b16 %v2019_v9  ;;  %v1477_v26 = vsel %vm3661_vm6, %v1472_v12, %v1476_v50 }
  0xc6   :  { %v489_v30 = vpop.f32.mrf.mxu1  ;;  %v1639_v44 = vunpack.c.l.b16 %v1477_v26  ;;  %v1491_v50 = vrot.slane %v1489_v34, 4  ;;  %v1494_v51 = vrot.slane %v1492_v36, 5  ;;  %v2026_v12 = vsel %vm3620_vm4, %v3263_v58, %v2025_v43  ;;  %v1331_v26 = vld [vmem:[%s5054_s1 + $0x50] sm:$0xf]  ;;  %v2298_v34 = vld [vmem:[%s5062_s9 + $0x8] sm:$0xff] }
  0xc7   :  { %v5100_v28 = vmax.f32 %v4095_v21, 0.0  ;;  %v1482_v13 = vrot.slane %v1481_v4, 4  ;;  %v1526_v43 = vshll.u32 %v1331_v26, 16 }
  0xc8   :  { %v361_v39 = vpop.f32.mrf.mxu0  ;;  %v683_v40 = vpop.f32.mrf.mxu2 }
  0xc9   :  { %v487_v41 = vadd.f32 %v486_v5, %v361_v39  ;;  %3157 = vmatmul.msk.f32.gmra.mxu3 %vm770_vm7, %v5100_v28  ;;  %3251 = vmatmul.msk.bf16.gmra.mxu1 %vm310_vm2, %v3210_v27  ;;  %v1484_v5 = vshll.u32 %v1347_v47, 16  ;;  %v1498_v39 = vshll.u32 %v1329_v19, 16  ;;  %v1330_v47 = vld [vmem:[%s5054_s1 + $0x48] sm:$0xf] }
  0xca   :  { %v1508_v59 = vshll.u32 %v1330_v47, 16 }
  0xcb   :  { %v713_v46 = vadd.f32 %v683_v40, %v487_v41  ;;  %v1486_v14 = vrot.slane %v1484_v5, 5  ;;  %v1502_v40 = vshrl.u32 %v1329_v19, 16  ;;  %v1500_v52 = vrot.slane %v1498_v39, 5 }
  0xcc   :  { %v1510_v19 = vrot.slane %v1508_v59, 5 }
  0xcd   :  { %v4117_v53 = vadd.f32 %v3933_v37, %v713_v46  ;;  %3283 = vmatmul.msk.bf16.gmra.mxu2 %vm310_vm2, %v2096_v42  ;;  %v1487_v27 = vsel %vm3661_vm6, %v1482_v13, %v1486_v14  ;;  %v2097_v42 = vpack.c.b16 %v2079_v18, %v2078_v17 }
  0xce   :  { %v491_v63 = vpop.f32.mrf.mxu1  ;;  %v1640_v46 = vunpack.c.l.b16 %v1487_v27  ;;  %v3335_v27 = vld [vmem:[%s5054_s1 + $0x40] sm:$0xff] }
  0xcf   :  { %v5078_v61 = vmax.f32 %v4117_v53, 0.0 }
  0xd0   :  { %v364_v6 = vpop.f32.mrf.mxu0  ;;  %v686_v2 = vpop.f32.mrf.mxu2  ;;  %v1658_v4 = vpack.c.b16 %v1640_v46, %v1639_v44  ;;  %v4196_v46 = vld [vmem:[%s5054_s1 + $0x54] sm:$0xf] }
  0xd1   :  { %v490_v7 = vadd.f32 %v489_v30, %v364_v6  ;;  %3158 = vmatmul.msk.f32.gmra.mxu3 %vm770_vm7, %v5078_v61  ;;  %v2299_v30 = vld [vmem:[%s5062_s9 + $0x10] sm:$0xff] }
  0xd2   :  { %2394 = vmatpush.msrb.mxu3 %v2299_v30 }
  0xd3   :  { %v714_v11 = vadd.f32 %v686_v2, %v490_v7  ;;  %3183 = vmatmul.msk.bf16.gmra.mxu0 %vm310_vm2, %v1657_v54  ;;  %v1504_v54 = vrot.slane %v1502_v40, 4  ;;  %v1495_v7 = vor.u32 %v1494_v51, %v1491_v50  ;;  %v1348_v51 = vld [vmem:[%s5054_s1 + $0x4c] sm:$0x1] }
  0xd4   :  { %2395 = vmatpush.msrb.mxu3 %v2298_v34  ;;  %v3221_v34 = vld [vmem:[%s5054_s1 + $0x48] sm:$0xf] }
  0xd5   :  { %v4130_v16 = vadd.f32 %v3933_v37, %v714_v11  ;;  %v1505_v9 = vor.u32 %v1504_v54, %v1500_v52  ;;  %v1496_v17 = vrot.slane %v1495_v7, 4  ;;  %v2035_v7 = vrot.slane %v4196_v46, 5 }
  0xd6   :  { %v494_v25 = vpop.f32.mrf.mxu1 }
  0xd7   :  { %v5077_v24 = vmax.f32 %v4130_v16, 0.0  ;;  %v1506_v18 = vrot.slane %v1505_v9, 4  ;;  %v1501_v40 = vsel %vm3661_vm6, %v1496_v17, %v1500_v52  ;;  %v1964_v52 = vld [vmem:[%s5054_s1 + $0x50] sm:$0xe] }
  0xd8   :  { %v366_v31 = vpop.f32.mrf.mxu0  ;;  %v688_v33 = vpop.f32.mrf.mxu2  ;;  %v1641_v48 = vunpack.c.l.b16 %v1501_v40  ;;  %v1333_v40 = vld [vmem:[%s5054_s1 + $0x58] sm:$0xf] }
  0xd9   :  { %v492_v41 = vadd.f32 %v491_v63, %v366_v31  ;;  %3159 = vmatmul.msk.f32.gmra.mxu3 %vm770_vm7, %v5077_v24  ;;  %3252 = vmatmul.msk.bf16.gmra.mxu1 %vm310_vm2, %v3334_v23  ;;  %v2028_v63 = vrot.slane %v1330_v47, 5  ;;  %v2080_v23 = vunpack.c.l.b16 %v2026_v12 }
  0xdb   :  { %v715_v45 = vadd.f32 %v688_v33, %v492_v41  ;;  %v2029_v13 = vsel %vm3620_vm4, %v2027_v60, %v2028_v63  ;;  %v1512_v33 = vshrl.u32 %v1330_v47, 16  ;;  %v1511_v41 = vsel %vm3661_vm6, %v1506_v18, %v1510_v19 }
  0xdc   :  { %v1642_v50 = vunpack.c.l.b16 %v1511_v41  ;;  %v1528_v60 = vrot.slane %v1526_v43, 5 }
  0xdd   :  { %v4160_v57 = vadd.f32 %v3933_v37, %v715_v45  ;;  %3284 = vmatmul.msk.bf16.gmra.mxu2 %vm310_vm2, %v2097_v42  ;;  %v1523_v42 = vshrl.u32 %v1331_v26, 16  ;;  %v1514_v54 = vrot.slane %v1512_v33, 4 }
  0xde   :  { %v496_v5 = vpop.f32.mrf.mxu1  ;;  %v1659_v59 = vpack.c.b16 %v1642_v50, %v1641_v48  ;;  %v2038_v50 = vrot.slane %v1333_v40, 5 }
  0xdf   :  { %v5076_v0 = vmax.f32 %v4160_v57, 0.0  ;;  %v1525_v58 = vrot.slane %v1523_v42, 4  ;;  %v1515_v12 = vor.u32 %v1514_v54, %v1510_v19 }
  0xe0   :  { %v369_v6 = vpop.f32.mrf.mxu0  ;;  %v691_v2 = vpop.f32.mrf.mxu2 }
  0xe1   :  { %v495_v11 = vadd.f32 %v494_v25, %v369_v6  ;;  %3160 = vmatmul.msk.f32.gmra.mxu3 %vm770_vm7, %v5076_v0  ;;  %v2081_v25 = vunpack.c.l.b16 %v2029_v13  ;;  %v2031_v6 = vrot.slane %v1348_v51, 5  ;;  %v1518_v13 = vshll.u32 %v1348_v51, 16  ;;  %v2297_v51 = vld [vmem:[%s5062_s9] sm:$0xff] }
  0xe2   :  { %v1529_v18 = vor.u32 %v1528_v60, %v1525_v58  ;;  %v1516_v19 = vrot.slane %v1515_v12, 4  ;;  %v1536_v60 = vshrl.u32 %v4196_v46, 16  ;;  %2396 = vmatpush.msrb.mxu3 %v2297_v51  ;;  %v1349_v12 = vld [vmem:[%s5054_s1 + $0x5c] sm:$0x1] }
  0xe3   :  { %v716_v14 = vadd.f32 %v691_v2, %v495_v11  ;;  %3184 = vmatmul.msk.bf16.gmra.mxu0 %vm310_vm2, %v1658_v4  ;;  %v2098_v44 = vpack.c.b16 %v2081_v25, %v2080_v23  ;;  %v3264_v2 = vrot.slane %v1964_v52, 9  ;;  %v1532_v23 = vshll.u32 %v4196_v46, 16 }
  0xe4   :  { %v1520_v33 = vrot.slane %v1518_v13, 5  ;;  %v2040_v46 = vrot.slane %v2038_v50, 4 }
  0xe5   :  { %v4173_v20 = vadd.f32 %v3933_v37, %v716_v14  ;;  %v2036_v26 = vsel %vm3620_vm4, %v3264_v2, %v2035_v7 }
  0xe6   :  { %v499_v31 = vpop.f32.mrf.mxu1  ;;  %v2083_v43 = vunpack.c.l.b16 %v2036_v26  ;;  %v1521_v48 = vsel %vm3661_vm6, %v1516_v19, %v1520_v33 }
  0xe7   :  { %v5071_v30 = vmax.f32 %v4173_v20, 0.0  ;;  %v1643_v13 = vunpack.c.l.b16 %v1521_v48  ;;  %v1334_v48 = vld [vmem:[%s5054_s1 + $0x60] sm:$0xf] }
  0xe8   :  { %v371_v36 = vpop.f32.mrf.mxu0  ;;  %v693_v39 = vpop.f32.mrf.mxu2 }
  0xe9   :  { %v497_v45 = vadd.f32 %v496_v5, %v371_v36  ;;  %3161 = vmatmul.msk.f32.gmra.mxu3 %vm770_vm7, %v5071_v30  ;;  %3253 = vmatmul.msk.bf16.gmra.mxu1 %vm310_vm2, %v3335_v27  ;;  %v2030_v5 = vrot.slane %v2028_v63, 4  ;;  %v1530_v36 = vrot.slane %v1529_v18, 4  ;;  %v2037_v18 = vrot.slane %v2035_v7, 4 }
  0xeb   :  { %v717_v47 = vadd.f32 %v693_v39, %v497_v45  ;;  %v2032_v63 = vsel %vm3620_vm4, %v2030_v5, %v2031_v6  ;;  %v1534_v39 = vrot.slane %v1532_v23, 5  ;;  %v1542_v5 = vshll.u32 %v1333_v40, 16 }
  0xec   :  { %v2082_v42 = vunpack.c.l.b16 %v2032_v63  ;;  %v1546_v6 = vshrl.u32 %v1333_v40, 16  ;;  %v2041_v23 = vrot.slane %v1349_v12, 5 }
  0xed   :  { %v4205_v4 = vadd.f32 %v3933_v37, %v717_v47  ;;  %3285 = vmatmul.msk.bf16.gmra.mxu2 %vm310_vm2, %v2098_v44  ;;  %v1535_v58 = vsel %vm3661_vm6, %v1530_v36, %v1534_v39  ;;  %v1544_v63 = vrot.slane %v1542_v5, 5 }
  0xee   :  { %v501_v11 = vpop.f32.mrf.mxu1  ;;  %v2042_v7 = vsel %vm3620_vm4, %v2040_v46, %v2041_v23 }
  0xef   :  { %v5069_v9 = vmax.f32 %v4205_v4, 0.0 }
  0xf0   :  { %v374_v14 = vpop.f32.mrf.mxu0  ;;  %v696_v17 = vpop.f32.mrf.mxu2 }
  0xf1   :  { %v500_v25 = vadd.f32 %v499_v31, %v374_v14  ;;  %3162 = vmatmul.msk.f32.gmra.mxu3 %vm770_vm7, %v5069_v9  ;;  %v3336_v31 = vld [vmem:[%s5054_s1 + $0x4c] sm:$0xf0] }
  0xf2   :  { %v3222_v45 = vor.u32 %v3336_v31, %v3221_v34  ;;  %v2039_v34 = vsel %vm3620_vm4, %v2037_v18, %v2038_v50  ;;  %v1335_v50 = vld [vmem:[%s5054_s1 + $0x64] sm:$0xf] }
  0xf3   :  { %v718_v27 = vadd.f32 %v696_v17, %v500_v25  ;;  %3185 = vmatmul.msk.bf16.gmra.mxu0 %vm310_vm2, %v1659_v59  ;;  %v2099_v59 = vpack.c.b16 %v2083_v43, %v2082_v42  ;;  %v1644_v17 = vunpack.c.l.b16 %v1535_v58  ;;  %v1538_v25 = vrot.slane %v1536_v60, 4 }
  0xf4   :  { %v1552_v43 = vshll.u32 %v1349_v12, 16  ;;  %v1557_v60 = vshrl.u32 %v1334_v48, 16  ;;  %v3337_v12 = vld [vmem:[%s5054_s1 + $0x54] sm:$0xff] }
  0xf5   :  { %v4229_v41 = vadd.f32 %v3933_v37, %v718_v27  ;;  %v1660_v19 = vpack.c.b16 %v1644_v17, %v1643_v13  ;;  %v1539_v40 = vor.u32 %v1538_v25, %v1534_v39  ;;  %v2085_v39 = vunpack.c.l.b16 %v2042_v7 }
  0xf6   :  { %v504_v47 = vpop.f32.mrf.mxu1 }
  0xf7   :  { %v5072_v44 = vmax.f32 %v4229_v41, 0.0 }
  0xf8   :  { %v376_v52 = vpop.f32.mrf.mxu0  ;;  %v698_v54 = vpop.f32.mrf.mxu2 }
  0xf9   :  { %v502_v2 = vadd.f32 %v501_v11, %v376_v52  ;;  %3163 = vmatmul.msk.f32.gmra.mxu3 %vm770_vm7, %v5072_v44  ;;  %3254 = vmatmul.msk.bf16.gmra.mxu1 %vm310_vm2, %v3222_v45  ;;  %v1548_v11 = vrot.slane %v1546_v6, 4  ;;  %v2084_v52 = vunpack.c.l.b16 %v2039_v34  ;;  %v1560_v6 = vshll.u32 %v1334_v48, 16  ;;  %v1965_v34 = vld [vmem:[%s5054_s1 + $0x60] sm:$0xe] }
  0xfa   :  { %v5107_v48 = vlaneseq }
  0xfb   :  { %v719_v14 = vadd.f32 %v698_v54, %v502_v2  ;;  %v1549_v42 = vor.u32 %v1548_v11, %v1544_v63  ;;  %v1540_v54 = vrot.slane %v1539_v40, 4  ;;  %v1566_v2 = vshll.u32 %v1335_v50, 16 }
  0xfc   :  { %v2100_v46 = vpack.c.b16 %v2085_v39, %v2084_v52  ;;  %v1559_v11 = vrot.slane %v1557_v60, 4  ;;  %v2045_v40 = vrot.slane %v1335_v50, 5 }
  0xfd   :  { %v4248_v26 = vadd.f32 %v3933_v37, %v719_v14  ;;  %3286 = vmatmul.msk.bf16.gmra.mxu2 %vm310_vm2, %v2099_v59  ;;  %v1550_v58 = vrot.slane %v1549_v42, 4  ;;  %v1570_v59 = vshrl.u32 %v1335_v50, 16  ;;  %v1545_v23 = vsel %vm3661_vm6, %v1540_v54, %v1544_v63 }
  0xfe   :  { %v506_v33 = vpop.f32.mrf.mxu1  ;;  %v1645_v42 = vunpack.c.l.b16 %v1545_v23  ;;  %v4311_v23 = vld [vmem:[%s5061_s8] ss:$0 sm:$0xff] }
  0xff   :  { %v5073_v27 = vmax.f32 %v4248_v26, 0.0  ;;  %v1572_v7 = vrot.slane %v1570_v59, 4  ;;  %v4298_v59 = vpop.permute.xlu1 %915 }
 0x100   :  { %v379_v31 = vpop.f32.mrf.mxu0  ;;  %v701_v36 = vpop.f32.mrf.mxu2 }
 0x101   :  { %v505_v45 = vadd.f32 %v504_v47, %v379_v31  ;;  %3164 = vmatmul.msk.f32.gmra.mxu3 %vm770_vm7, %v5073_v27  ;;  %v1554_v47 = vrot.slane %v1552_v43, 5  ;;  %v1562_v31 = vrot.slane %v1560_v6, 5 }
 0x103   :  { %v720_v51 = vadd.f32 %v701_v36, %v505_v45  ;;  %3186 = vmatmul.msk.bf16.gmra.mxu0 %vm310_vm2, %v1660_v19  ;;  %v1555_v25 = vsel %vm3661_vm6, %v1550_v58, %v1554_v47  ;;  %v1568_v36 = vrot.slane %v1566_v2, 5  ;;  %v4284_v45 = vpop.permute.xlu0 %909  ;;  %v1563_v39 = vor.u32 %v1562_v31, %v1559_v11 }
 0x104   :  { %v1646_v43 = vunpack.c.l.b16 %v1555_v25  ;;  %v2047_v58 = vrot.slane %v2045_v40, 4 }
 0x105   :  { %v4267_v5 = vadd.f32 %v3933_v37, %v720_v51  ;;  %v3265_v51 = vrot.slane %v1965_v34, 9  ;;  %v1573_v54 = vor.u32 %v1572_v7, %v1568_v36  ;;  %v1564_v25 = vrot.slane %v1563_v39, 4 }
 0x106   :  { %v1899_v14 = vpop.f32.mrf.mxu1  ;;  %v1661_v6 = vpack.c.b16 %v1646_v43, %v1645_v42 }
 0x107   :  { %v5067_v13 = vmax.f32 %v4267_v5, 0.0  ;;  %v1574_v11 = vrot.slane %v1573_v54, 4  ;;  %v919_v9 = vpop.permute.xlu1 %918 }
 0x108   :  { %v381_v17 = vpop.f32.mrf.mxu0  ;;  %v703_v18 = vpop.f32.mrf.mxu2 }
 0x109   :  { %v507_v19 = vadd.f32 %v506_v33, %v381_v17  ;;  %3165 = vmatmul.msk.f32.gmra.mxu3 %vm770_vm7, %v5067_v13  ;;  %3255 = vmatmul.msk.bf16.gmra.mxu1 %vm310_vm2, %v3337_v12  ;;  %v4289_v33 = vld [vmem:[%s5054_s1 + $0x68] sm:$0xf] }
 0x10a   :  { %v1576_v50 = vshll.u32 %v4289_v33, 16  ;;  %v2048_v47 = vrot.slane %v4289_v33, 5 }
 0x10b   :  { %v721_v63 = vadd.f32 %v703_v18, %v507_v19  ;;  %v2046_v18 = vsel %vm3620_vm4, %v3265_v51, %v2045_v40  ;;  %v1337_v40 = vld [vmem:[%s5054_s1 + $0x70] sm:$0xf]  ;;  %v913_v43 = vpop.permute.xlu0 %912  ;;  %v1569_v51 = vsel %vm3661_vm6, %v1564_v25, %v1568_v36 }
 0x10c   :  { %v4313_v19 = vrot.slane %v1576_v50, 5  ;;  %v2049_v34 = vsel %vm3620_vm4, %v2047_v58, %v2048_v47  ;;  %v3338_v50 = vld [vmem:[%s5054_s1 + $0x60] sm:$0xff]  ;;  %v1580_v58 = vshrl.u32 %v4289_v33, 16  ;;  %v1591_v36 = vshrl.u32 %v1337_v40, 16 }
 0x10d   :  { %v4292_v52 = vadd.f32 %v3933_v37, %v721_v63  ;;  %3287 = vmatmul.msk.bf16.gmra.mxu2 %vm310_vm2, %v2100_v46  ;;  %v4301_v37 = vand.u32 127, %v5107_v48  ;;  %v2087_v42 = vunpack.c.l.b16 %v2049_v34  ;;  %v1647_v34 = vunpack.c.l.b16 %v1569_v51 }
 0x10e   :  { %v1901_v2 = vpop.f32.mrf.mxu1  ;;  %v1579_v39 = vsel %vm3661_vm6, %v1574_v11, %v4313_v19  ;;  %v1582_v51 = vrot.slane %v1580_v58, 4 }
 0x10f   :  { %v5068_v60 = vmax.f32 %v4292_v52, 0.0  ;;  %v4321_v7 = vadd.s32 4294967288, %v4301_v37  ;;  %v922_v54 = vperm.slane %v4284_v45, %v4301_v37  ;;  %v4346_v45 = vadd.s32 4294967272, %v4301_v37 }
 0x110   :  { %v1722_v12 = vpop.f32.mrf.mxu0  ;;  %v2161_v17 = vpop.f32.mrf.mxu2  ;;  %vm1013_vm3 = vcmp.lt.s32.totalorder %v4301_v37, 16 }
 0x111   :  { %v1900_v46 = vadd.f32 %v1899_v14, %v1722_v12  ;;  %3166 = vmatmul.msk.f32.gmra.mxu3 %vm770_vm7, %v5068_v60  ;;  %v2086_v14 = vunpack.c.l.b16 %v2046_v18  ;;  %v4342_v12 = vadd.s32 4294967280, %v4301_v37  ;;  %v1594_v18 = vshll.u32 %v1337_v40, 16  ;;  %v4354_v60 = vld [vmem:[%s5058_s5] ss:$0 sm:$0xff] }
 0x112   :  { %v924_v11 = vperm.slane %v913_v43, %v4321_v7  ;;  %v1350_v43 = vld [vmem:[%s5054_s1 + $0x6c] sm:$0x1]  ;;  %v932_v58 = vperm.slane %v919_v9, %v4346_v45 }
 0x113   :  { %v2221_v31 = vadd.f32 %v2161_v17, %v1900_v46  ;;  %3187 = vmatmul.msk.bf16.gmra.mxu0 %vm310_vm2, %v1661_v6  ;;  %v2101_v40 = vpack.c.b16 %v2087_v42, %v2086_v14  ;;  %v1966_v14 = vld [vmem:[%s5054_s1 + $0x70] sm:$0xe]  ;;  %v1593_v42 = vrot.slane %v1591_v36, 4  ;;  %v2051_v27 = vrot.slane %v1350_v43, 5 }
 0x114   :  { %v926_v30 = vsel %vm925_vm8, %v924_v11, %v922_v54  ;;  %v3266_v36 = vrot.slane %v1966_v14, 9  ;;  %v1583_v54 = vor.u32 %v1582_v51, %v4313_v19  ;;  %v1586_v11 = vshll.u32 %v1350_v43, 16  ;;  %v2504_v14 = vpop.permute.xlu1 %2503 }
 0x115   :  { %v4327_v63 = vadd.f32 %v4311_v23, %v2221_v31  ;;  %v1648_v31 = vunpack.c.l.b16 %v1579_v39 }
 0x116   :  { %v1904_v17 = vpop.f32.mrf.mxu1  ;;  %v1584_v51 = vrot.slane %v1583_v54, 4 }
 0x117   :  { %v5070_v6 = vmax.f32 %v4327_v63, 0.0  ;;  %v1662_v44 = vpack.c.b16 %v1648_v31, %v1647_v34 }
 0x118   :  { %v1724_v46 = vpop.f32.mrf.mxu0  ;;  %v2163_v25 = vpop.f32.mrf.mxu2 }
 0x119   :  { %v1902_v13 = vadd.f32 %v1901_v2, %v1724_v46  ;;  %3291 = vmatmul.msk.f32.vlgmr.msrb.gmra.mxu3 %vm770_vm7, %v5070_v6  ;;  %3256 = vmatmul.msk.bf16.gmra.mxu1 %vm310_vm2, %v3338_v50  ;;  %v928_v2 = vperm.slane %v4298_v59, %v4342_v12  ;;  %v4365_v46 = vld [vmem:[%s5054_s1 + $0x74] sm:$0xf]  ;;  %v1596_v50 = vrot.slane %v1594_v18, 5 }
 0x11a   :  { %v2055_v18 = vrot.slane %v4365_v46, 5 }
 0x11b   :  { %v2222_v39 = vadd.f32 %v2163_v25, %v1902_v13  ;;  %v2050_v25 = vrot.slane %v2048_v47, 4  ;;  %v1597_v31 = vor.u32 %v1596_v50, %v1593_v42  ;;  %v1588_v42 = vrot.slane %v1586_v11, 5 }
 0x11c   :  { %v836_v6 = vpop.f32.mrf.mxu3  ;;  %v2056_v43 = vsel %vm3620_vm4, %v3266_v36, %v2055_v18 }
 0x11d   :  { %v4373_v13 = vadd.f32 %v4311_v23, %v2222_v39  ;;  %v837_v59 = vadd.f32 %v4354_v60, %v836_v6  ;;  %3288 = vmatmul.msk.bf16.gmra.mxu2 %vm310_vm2, %v2101_v40  ;;  %v1600_v39 = vshll.u32 %v4365_v46, 16  ;;  %v930_v40 = vsel %vm929_vm9, %v928_v2, %v926_v30 }
 0x11e   :  { %v1906_v34 = vpop.f32.mrf.mxu1  ;;  %v2052_v19 = vsel %vm3620_vm4, %v2050_v25, %v2051_v27  ;;  %v4394_v50 = vsel %vm933_vm10, %v932_v58, %v930_v40  ;;  %v3233_v27 = vld [vmem:[%s5054_s1 + $0x68] sm:$0xf] }
 0x11f   :  { %v5074_v9 = vmax.f32 %v4373_v13, 0.0  ;;  %3383 = vtanh.f32 %v837_v59  ;;  %v4397_v2 = vrot.slane %v1600_v39, 5  ;;  %v3339_v59 = vld [vmem:[%s5054_s1 + $0x6c] sm:$0xf0]  ;;  %v2088_v11 = vunpack.c.l.b16 %v2052_v19 }
 0x120   :  { %v1727_v6 = vpop.f32.mrf.mxu0  ;;  %v2166_v33 = vpop.f32.mrf.mxu2  ;;  %v3234_v40 = vor.u32 %v3339_v59, %v3233_v27 }
 0x121   :  { %v1905_v47 = vadd.f32 %v1904_v17, %v1727_v6  ;;  %3292 = vmatmul.msk.f32.gmra.mxu3 %vm770_vm7, %v5074_v9  ;;  %v1598_v17 = vrot.slane %v1597_v31, 4  ;;  %v1339_v31 = vld [vmem:[%s5054_s1 + $0x78] sm:$0xf]  ;;  %v1589_v6 = vsel %vm3661_vm6, %v1584_v51, %v1588_v42  ;;  %v2510_v59 = vpop.permute.xlu0 %2509 }
 0x122   :  { %v1610_v0 = vshll.u32 %v1339_v31, 16  ;;  %v1614_v51 = vshrl.u32 %v1339_v31, 16 }
 0x123   :  { %v2223_v30 = vadd.f32 %v2166_v33, %v1905_v47  ;;  %3188 = vmatmul.msk.bf16.gmra.mxu0 %vm310_vm2, %v1662_v44  ;;  %v2089_v44 = vunpack.c.l.b16 %v2056_v43  ;;  %v2514_v33 = vperm.slane %v2504_v14, %v4301_v37  ;;  %v1603_v19 = vsel %vm3661_vm6, %v1598_v17, %v4397_v2  ;;  %v2513_v17 = vpop.permute.xlu1 %2512 }
 0x124   :  { %v839_v25 = vpop.f32.mrf.mxu3  ;;  %v1604_v43 = vshrl.u32 %v4365_v46, 16  ;;  %v2519_v61 = vperm.slane %v2513_v17, %v4346_v45 }
 0x125   :  { %v3384_v36 = vpop.eup %3383  ;;  %v4406_v54 = vadd.f32 %v4311_v23, %v2223_v30  ;;  %v840_v58 = vadd.f32 %v4354_v60, %v839_v25  ;;  %v2507_v25 = vpop.permute.xlu2 %2506  ;;  %v2102_v27 = vpack.c.b16 %v2089_v44, %v2088_v11  ;;  %v1612_v44 = vrot.slane %v1610_v0, 5 }
 0x126   :  { %v949_v39 = vmul.f32 %v3384_v36, %v4394_v50  ;;  %v1909_v30 = vpop.f32.mrf.mxu1  ;;  %v2515_v42 = vperm.slane %v2507_v25, %v4321_v7  ;;  %v1649_v25 = vunpack.c.l.b16 %v1589_v6  ;;  %v1606_v11 = vrot.slane %v1604_v43, 4 }
 0x127   :  { %v5080_v47 = vmax.f32 %v4406_v54, 0.0  ;;  %3385 = vtanh.f32 %v840_v58  ;;  %v2058_v58 = vrot.slane %v1339_v31, 5  ;;  %v2057_v6 = vrot.slane %v2055_v18, 4 }
 0x128   :  { %v1729_v9 = vpop.f32.mrf.mxu0  ;;  %v965_v36 = vsel %vm310_vm2, %v949_v39, 0.0  ;;  %v2168_v55 = vpop.f32.mrf.mxu2  ;;  %v2516_v24 = vsel %vm925_vm8, %v2515_v42, %v2514_v33  ;;  %v2517_v39 = vperm.slane %v2510_v59, %v4342_v12 }
 0x129   :  { %v1907_v14 = vadd.f32 %v1906_v34, %v1729_v9  ;;  %966 = vadd.xlane.f32.xlu2 %v965_v36  ;;  %3293 = vmatmul.msk.f32.gmra.mxu3 %vm770_vm7, %v5080_v47  ;;  %v1650_v9 = vunpack.c.l.b16 %v1603_v19  ;;  %v1351_v34 = vld [vmem:[%s5054_s1 + $0x7c] sm:$0x1]  ;;  %v1616_v47 = vrot.slane %v1614_v51, 4  ;;  %v2060_v0 = vrot.slane %v2058_v58, 4 }
 0x12a   :  { %3257 = vmatmul.msk.bf16.gmra.mxu1 %vm310_vm2, %v3234_v40  ;;  %v2518_v40 = vsel %vm929_vm9, %v2517_v39, %v2516_v24  ;;  %v2061_v19 = vrot.slane %v1351_v34, 5  ;;  %v1620_v17 = vshll.u32 %v1351_v34, 16  ;;  %v2059_v46 = vsel %vm3620_vm4, %v2057_v6, %v2058_v58 }
 0x12b   :  { %v2224_v15 = vadd.f32 %v2168_v55, %v1907_v14  ;;  %v4440_v55 = vsel %vm933_vm10, %v2519_v61, %v2518_v40  ;;  %v1663_v43 = vpack.c.b16 %v1650_v9, %v1649_v25  ;;  %v1617_v61 = vor.u32 %v1616_v47, %v1612_v44 }
 0x12c   :  { %v842_v36 = vpop.f32.mrf.mxu3  ;;  %v2062_v18 = vsel %vm3620_vm4, %v2060_v0, %v2061_v19  ;;  %v1622_v47 = vrot.slane %v1620_v17, 5  ;;  %v2090_v40 = vunpack.c.l.b16 %v2059_v46  ;;  %vm1065_vm4 = vcmask 130048  }
 0x12d   :  { %v3386_v31 = vpop.eup %3385  ;;  %v4435_v33 = vadd.f32 %v4311_v23, %v2224_v15  ;;  %v843_v42 = vadd.f32 %v4354_v60, %v842_v36  ;;  %3289 = vmatmul.msk.bf16.gmra.mxu2 %vm310_vm2, %v2102_v27  ;;  %v1607_v27 = vor.u32 %v1606_v11, %v4397_v2  ;;  %v1618_v2 = vrot.slane %v1617_v61, 4 }
 0x12e   :  { %v950_v45 = vmul.f32 %v3386_v31, %v4394_v50  ;;  %v1911_v15 = vpop.f32.mrf.mxu1  ;;  %v2091_v31 = vunpack.c.l.b16 %v2062_v18 }
 0x12f   :  { %v5097_v24 = vmax.f32 %v4435_v33, 0.0  ;;  %3387 = vtanh.f32 %v843_v42  ;;  %v1608_v36 = vrot.slane %v1607_v27, 4 }
 0x130   :  { %v1732_v51 = vpop.f32.mrf.mxu0  ;;  %v968_v14 = vsel %vm310_vm2, %v950_v45, 0.0  ;;  %v2171_v59 = vpop.f32.mrf.mxu2 }
 0x131   :  { %v1910_v39 = vadd.f32 %v1909_v30, %v1732_v51  ;;  %969 = vadd.xlane.f32.xlu2 %v968_v14  ;;  %3294 = vmatmul.msk.f32.gmra.mxu3 %vm770_vm7, %v5097_v24  ;;  %v1623_v51 = vsel %vm3661_vm6, %v1618_v2, %v1622_v47 }
 0x132   :  { %v1652_v17 = vunpack.c.l.b16 %v1623_v51 }
 0x133   :  { %v2225_v25 = vadd.f32 %v2171_v59, %v1910_v39  ;;  %3189 = vmatmul.msk.bf16.gmra.mxu0 %vm310_vm2, %v1663_v43  ;;  %v1613_v43 = vsel %vm3661_vm6, %v1608_v36, %v1612_v44  ;;  %v2103_v59 = vpack.c.b16 %v2091_v31, %v2090_v40 }
 0x134   :  { %v845_v9 = vpop.f32.mrf.mxu3  ;;  %v1651_v61 = vunpack.c.l.b16 %v1613_v43 }
 0x135   :  { %v3388_v34 = vpop.eup %3387  ;;  %v4457_v30 = vadd.f32 %v4311_v23, %v2225_v25  ;;  %v846_v11 = vadd.f32 %v4354_v60, %v845_v9 }
 0x136   :  { %v951_v58 = vmul.f32 %v3388_v34, %v4394_v50  ;;  %v1914_v45 = vpop.f32.mrf.mxu1  ;;  %v1664_v25 = vpack.c.b16 %v1652_v17, %v1651_v61 }
 0x137   :  { %v5092_v42 = vmax.f32 %v4457_v30, 0.0  ;;  %3389 = vtanh.f32 %v846_v11 }
 0x138   :  { %v1734_v6 = vpop.f32.mrf.mxu0  ;;  %v971_v0 = vsel %vm310_vm2, %v951_v58, 0.0  ;;  %v2173_v19 = vpop.f32.mrf.mxu2 }
 0x139   :  { %v1912_v14 = vadd.f32 %v1911_v15, %v1734_v6  ;;  %972 = vadd.xlane.f32.xlu0 %v971_v0  ;;  %3295 = vmatmul.msk.f32.gmra.mxu3 %vm770_vm7, %v5092_v42 }
 0x13a   :  { %3258 = vmatmul.msk.bf16.gmra.mxu1 %vm310_vm2, %v3340_v8 }
 0x13b   :  { %v2226_v27 = vadd.f32 %v2173_v19, %v1912_v14 }
 0x13c   :  { %v848_v39 = vpop.f32.mrf.mxu3 }
 0x13d   :  { %v3390_v46 = vpop.eup %3389  ;;  %v4475_v18 = vadd.f32 %v4311_v23, %v2226_v27  ;;  %v849_v38 = vadd.f32 %v4354_v60, %v848_v39  ;;  %3290 = vmatmul.msk.bf16.gmra.mxu2 %vm310_vm2, %v2103_v59 }
 0x13e   :  { %v952_v44 = vmul.f32 %v3390_v46, %v4394_v50  ;;  %v1916_v9 = vpop.f32.mrf.mxu1 }
 0x13f   :  { %v5094_v15 = vmax.f32 %v4475_v18, 0.0  ;;  %3391 = vtanh.f32 %v849_v38 }
 0x140   :  { %v1737_v36 = vpop.f32.mrf.mxu0  ;;  %v974_v2 = vsel %vm310_vm2, %v952_v44, 0.0  ;;  %v2176_v47 = vpop.f32.mrf.mxu2 }
 0x141   :  { %v1915_v34 = vadd.f32 %v1914_v45, %v1737_v36  ;;  %975 = vadd.xlane.f32.xlu1 %v974_v2  ;;  %3296 = vmatmul.msk.f32.gmra.mxu3 %vm770_vm7, %v5094_v15 }
 0x143   :  { %v2227_v11 = vadd.f32 %v2176_v47, %v1915_v34  ;;  %3190 = vmatmul.msk.bf16.gmra.mxu0 %vm310_vm2, %v1664_v25 }
 0x144   :  { %v851_v40 = vpop.f32.mrf.mxu3 }
 0x145   :  { %v3392_v31 = vpop.eup %3391  ;;  %v4487_v58 = vadd.f32 %v4311_v23, %v2227_v11  ;;  %v852_v8 = vadd.f32 %v4354_v60, %v851_v40 }
 0x146   :  { %v953_v6 = vmul.f32 %v3392_v31, %v4394_v50  ;;  %v1919_v45 = vpop.f32.mrf.mxu1 }
 0x147   :  { %v5085_v0 = vmax.f32 %v4487_v58, 0.0  ;;  %3393 = vtanh.f32 %v852_v8 }
 0x148   :  { %v1739_v19 = vpop.f32.mrf.mxu0  ;;  %v977_v43 = vsel %vm310_vm2, %v953_v6, 0.0  ;;  %v2178_v51 = vpop.f32.mrf.mxu2 }
 0x149   :  { %v1917_v14 = vadd.f32 %v1916_v9, %v1739_v19  ;;  %978 = vadd.xlane.f32.xlu2 %v977_v43  ;;  %3297 = vmatmul.msk.f32.gmra.mxu3 %vm770_vm7, %v5085_v0 }
 0x14b   :  { %v2228_v59 = vadd.f32 %v2178_v51, %v1917_v14 }
 0x14c   :  { %v854_v27 = vpop.f32.mrf.mxu3 }
 0x14d   :  { %v3394_v61 = vpop.eup %3393  ;;  %v4497_v17 = vadd.f32 %v4311_v23, %v2228_v59  ;;  %v855_v39 = vadd.f32 %v4354_v60, %v854_v27 }
 0x14e   :  { %v954_v46 = vmul.f32 %v3394_v61, %v4394_v50  ;;  %v1921_v44 = vpop.f32.mrf.mxu1 }
 0x14f   :  { %v5089_v38 = vmax.f32 %v4497_v17, 0.0  ;;  %3395 = vtanh.f32 %v855_v39 }
 0x150   :  { %v1742_v25 = vpop.f32.mrf.mxu0  ;;  %v980_v9 = vsel %vm310_vm2, %v954_v46, 0.0  ;;  %v2181_v36 = vpop.f32.mrf.mxu2 }
 0x151   :  { %v1920_v2 = vadd.f32 %v1919_v45, %v1742_v25  ;;  %981 = vadd.xlane.f32.xlu2 %v980_v9  ;;  %3298 = vmatmul.msk.f32.gmra.mxu3 %vm770_vm7, %v5089_v38 }
 0x153   :  { %v2229_v47 = vadd.f32 %v2181_v36, %v1920_v2 }
 0x154   :  { %v857_v34 = vpop.f32.mrf.mxu3 }
 0x155   :  { %v3396_v11 = vpop.eup %3395  ;;  %v4507_v40 = vadd.f32 %v4311_v23, %v2229_v47  ;;  %v858_v31 = vadd.f32 %v4354_v60, %v857_v34 }
 0x156   :  { %v955_v8 = vmul.f32 %v3396_v11, %v4394_v50  ;;  %v1924_v19 = vpop.f32.mrf.mxu1 }
 0x157   :  { %v5087_v6 = vmax.f32 %v4507_v40, 0.0  ;;  %3397 = vtanh.f32 %v858_v31 }
 0x158   :  { %v1744_v45 = vpop.f32.mrf.mxu0  ;;  %v983_v43 = vsel %vm310_vm2, %v955_v8, 0.0  ;;  %v2183_v51 = vpop.f32.mrf.mxu2 }
 0x159   :  { %v1922_v14 = vadd.f32 %v1921_v44, %v1744_v45  ;;  %984 = vadd.xlane.f32.xlu2 %v983_v43  ;;  %3299 = vmatmul.msk.f32.gmra.mxu3 %vm770_vm7, %v5087_v6 }
 0x15b   :  { %v2230_v59 = vadd.f32 %v2183_v51, %v1922_v14 }
 0x15c   :  { %v860_v27 = vpop.f32.mrf.mxu3 }
 0x15d   :  { %v3398_v61 = vpop.eup %3397  ;;  %v4517_v39 = vadd.f32 %v4311_v23, %v2230_v59  ;;  %v861_v46 = vadd.f32 %v4354_v60, %v860_v27 }
 0x15e   :  { %v956_v25 = vmul.f32 %v3398_v61, %v4394_v50  ;;  %v1926_v36 = vpop.f32.mrf.mxu1 }
 0x15f   :  { %v5083_v9 = vmax.f32 %v4517_v39, 0.0  ;;  %3399 = vtanh.f32 %v861_v46 }
 0x160   :  { %v1747_v44 = vpop.f32.mrf.mxu0  ;;  %v986_v2 = vsel %vm310_vm2, %v956_v25, 0.0  ;;  %v2186_v47 = vpop.f32.mrf.mxu2 }
 0x161   :  { %v1925_v34 = vadd.f32 %v1924_v19, %v1747_v44  ;;  %987 = vadd.xlane.f32.xlu2 %v986_v2  ;;  %3300 = vmatmul.msk.f32.gmra.mxu3 %vm770_vm7, %v5083_v9 }
 0x163   :  { %v2231_v11 = vadd.f32 %v2186_v47, %v1925_v34 }
 0x164   :  { %v863_v31 = vpop.f32.mrf.mxu3 }
 0x165   :  { %v3400_v8 = vpop.eup %3399  ;;  %v4527_v45 = vadd.f32 %v4311_v23, %v2231_v11  ;;  %v864_v43 = vadd.f32 %v4354_v60, %v863_v31 }
 0x166   :  { %v957_v51 = vmul.f32 %v3400_v8, %v4394_v50  ;;  %v1929_v59 = vpop.f32.mrf.mxu1 }
 0x167   :  { %v5081_v14 = vmax.f32 %v4527_v45, 0.0  ;;  %3401 = vtanh.f32 %v864_v43 }
 0x168   :  { %v1749_v19 = vpop.f32.mrf.mxu0  ;;  %v989_v27 = vsel %vm310_vm2, %v957_v51, 0.0  ;;  %v2188_v61 = vpop.f32.mrf.mxu2 }
 0x169   :  { %v1927_v46 = vadd.f32 %v1926_v36, %v1749_v19  ;;  %990 = vadd.xlane.f32.xlu2 %v989_v27  ;;  %3301 = vmatmul.msk.f32.gmra.mxu3 %vm770_vm7, %v5081_v14 }
 0x16b   :  { %v2232_v25 = vadd.f32 %v2188_v61, %v1927_v46 }
 0x16c   :  { %v866_v44 = vpop.f32.mrf.mxu3 }
 0x16d   :  { %v3402_v2 = vpop.eup %3401  ;;  %v4537_v47 = vadd.f32 %v4311_v23, %v2232_v25  ;;  %v867_v34 = vadd.f32 %v4354_v60, %v866_v44 }
 0x16e   :  { %v958_v11 = vmul.f32 %v3402_v2, %v4394_v50  ;;  %v1931_v8 = vpop.f32.mrf.mxu1 }
 0x16f   :  { %v5082_v31 = vmax.f32 %v4537_v47, 0.0  ;;  %3403 = vtanh.f32 %v867_v34 }
 0x170   :  { %v1752_v36 = vpop.f32.mrf.mxu0  ;;  %v992_v43 = vsel %vm310_vm2, %v958_v11, 0.0  ;;  %v2191_v51 = vpop.f32.mrf.mxu2 }
 0x171   :  { %v1930_v19 = vadd.f32 %v1929_v59, %v1752_v36  ;;  %993 = vadd.xlane.f32.xlu2 %v992_v43  ;;  %3302 = vmatmul.msk.f32.gmra.mxu3 %vm770_vm7, %v5082_v31 }
 0x173   :  { %v2233_v27 = vadd.f32 %v2191_v51, %v1930_v19 }
 0x174   :  { %v869_v61 = vpop.f32.mrf.mxu3 }
 0x175   :  { %v3404_v46 = vpop.eup %3403  ;;  %v4547_v25 = vadd.f32 %v4311_v23, %v2233_v27  ;;  %v870_v44 = vadd.f32 %v4354_v60, %v869_v61 }
 0x176   :  { %v959_v2 = vmul.f32 %v3404_v46, %v4394_v50  ;;  %v1934_v11 = vpop.f32.mrf.mxu1 }
 0x177   :  { %v5084_v34 = vmax.f32 %v4547_v25, 0.0  ;;  %3405 = vtanh.f32 %v870_v44 }
 0x178   :  { %v1754_v59 = vpop.f32.mrf.mxu0  ;;  %v995_v36 = vsel %vm310_vm2, %v959_v2, 0.0  ;;  %v2193_v43 = vpop.f32.mrf.mxu2 }
 0x179   :  { %v1932_v14 = vadd.f32 %v1931_v8, %v1754_v59  ;;  %996 = vadd.xlane.f32.xlu0 %v995_v36  ;;  %3303 = vmatmul.msk.f32.gmra.mxu3 %vm770_vm7, %v5084_v34 }
 0x17b   :  { %v2234_v51 = vadd.f32 %v2193_v43, %v1932_v14 }
 0x17c   :  { %v872_v19 = vpop.f32.mrf.mxu3 }
 0x17d   :  { %v3406_v27 = vpop.eup %3405  ;;  %v4557_v61 = vadd.f32 %v4311_v23, %v2234_v51  ;;  %v873_v46 = vadd.f32 %v4354_v60, %v872_v19 }
 0x17e   :  { %v960_v44 = vmul.f32 %v3406_v27, %v4394_v50  ;;  %v1936_v2 = vpop.f32.mrf.mxu1 }
 0x17f   :  { %v5086_v31 = vmax.f32 %v4557_v61, 0.0  ;;  %3407 = vtanh.f32 %v873_v46 }
 0x180   :  { %v1757_v8 = vpop.f32.mrf.mxu0  ;;  %v998_v59 = vsel %vm310_vm2, %v960_v44, 0.0  ;;  %v2196_v36 = vpop.f32.mrf.mxu2 }
 0x181   :  { %v1935_v9 = vadd.f32 %v1934_v11, %v1757_v8  ;;  %999 = vadd.xlane.f32.xlu1 %v998_v59  ;;  %3304 = vmatmul.msk.f32.gmra.mxu3 %vm770_vm7, %v5086_v31 }
 0x183   :  { %v2235_v14 = vadd.f32 %v2196_v36, %v1935_v9 }
 0x184   :  { %v875_v43 = vpop.f32.mrf.mxu3 }
 0x185   :  { %v3408_v51 = vpop.eup %3407  ;;  %v4567_v19 = vadd.f32 %v4311_v23, %v2235_v14  ;;  %v876_v27 = vadd.f32 %v4354_v60, %v875_v43 }
 0x186   :  { %v961_v46 = vmul.f32 %v3408_v51, %v4394_v50  ;;  %v1939_v44 = vpop.f32.mrf.mxu1 }
 0x187   :  { %v5088_v34 = vmax.f32 %v4567_v19, 0.0  ;;  %3409 = vtanh.f32 %v876_v27 }
 0x188   :  { %v1759_v11 = vpop.f32.mrf.mxu0  ;;  %v1001_v8 = vsel %vm310_vm2, %v961_v46, 0.0  ;;  %v2198_v59 = vpop.f32.mrf.mxu2 }
 0x189   :  { %v1937_v0 = vadd.f32 %v1936_v2, %v1759_v11  ;;  %1002 = vadd.xlane.f32.xlu2 %v1001_v8  ;;  %3305 = vmatmul.msk.f32.gmra.mxu3 %vm770_vm7, %v5088_v34 }
 0x18b   :  { %v2236_v9 = vadd.f32 %v2198_v59, %v1937_v0 }
 0x18c   :  { %v878_v36 = vpop.f32.mrf.mxu3 }
 0x18d   :  { %v3410_v14 = vpop.eup %3409  ;;  %v4577_v43 = vadd.f32 %v4311_v23, %v2236_v9  ;;  %v879_v51 = vadd.f32 %v4354_v60, %v878_v36 }
 0x18e   :  { %v962_v27 = vmul.f32 %v3410_v14, %v4394_v50  ;;  %v1941_v46 = vpop.f32.mrf.mxu1 }
 0x18f   :  { %v5091_v31 = vmax.f32 %v4577_v43, 0.0  ;;  %3411 = vtanh.f32 %v879_v51 }
 0x190   :  { %v1762_v2 = vpop.f32.mrf.mxu0  ;;  %v1004_v11 = vsel %vm310_vm2, %v962_v27, 0.0  ;;  %v2201_v8 = vpop.f32.mrf.mxu2 }
 0x191   :  { %v1940_v6 = vadd.f32 %v1939_v44, %v1762_v2  ;;  %1005 = vadd.xlane.f32.xlu0 %v1004_v11  ;;  %3306 = vmatmul.msk.f32.gmra.mxu3 %vm770_vm7, %v5091_v31 }
 0x193   :  { %v2237_v0 = vadd.f32 %v2201_v8, %v1940_v6 }
 0x194   :  { %v881_v59 = vpop.f32.mrf.mxu3 }
 0x195   :  { %v3412_v9 = vpop.eup %3411  ;;  %v4587_v36 = vadd.f32 %v4311_v23, %v2237_v0  ;;  %v882_v14 = vadd.f32 %v4354_v60, %v881_v59  ;;  %v4599_v60 = vld [vmem:[%s5063_s10] ss:$0 sm:$0xff] }
 0x196   :  { %v963_v51 = vmul.f32 %v3412_v9, %v4394_v50  ;;  %v1944_v27 = vpop.f32.mrf.mxu1 }
 0x197   :  { %5117 = vst [vmem:[#allocation8_spill] sm:$0xff] %v4587_v36  ;;  %v5090_v34 = vmax.f32 %v4587_v36, 0.0  ;;  %3413 = vtanh.f32 %v882_v14 }
 0x198   :  { %v1764_v44 = vpop.f32.mrf.mxu0  ;;  %v1007_v2 = vsel %vm310_vm2, %v963_v51, 0.0  ;;  %v2203_v11 = vpop.f32.mrf.mxu2 }
 0x199   :  { %v1942_v38 = vadd.f32 %v1941_v46, %v1764_v44  ;;  %1008 = vadd.xlane.f32.xlu1 %v1007_v2  ;;  %3307 = vmatmul.msk.f32.gmra.mxu3 %vm770_vm7, %v5090_v34 }
 0x19b   :  { %v2238_v6 = vadd.f32 %v2203_v11, %v1942_v38 }
 0x19c   :  { %v2398_v8 = vpop.f32.mrf.mxu3  ;;  %v4646_v24 = vpop.xlane.xlu2 %966 }
 0x19d   :  { %v3414_v0 = vpop.eup %3413  ;;  %v4602_v59 = vadd.f32 %v4311_v23, %v2238_v6  ;;  %v2399_v9 = vadd.f32 %v4599_v60, %v2398_v8 }
 0x19e   :  { %v964_v46 = vmul.f32 %v3414_v0, %v4394_v50  ;;  %v1946_v51 = vpop.f32.mrf.mxu1 }
 0x19f   :  { %5118 = vst [vmem:[#allocation9_spill] sm:$0xff] %v4602_v59  ;;  %v5093_v14 = vmax.f32 %v4602_v59, 0.0  ;;  %3415 = vtanh.f32 %v2399_v9 }
 0x1a0   :  { %v1767_v44 = vpop.f32.mrf.mxu0  ;;  %v1010_v2 = vsel %vm310_vm2, %v964_v46, 0.0  ;;  %v2206_v34 = vpop.f32.mrf.mxu2 }
 0x1a1   :  { %v1945_v31 = vadd.f32 %v1944_v27, %v1767_v44  ;;  %3308 = vmatmul.msk.f32.gmra.mxu3 %vm770_vm7, %v5093_v14  ;;  %1011 = vadd.xlane.f32.xlu2 %v1010_v2 }
 0x1a3   :  { %v2239_v38 = vadd.f32 %v2206_v34, %v1945_v31 }
 0x1a4   :  { %v2401_v11 = vpop.f32.mrf.mxu3 }
 0x1a5   :  { %v3416_v6 = vpop.eup %3415  ;;  %v4612_v8 = vadd.f32 %v4311_v23, %v2239_v38  ;;  %v2402_v50 = vadd.f32 %v4599_v60, %v2401_v11 }
 0x1a6   :  { %v2528_v0 = vmul.f32 %v3416_v6, %v4440_v55 }
 0x1a7   :  { %5119 = vst [vmem:[#allocation10_spill] sm:$0xff] %v4612_v8  ;;  %v5095_v9 = vmax.f32 %v4612_v8, 0.0  ;;  %3417 = vtanh.f32 %v2402_v50  ;;  %v1949_v46 = vpop.f32.mrf.mxu1 }
 0x1a8   :  { %v1769_v27 = vpop.f32.mrf.mxu0  ;;  %v2552_v44 = vsel %vm310_vm2, %v2528_v0, 0.0  ;;  %v2208_v42 = vpop.f32.mrf.mxu2 }
 0x1a9   :  { %v1947_v14 = vadd.f32 %v1946_v51, %v1769_v27  ;;  %3309 = vmatmul.msk.f32.gmra.mxu3 %vm770_vm7, %v5095_v9  ;;  %2553 = vadd.xlane.f32.xlu2 %v2552_v44 }
 0x1ab   :  { %v2240_v31 = vadd.f32 %v2208_v42, %v1947_v14 }
 0x1ac   :  { %v2404_v34 = vpop.f32.mrf.mxu3  ;;  %v973_v48 = vpop.xlane.xlu0 %972 }
 0x1ad   :  { %v3418_v2 = vpop.eup %3417  ;;  %v4622_v38 = vadd.f32 %v4311_v23, %v2240_v31  ;;  %v2405_v11 = vadd.f32 %v4599_v60, %v2404_v34 }
 0x1ae   :  { %v2529_v6 = vmul.f32 %v3418_v2, %v4440_v55 }
 0x1af   :  { %5120 = vst [vmem:[#allocation11_spill] sm:$0xff] %v4622_v38  ;;  %v5096_v50 = vmax.f32 %v4622_v38, 0.0  ;;  %3419 = vtanh.f32 %v2405_v11  ;;  %v1951_v42 = vpop.f32.mrf.mxu1 }
 0x1b0   :  { %v1772_v0 = vpop.f32.mrf.mxu0  ;;  %v2555_v51 = vsel %vm310_vm2, %v2529_v6, 0.0  ;;  %v2211_v27 = vpop.f32.mrf.mxu2 }
 0x1b1   :  { %v1950_v15 = vadd.f32 %v1949_v46, %v1772_v0  ;;  %3310 = vmatmul.msk.f32.gmra.mxu3 %vm770_vm7, %v5096_v50  ;;  %2556 = vadd.xlane.f32.xlu1 %v2555_v51 }
 0x1b3   :  { %v2241_v14 = vadd.f32 %v2211_v27, %v1950_v15 }
 0x1b4   :  { %v2407_v44 = vpop.f32.mrf.mxu3 }
 0x1b5   :  { %v3420_v31 = vpop.eup %3419  ;;  %v4632_v34 = vadd.f32 %v4311_v23, %v2241_v14  ;;  %v2408_v2 = vadd.f32 %v4599_v60, %v2407_v44 }
 0x1b6   :  { %v2530_v11 = vmul.f32 %v3420_v31, %v4440_v55 }
 0x1b7   :  { %5121 = vst [vmem:[#allocation12_spill] sm:$0xff] %v4632_v34  ;;  %v5098_v6 = vmax.f32 %v4632_v34, 0.0  ;;  %3421 = vtanh.f32 %v2408_v2  ;;  %v1954_v27 = vpop.f32.mrf.mxu1 }
 0x1b8   :  { %v1774_v46 = vpop.f32.mrf.mxu0  ;;  %v2558_v0 = vsel %vm310_vm2, %v2530_v11, 0.0  ;;  %v2213_v9 = vpop.f32.mrf.mxu2 }
 0x1b9   :  { %v1952_v50 = vadd.f32 %v1951_v42, %v1774_v46  ;;  %3311 = vmatmul.msk.f32.gmra.mxu3 %vm770_vm7, %v5098_v6  ;;  %2559 = vadd.xlane.f32.xlu0 %v2558_v0 }
 0x1bb   :  { %v2242_v15 = vadd.f32 %v2213_v9, %v1952_v50 }
 0x1bc   :  { %v2410_v51 = vpop.f32.mrf.mxu3 }
 0x1bd   :  { %v3422_v14 = vpop.eup %3421  ;;  %v4642_v44 = vadd.f32 %v4311_v23, %v2242_v15  ;;  %v2411_v31 = vadd.f32 %v4599_v60, %v2410_v51 }
 0x1be   :  { %v2531_v2 = vmul.f32 %v3422_v14, %v4440_v55 }
 0x1bf   :  { %v5101_v42 = vmax.f32 %v4642_v44, 0.0  ;;  %3423 = vtanh.f32 %v2411_v31  ;;  %v1956_v1 = vpop.f32.mrf.mxu1 }
 0x1c0   :  { %v1777_v11 = vpop.f32.mrf.mxu0  ;;  %v2561_v46 = vsel %vm310_vm2, %v2531_v2, 0.0  ;;  %v2216_v0 = vpop.f32.mrf.mxu2 }
 0x1c1   :  { %v1955_v9 = vadd.f32 %v1954_v27, %v1777_v11  ;;  %3312 = vmatmul.msk.f32.gmra.mxu3 %vm770_vm7, %v5101_v42  ;;  %2562 = vadd.xlane.f32.xlu2 %v2561_v46  ;;  %v4663_v46 = vpop.xlane.xlu2 %969 }
 0x1c3   :  { %v2243_v50 = vadd.f32 %v2216_v0, %v1955_v9 }
 0x1c4   :  { %v2413_v15 = vpop.f32.mrf.mxu3 }
 0x1c5   :  { %v3424_v51 = vpop.eup %3423  ;;  %v4654_v14 = vadd.f32 %v4311_v23, %v2243_v50  ;;  %v2414_v6 = vadd.f32 %v4599_v60, %v2413_v15 }
 0x1c6   :  { %v2532_v31 = vmul.f32 %v3424_v51, %v4440_v55 }
 0x1c7   :  { %v5103_v2 = vmax.f32 %v4654_v14, 0.0  ;;  %3425 = vtanh.f32 %v2414_v6 }
 0x1c8   :  { %v1779_v27 = vpop.f32.mrf.mxu0  ;;  %v2564_v11 = vsel %vm310_vm2, %v2532_v31, 0.0  ;;  %v2218_v28 = vpop.f32.mrf.mxu2 }
 0x1c9   :  { %v1957_v42 = vadd.f32 %v1956_v1, %v1779_v27  ;;  %3313 = vmatmul.msk.f32.gmra.mxu3 %vm770_vm7, %v5103_v2  ;;  %2565 = vadd.xlane.f32.xlu1 %v2564_v11 }
 0x1cb   :  { %v2244_v0 = vadd.f32 %v2218_v28, %v1957_v42  ;;  %v4675_v28 = vpop.xlane.xlu2 %978 }
 0x1cc   :  { %v2416_v9 = vpop.f32.mrf.mxu3 }
 0x1cd   :  { %v3426_v50 = vpop.eup %3425  ;;  %v4666_v15 = vadd.f32 %v4311_v23, %v2244_v0  ;;  %v2417_v6 = vadd.f32 %v4599_v60, %v2416_v9 }
 0x1ce   :  { %v2533_v51 = vmul.f32 %v3426_v50, %v4440_v55 }
 0x1cf   :  { %v5102_v31 = vmax.f32 %v4666_v15, 0.0  ;;  %3427 = vtanh.f32 %v2417_v6 }
 0x1d0   :  { %v2567_v1 = vsel %vm310_vm2, %v2533_v51, 0.0 }
 0x1d1   :  { %3314 = vmatmul.msk.f32.gmra.mxu3 %vm770_vm7, %v5102_v31  ;;  %2568 = vadd.xlane.f32.xlu2 %v2567_v1 }
 0x1d3   :  { %v4680_v9 = vpop.xlane.xlu2 %981 }
 0x1d4   :  { %v2419_v42 = vpop.f32.mrf.mxu3 }
 0x1d5   :  { %v3428_v27 = vpop.eup %3427  ;;  %v2420_v23 = vadd.f32 %v4599_v60, %v2419_v42 }
 0x1d6   :  { %v2534_v11 = vmul.f32 %v3428_v27, %v4440_v55 }
 0x1d7   :  { %3429 = vtanh.f32 %v2420_v23 }
 0x1d8   :  { %v2570_v0 = vsel %vm310_vm2, %v2534_v11, 0.0 }
 0x1d9   :  { %2571 = vadd.xlane.f32.xlu0 %v2570_v0 }
 0x1db   :  { %v4686_v23 = vpop.xlane.xlu2 %984 }
 0x1dc   :  { %v2422_v50 = vpop.f32.mrf.mxu3 }
 0x1dd   :  { %v3430_v6 = vpop.eup %3429  ;;  %v2423_v51 = vadd.f32 %v4599_v60, %v2422_v50 }
 0x1de   :  { %v2535_v1 = vmul.f32 %v3430_v6, %v4440_v55 }
 0x1df   :  { %3431 = vtanh.f32 %v2423_v51 }
 0x1e0   :  { %v2573_v31 = vsel %vm310_vm2, %v2535_v1, 0.0 }
 0x1e1   :  { %2574 = vadd.xlane.f32.xlu1 %v2573_v31 }
 0x1e3   :  { %v988_v31 = vpop.xlane.xlu2 %987 }
 0x1e4   :  { %v2425_v2 = vpop.f32.mrf.mxu3 }
 0x1e5   :  { %v3432_v42 = vpop.eup %3431  ;;  %v2426_v27 = vadd.f32 %v4599_v60, %v2425_v2 }
 0x1e6   :  { %v2536_v11 = vmul.f32 %v3432_v42, %v4440_v55 }
 0x1e7   :  { %3433 = vtanh.f32 %v2426_v27 }
 0x1e8   :  { %v2576_v0 = vsel %vm310_vm2, %v2536_v11, 0.0 }
 0x1e9   :  { %2577 = vadd.xlane.f32.xlu2 %v2576_v0 }
 0x1eb   :  { %v991_v11 = vpop.xlane.xlu2 %990 }
 0x1ec   :  { %v2428_v32 = vpop.f32.mrf.mxu3 }
 0x1ed   :  { %v3434_v50 = vpop.eup %3433  ;;  %v2429_v6 = vadd.f32 %v4599_v60, %v2428_v32 }
 0x1ee   :  { %v2537_v51 = vmul.f32 %v3434_v50, %v4440_v55 }
 0x1ef   :  { %3435 = vtanh.f32 %v2429_v6 }
 0x1f0   :  { %v2579_v1 = vsel %vm310_vm2, %v2537_v51, 0.0 }
 0x1f1   :  { %2580 = vadd.xlane.f32.xlu0 %v2579_v1  ;;  %v976_v1 = vpop.xlane.xlu1 %975 }
 0x1f4   :  { %v2431_v2 = vpop.f32.mrf.mxu3 }
 0x1f5   :  { %v3436_v3 = vpop.eup %3435  ;;  %v2432_v35 = vadd.f32 %v4599_v60, %v2431_v2  ;;  %v994_v2 = vpop.xlane.xlu2 %993 }
 0x1f6   :  { %v2538_v42 = vmul.f32 %v3436_v3, %v4440_v55 }
 0x1f7   :  { %3437 = vtanh.f32 %v2432_v35  ;;  %v997_v35 = vpop.xlane.xlu0 %996 }
 0x1f8   :  { %v2582_v27 = vsel %vm310_vm2, %v2538_v42, 0.0 }
 0x1f9   :  { %2583 = vadd.xlane.f32.xlu1 %v2582_v27 }
 0x1fc   :  { %v2434_v0 = vpop.f32.mrf.mxu3 }
 0x1fd   :  { %v3438_v32 = vpop.eup %3437  ;;  %v2435_v50 = vadd.f32 %v4599_v60, %v2434_v0  ;;  %v1033_v0 = vperm.slane %v4663_v46, %v4321_v7 }
 0x1fe   :  { %v2539_v6 = vmul.f32 %v3438_v32, %v4440_v55  ;;  %v1036_v32 = vperm.slane %v976_v1, %v4321_v7  ;;  %v1045_v1 = vperm.slane %v994_v2, %v4321_v7 }
 0x1ff   :  { %3439 = vtanh.f32 %v2435_v50  ;;  %v1000_v50 = vpop.xlane.xlu1 %999 }
 0x200   :  { %v2585_v51 = vsel %vm310_vm2, %v2539_v6, 0.0  ;;  %v1032_v6 = vperm.slane %v4646_v24, %v4301_v37 }
 0x201   :  { %2586 = vadd.xlane.f32.xlu2 %v2585_v51  ;;  %v1039_v51 = vperm.slane %v4680_v9, %v4321_v7 }
 0x202   :  { %v1034_v46 = vsel %vm925_vm8, %v1033_v0, %v1032_v6  ;;  %v1044_v0 = vperm.slane %v991_v11, %v4301_v37  ;;  %v1048_v6 = vperm.slane %v1000_v50, %v4321_v7 }
 0x204   :  { %v2437_v34 = vpop.f32.mrf.mxu3  ;;  %v1006_v59 = vpop.xlane.xlu0 %1005 }
 0x205   :  { %v3440_v3 = vpop.eup %3439  ;;  %v2438_v42 = vadd.f32 %v4599_v60, %v2437_v34  ;;  %v1035_v34 = vperm.slane %v973_v48, %v4301_v37  ;;  %v1041_v48 = vperm.slane %v4686_v23, %v4301_v37  ;;  %v1051_v2 = vperm.slane %v1006_v59, %v4321_v7 }
 0x206   :  { %v2540_v27 = vmul.f32 %v3440_v3, %v4440_v55  ;;  %v1042_v3 = vperm.slane %v988_v31, %v4321_v7  ;;  %v1046_v23 = vsel %vm925_vm8, %v1045_v1, %v1044_v0 }
 0x207   :  { %3441 = vtanh.f32 %v2438_v42  ;;  %v1003_v42 = vpop.xlane.xlu2 %1002  ;;  %v1037_v9 = vsel %vm925_vm8, %v1036_v32, %v1035_v34 }
 0x208   :  { %v2588_v38 = vsel %vm310_vm2, %v2540_v27, 0.0  ;;  %v1056_v34 = vsel %vm935_vm11, %v1037_v9, %v1034_v46  ;;  %v1050_v50 = vperm.slane %v1003_v42, %v4301_v37 }
 0x209   :  { %2589 = vadd.xlane.f32.xlu0 %v2588_v38  ;;  %v1038_v38 = vperm.slane %v4675_v28, %v4301_v37  ;;  %v1043_v28 = vsel %vm925_vm8, %v1042_v3, %v1041_v48 }
 0x20a   :  { %v1052_v46 = vsel %vm925_vm8, %v1051_v2, %v1050_v50 }
 0x20b   :  { %v1040_v36 = vsel %vm925_vm8, %v1039_v51, %v1038_v38 }
 0x20c   :  { %v2440_v27 = vpop.f32.mrf.mxu3  ;;  %v1057_v11 = vsel %vm936_vm12, %v1040_v36, %v1056_v34  ;;  %v1009_v51 = vpop.xlane.xlu1 %1008 }
 0x20d   :  { %v3442_v8 = vpop.eup %3441  ;;  %v2441_v24 = vadd.f32 %v4599_v60, %v2440_v27  ;;  %v1058_v27 = vsel %vm938_vm13, %v1043_v28, %v1057_v11 }
 0x20e   :  { %v2541_v31 = vmul.f32 %v3442_v8, %v4440_v55  ;;  %v1047_v8 = vperm.slane %v997_v35, %v4301_v37  ;;  %v1059_v59 = vsel %vm940_vm14, %v1046_v23, %v1058_v27  ;;  %v1053_v35 = vperm.slane %v1009_v51, %v4301_v37 }
 0x20f   :  { %3443 = vtanh.f32 %v2441_v24 }
 0x210   :  { %v2591_v32 = vsel %vm310_vm2, %v2541_v31, 0.0  ;;  %v1049_v3 = vsel %vm925_vm8, %v1048_v6, %v1047_v8 }
 0x211   :  { %2592 = vadd.xlane.f32.xlu1 %v2591_v32  ;;  %v1060_v48 = vsel %vm942_vm15, %v1049_v3, %v1059_v59 }
 0x212   :  { %v1061_v0 = vsel %vm944_vm0, %v1052_v46, %v1060_v48 }
 0x214   :  { %v2443_v38 = vpop.f32.mrf.mxu3  ;;  %v1012_v24 = vpop.xlane.xlu2 %1011 }
 0x215   :  { %v3444_v1 = vpop.eup %3443  ;;  %v2444_v36 = vadd.f32 %v4599_v60, %v2443_v38  ;;  %v1054_v42 = vperm.slane %v1012_v24, %v4321_v7 }
 0x216   :  { %v2542_v9 = vmul.f32 %v3444_v1, %v4440_v55 }
 0x217   :  { %3445 = vtanh.f32 %v2444_v36  ;;  %v1055_v31 = vsel %vm925_vm8, %v1054_v42, %v1053_v35 }
 0x218   :  { %v2594_v6 = vsel %vm310_vm2, %v2542_v9, 0.0  ;;  %v1062_v28 = vsel %vm946_vm1, %v1055_v31, %v1061_v0 }
 0x219   :  { %2595 = vadd.xlane.f32.xlu2 %v2594_v6  ;;  %v4745_v2 = vsel %vm1013_vm3, %v1062_v28, -1e+30 }
 0x21a   :  { %v1066_v32 = vsel %vm1065_vm4, %v4745_v2, -inf }
 0x21b   :  { %1067 = vmax.xlane.f32.xlu0 %v1066_v32 }
 0x21c   :  { %v2446_v34 = vpop.f32.mrf.mxu3 }
 0x21d   :  { %v3446_v23 = vpop.eup %3445  ;;  %v2447_v8 = vadd.f32 %v4599_v60, %v2446_v34 }
 0x21e   :  { %v2543_v11 = vmul.f32 %v3446_v23, %v4440_v55 }
 0x21f   :  { %3447 = vtanh.f32 %v2447_v8  ;;  %v2554_v8 = vpop.xlane.xlu2 %2553 }
 0x220   :  { %v2597_v50 = vsel %vm310_vm2, %v2543_v11, 0.0 }
 0x223   :  { %2598 = vadd.xlane.f32.xlu0 %v2597_v50 }
 0x224   :  { %v2449_v51 = vpop.f32.mrf.mxu3 }
 0x225   :  { %v3448_v27 = vpop.eup %3447  ;;  %v2450_v3 = vadd.f32 %v4599_v60, %v2449_v51 }
 0x226   :  { %v2544_v59 = vmul.f32 %v3448_v27, %v4440_v55 }
 0x227   :  { %3449 = vtanh.f32 %v2450_v3  ;;  %v2557_v3 = vpop.xlane.xlu1 %2556 }
 0x228   :  { %v2600_v46 = vsel %vm310_vm2, %v2544_v59, 0.0 }
 0x229   :  { %2601 = vadd.xlane.f32.xlu1 %v2600_v46 }
 0x22c   :  { %v2452_v38 = vpop.f32.mrf.mxu3 }
 0x22d   :  { %v3450_v24 = vpop.eup %3449  ;;  %v2453_v1 = vadd.f32 %v4599_v60, %v2452_v38 }
 0x22e   :  { %v2545_v35 = vmul.f32 %v3450_v24, %v4440_v55 }
 0x22f   :  { %3451 = vtanh.f32 %v2453_v1 }
 0x230   :  { %v2603_v36 = vsel %vm310_vm2, %v2545_v35, 0.0 }
 0x231   :  { %2604 = vadd.xlane.f32.xlu2 %v2603_v36 }
 0x234   :  { %v2455_v42 = vpop.f32.mrf.mxu3  ;;  %v2563_v46 = vpop.xlane.xlu2 %2562 }
 0x235   :  { %v3452_v9 = vpop.eup %3451  ;;  %v2456_v48 = vadd.f32 %v4599_v60, %v2455_v42 }
 0x236   :  { %v2546_v31 = vmul.f32 %v3452_v9, %v4440_v55  ;;  %v2560_v9 = vpop.xlane.xlu0 %2559 }
 0x237   :  { %3453 = vtanh.f32 %v2456_v48 }
 0x238   :  { %v2606_v0 = vsel %vm310_vm2, %v2546_v31, 0.0 }
 0x239   :  { %2607 = vadd.xlane.f32.xlu0 %v2606_v0 }
 0x23c   :  { %v2458_v6 = vpop.f32.mrf.mxu3  ;;  %v2566_v36 = vpop.xlane.xlu1 %2565 }
 0x23d   :  { %v3454_v28 = vpop.eup %3453  ;;  %v2459_v32 = vadd.f32 %v4599_v60, %v2458_v6 }
 0x23e   :  { %v2547_v34 = vmul.f32 %v3454_v28, %v4440_v55 }
 0x23f   :  { %3455 = vtanh.f32 %v2459_v32  ;;  %v2657_v32 = vperm.slane %v2566_v36, %v4321_v7 }
 0x240   :  { %v2609_v23 = vsel %vm310_vm2, %v2547_v34, 0.0 }
 0x241   :  { %2610 = vadd.xlane.f32.xlu1 %v2609_v23 }
 0x244   :  { %v2461_v11 = vpop.f32.mrf.mxu3  ;;  %v2569_v48 = vpop.xlane.xlu2 %2568 }
 0x245   :  { %v3456_v50 = vpop.eup %3455  ;;  %v2462_v51 = vadd.f32 %v4599_v60, %v2461_v11  ;;  %v2659_v23 = vperm.slane %v2569_v48, %v4342_v12 }
 0x246   :  { %v2548_v27 = vmul.f32 %v3456_v50, %v4440_v55  ;;  %v2652_v50 = vperm.slane %v2557_v3, %v4321_v7 }
 0x247   :  { %3457 = vtanh.f32 %v2462_v51  ;;  %v2656_v51 = vperm.slane %v2563_v46, %v4301_v37 }
 0x248   :  { %v2612_v59 = vsel %vm310_vm2, %v2548_v27, 0.0 }
 0x249   :  { %2613 = vadd.xlane.f32.xlu2 %v2612_v59  ;;  %v2654_v59 = vperm.slane %v2560_v9, %v4342_v12 }
 0x24c   :  { %v2464_v38 = vpop.f32.mrf.mxu3  ;;  %v2572_v27 = vpop.xlane.xlu0 %2571 }
 0x24d   :  { %v3458_v24 = vpop.eup %3457  ;;  %v2465_v1 = vadd.f32 %v4599_v60, %v2464_v38  ;;  %v2651_v38 = vperm.slane %v2554_v8, %v4301_v37 }
 0x24e   :  { %v2549_v35 = vmul.f32 %v3458_v24, %v4440_v55  ;;  %v2658_v24 = vsel %vm925_vm8, %v2657_v32, %v2656_v51 }
 0x24f   :  { %3459 = vtanh.f32 %v2465_v1  ;;  %v2660_v1 = vsel %vm929_vm9, %v2659_v23, %v2658_v24  ;;  %v2653_v3 = vsel %vm925_vm8, %v2652_v50, %v2651_v38 }
 0x250   :  { %v2615_v42 = vsel %vm310_vm2, %v2549_v35, 0.0  ;;  %v2661_v35 = vperm.slane %v2572_v27, %v4301_v37  ;;  %v2655_v48 = vsel %vm929_vm9, %v2654_v59, %v2653_v3 }
 0x251   :  { %2616 = vadd.xlane.f32.xlu0 %v2615_v42  ;;  %v2691_v8 = vsel %vm935_vm11, %v2660_v1, %v2655_v48 }
 0x254   :  { %v2467_v31 = vpop.f32.mrf.mxu3  ;;  %v2575_v34 = vpop.xlane.xlu1 %2574 }
 0x255   :  { %v3460_v0 = vpop.eup %3459  ;;  %v2468_v6 = vadd.f32 %v4599_v60, %v2467_v31  ;;  %v2662_v60 = vperm.slane %v2575_v34, %v4321_v7  ;;  %v5122_v34 = vlaneseq }
 0x256   :  { %v2550_v28 = vmul.f32 %v3460_v0, %v4440_v55 }
 0x257   :  { %3461 = vtanh.f32 %v2468_v6  ;;  %v2663_v9 = vsel %vm925_vm8, %v2662_v60, %v2661_v35  ;;  %v4793_v23 = vshrl.u32 %v5122_v34, 7 }
 0x258   :  { %v2618_v11 = vsel %vm310_vm2, %v2550_v28, 0.0 }
 0x259   :  { %2619 = vadd.xlane.f32.xlu1 %v2618_v11  ;;  %3353 = vset.pattern.permute.xlu2 %v4793_v23 }
 0x25a   :  { %3355 = vset.pattern.permute.xlu1 %v4793_v23 }
 0x25c   :  { %v2578_v36 = vpop.xlane.xlu2 %2577 }
 0x25d   :  { %v3462_v42 = vpop.eup %3461  ;;  %v2664_v46 = vperm.slane %v2578_v36, %v4342_v12 }
 0x25e   :  { %v2551_v31 = vmul.f32 %v3462_v42, %v4440_v55  ;;  %v4798_v55 = vadd.s32 8, %v4793_v23 }
 0x25f   :  { %v2665_v0 = vsel %vm929_vm9, %v2664_v46, %v2663_v9 }
 0x260   :  { %v2692_v6 = vsel %vm936_vm12, %v2665_v0, %v2691_v8  ;;  %v2621_v28 = vsel %vm310_vm2, %v2551_v31, 0.0  ;;  %3354 = vset.pattern.permute.xlu0 %v4798_v55  ;;  %vm2624_vm2 = vcmp.lt.s32.totalorder %v4301_v37, 24 }
 0x261   :  { %2622 = vadd.xlane.f32.xlu2 %v2621_v28 }
 0x264   :  { %v2581_v11 = vpop.xlane.xlu0 %2580 }
 0x265   :  { %v2666_v51 = vperm.slane %v2581_v11, %v4301_v37 }
 0x26c   :  { %v2584_v32 = vpop.xlane.xlu1 %2583 }
 0x26d   :  { %v2667_v50 = vperm.slane %v2584_v32, %v4321_v7 }
 0x26f   :  { %v2668_v60 = vsel %vm925_vm8, %v2667_v50, %v2666_v51 }
 0x274   :  { %v2587_v27 = vpop.xlane.xlu2 %2586 }
 0x275   :  { %v2669_v59 = vperm.slane %v2587_v27, %v4342_v12 }
 0x277   :  { %v2670_v38 = vsel %vm929_vm9, %v2669_v59, %v2668_v60 }
 0x278   :  { %v2693_v24 = vsel %vm938_vm13, %v2670_v38, %v2692_v6 }
 0x27c   :  { %v2590_v1 = vpop.xlane.xlu0 %2589 }
 0x27d   :  { %v2671_v42 = vperm.slane %v2590_v1, %v4301_v37 }
 0x284   :  { %v2593_v35 = vpop.xlane.xlu1 %2592 }
 0x285   :  { %v2672_v36 = vperm.slane %v2593_v35, %v4321_v7 }
 0x287   :  { %v2673_v48 = vsel %vm925_vm8, %v2672_v36, %v2671_v42 }
 0x28c   :  { %v2596_v3 = vpop.xlane.xlu2 %2595 }
 0x28d   :  { %v2674_v46 = vperm.slane %v2596_v3, %v4342_v12 }
 0x28e   :  { %v1068_v9 = vpop.xlane.xlu0 %1067 }
 0x28f   :  { %v2675_v31 = vsel %vm929_vm9, %v2674_v46, %v2673_v48  ;;  %v1069_v8 = vsub.f32 %v4745_v2, %v1068_v9 }
 0x290   :  { %v2694_v0 = vsel %vm940_vm14, %v2675_v31, %v2693_v24 }
 0x291   :  { %v1070_v28 = vmul.f32 1.442695, %v1069_v8 }
 0x293   :  { %3463 = vpow2.f32 %v1070_v28 }
 0x296   :  { %v2599_v38 = vpop.xlane.xlu0 %2598 }
 0x297   :  { %v2676_v8 = vperm.slane %v2599_v38, %v4301_v37 }
 0x299   :  { %v4814_v6 = vpop.eup %3463 }
 0x29a   :  { %v1072_v32 = vsel %vm1065_vm4, %v4814_v6, 0.0  ;;  %v1075_v34 = vperm.slane %v4814_v6, 0  ;;  %v1127_v2 = vperm.slane %v4814_v6, 4  ;;  %v1088_v11 = vperm.slane %v4814_v6, 1 }
 0x29b   :  { %1073 = vadd.xlane.f32.xlu1 %v1072_v32  ;;  %v1101_v50 = vperm.slane %v4814_v6, 2  ;;  %v1153_v51 = vperm.slane %v4814_v6, 6  ;;  %v1114_v27 = vperm.slane %v4814_v6, 3  ;;  %v1140_v24 = vperm.slane %v4814_v6, 5 }
 0x29c   :  { %1086 = vperm.xlu0 %3354, %v1075_v34   ;;  %1080 = vperm.xlu2 %3353, %v1075_v34   ;;  %v2602_v59 = vpop.xlane.xlu1 %2601 }
 0x29d   :  { %v2677_v3 = vperm.slane %v2602_v59, %v4321_v7 }
 0x2a4   :  { %3357 = vset.pattern.permute.xlu0 %v4793_v23  ;;  %3356 = vset.pattern.permute.xlu2 %v4798_v55  ;;  %v2605_v60 = vpop.xlane.xlu2 %2604 }
 0x2a5   :  { %v2679_v48 = vperm.slane %v2605_v60, %v4342_v12 }
 0x2ac   :  { %1132 = vperm.xlu0 %3357, %v1127_v2   ;;  %1099 = vperm.xlu2 %3356, %v1088_v11   ;;  %v2608_v36 = vpop.xlane.xlu0 %2607 }
 0x2ad   :  { %v2681_v34 = vperm.slane %v2608_v36, %v4301_v37 }
 0x2b4   :  { %3360 = vset.pattern.permute.xlu0 %v4798_v55  ;;  %1112 = vperm.xlu2 %3356, %v1101_v50   ;;  %v2611_v1 = vpop.xlane.xlu1 %2610 }
 0x2b5   :  { %1093 = vperm.xlu1 %3355, %v1088_v11   ;;  %v2682_v9 = vperm.slane %v2611_v1, %v4321_v7 }
 0x2bc   :  { %1164 = vperm.xlu0 %3360, %v1153_v51   ;;  %1125 = vperm.xlu2 %3356, %v1114_v27   ;;  %v2614_v35 = vpop.xlane.xlu2 %2613 }
 0x2bd   :  { %1106 = vperm.xlu1 %3355, %v1101_v50   ;;  %v2684_v28 = vperm.slane %v2614_v35, %v4342_v12  ;;  %v2678_v50 = vsel %vm925_vm8, %v2677_v3, %v2676_v8  ;;  %v1166_v35 = vperm.slane %v4814_v6, 7 }
 0x2c4   :  { %3359 = vset.pattern.permute.xlu2 %v4793_v23  ;;  %v2617_v31 = vpop.xlane.xlu0 %2616 }
 0x2c5   :  { %1119 = vperm.xlu1 %3355, %v1114_v27   ;;  %v2683_v27 = vsel %vm925_vm8, %v2682_v9, %v2681_v34 }
 0x2c6   :  { %v2685_v59 = vsel %vm929_vm9, %v2684_v28, %v2683_v27  ;;  %v5126_v27 = vmax.f32 %v4095_v21, 0.0 }
 0x2cc   :  { %1145 = vperm.xlu2 %3359, %v1140_v24   ;;  %v2620_v42 = vpop.xlane.xlu1 %2619 }
 0x2cd   :  { %3358 = vset.pattern.permute.xlu1 %v4798_v55  ;;  %v2687_v32 = vperm.slane %v2620_v42, %v4321_v7 }
 0x2d4   :  { %1158 = vperm.xlu2 %3359, %v1153_v51   ;;  %v2623_v46 = vpop.xlane.xlu2 %2622  ;;  %v2680_v51 = vsel %vm929_vm9, %v2679_v48, %v2678_v50 }
 0x2d5   :  { %1138 = vperm.xlu1 %3358, %v1127_v2   ;;  %v2689_v11 = vperm.slane %v2623_v46, %v4342_v12  ;;  %v2686_v2 = vperm.slane %v2617_v31, %v4301_v37  ;;  %v2695_v38 = vsel %vm942_vm15, %v2680_v51, %v2694_v0 }
 0x2d6   :  { %v2696_v12 = vsel %vm944_vm0, %v2685_v59, %v2695_v38 }
 0x2d7   :  { %v2688_v60 = vsel %vm925_vm8, %v2687_v32, %v2686_v2  ;;  %v5123_v32 = vmax.f32 %v3982_v29, 0.0  ;;  %v5125_v2 = vmax.f32 %v4035_v22, 0.0  ;;  %v5129_v29 = vmax.f32 %v4117_v53, 0.0 }
 0x2d8   :  { %v2690_v7 = vsel %vm929_vm9, %v2689_v11, %v2688_v60  ;;  %v5124_v11 = vmax.f32 %v4014_v62, 0.0  ;;  %v5127_v60 = vmax.f32 %v4071_v56, 0.0 }
 0x2d9   :  { %v2697_v1 = vsel %vm946_vm1, %v2690_v7, %v2696_v12  ;;  %v5128_v12 = vmax.f32 %v3969_v10, 0.0 }
 0x2da   :  { %v4851_v36 = vsel %vm2624_vm2, %v2697_v1, -1e+30 }
 0x2db   :  { %v2701_v42 = vsel %vm2700_vm5, %v4851_v36, -inf }
 0x2dc   :  { %3362 = vset.pattern.permute.xlu2 %v4798_v55 }
 0x2dd   :  { %1151 = vperm.xlu1 %3358, %v1140_v24  }
 0x2e4   :  { %1177 = vperm.xlu2 %3362, %v1166_v35  }
 0x2e5   :  { %3361 = vset.pattern.permute.xlu1 %v4793_v23 }
 0x2e6   :  { %2702 = vmax.xlane.f32.xlu0 %v2701_v42  ;;  %v5130_v42 = vmax.f32 %v4130_v16, 0.0 }
 0x2ec   :  { %3363 = vset.pattern.permute.xlu2 %v4793_v23 }
 0x2ed   :  { %1171 = vperm.xlu1 %3361, %v1166_v35  }
 0x2f6   :  { %v1081_v0 = vpop.permute.xlu2 %1080 }
 0x306   :  { %v1100_v24 = vpop.permute.xlu2 %1099 }
 0x307   :  { %v1182_v50 = vmul.f32 %v1100_v24, %v5124_v11 }
 0x309   :  { %v1205_v62 = vsel %vm770_vm7, %v1182_v50, 0.0  ;;  %v5133_v50 = vmax.f32 %v4248_v26, 0.0 }
 0x30e   :  { %v4857_v37 = vpop.xlane.xlu1 %1073  ;;  %v1113_v46 = vpop.permute.xlu2 %1112 }
 0x30f   :  { %v1087_v9 = vpop.permute.xlu0 %1086  ;;  %v1184_v7 = vmul.f32 %v1113_v46, %v5127_v60  ;;  %3465 = vrcp.f32 %v4857_v37  ;;  %v5137_v37 = vmax.f32 %v4292_v52, 0.0 }
 0x310   :  { %v1180_v1 = vmul.f32 %v1087_v9, %v5128_v12  ;;  %v5132_v9 = vmax.f32 %v3950_v49, 0.0 }
 0x312   :  { %v1179_v53 = vmul.f32 %v1081_v0, %v5132_v9 }
 0x316   :  { %v1126_v48 = vpop.permute.xlu2 %1125 }
 0x317   :  { %v1186_v35 = vmul.f32 %v1126_v48, %v5129_v29  ;;  %v1214_v48 = vsel %vm770_vm7, %v1184_v7, 0.0  ;;  %v5135_v7 = vmax.f32 %v4173_v20, 0.0 }
 0x319   :  { %v1223_v16 = vsel %vm770_vm7, %v1186_v35, 0.0 }
 0x31e   :  { %v1133_v28 = vpop.permute.xlu0 %1132 }
 0x31f   :  { %v1187_v22 = vmul.f32 %v1133_v28, %v5130_v42 }
 0x321   :  { %v1231_v11 = vsel %vm770_vm7, %v1187_v22, 0.0  ;;  %v5136_v22 = vmax.f32 %v4205_v4, 0.0 }
 0x326   :  { %v1146_v31 = vpop.permute.xlu2 %1145 }
 0x327   :  { %v1094_v3 = vpop.permute.xlu1 %1093 }
 0x328   :  { %v1181_v34 = vmul.f32 %v1094_v3, %v5123_v32  ;;  %v1196_v32 = vsel %vm770_vm7, %v1180_v1, 0.0 }
 0x32a   :  { %v1204_v38 = vsel %vm770_vm7, %v1181_v34, 0.0 }
 0x32b   :  { %v1206_v3 = vadd.f32 %v1205_v62, %v1204_v38  ;;  %v1189_v38 = vmul.f32 %v1146_v31, %v5135_v7  ;;  %v4898_v62 = vadd.s32 16, %v4793_v23 }
 0x32d   :  { %v1207_v49 = vrot.slane %v1206_v3, 4  ;;  %3364 = vset.pattern.permute.xlu1 %v4898_v62  ;;  %v1240_v20 = vsel %vm770_vm7, %v1189_v38, 0.0 }
 0x32e   :  { %v1159_v56 = vpop.permute.xlu2 %1158 }
 0x32f   :  { %v1107_v6 = vpop.permute.xlu1 %1106 }
 0x330   :  { %v1183_v51 = vmul.f32 %v1107_v6, %v5125_v2  ;;  %v1165_v6 = vpop.permute.xlu0 %1164 }
 0x331   :  { %v1192_v2 = vmul.f32 %v1165_v6, %v5133_v50 }
 0x332   :  { %v1213_v24 = vsel %vm770_vm7, %v1183_v51, 0.0 }
 0x333   :  { %v1215_v28 = vadd.f32 %v1214_v48, %v1213_v24  ;;  %v1250_v1 = vsel %vm770_vm7, %v1192_v2, 0.0 }
 0x335   :  { %v1216_v12 = vrot.slane %v1215_v28, 4 }
 0x337   :  { %v1120_v8 = vpop.permute.xlu1 %1119  ;;  %v1217_v31 = vadd.f32 %v1216_v12, %v1215_v28 }
 0x338   :  { %v1185_v59 = vmul.f32 %v1120_v8, %v5126_v27  ;;  %v5131_v8 = vmax.f32 %v4160_v57, 0.0  ;;  %v5134_v57 = vmax.f32 %v4229_v41, 0.0  ;;  %v1208_v41 = vadd.f32 %v1207_v49, %v1206_v3 }
 0x339   :  { %v1218_v48 = vrot.slane %v1217_v31, 2 }
 0x33a   :  { %v1222_v46 = vsel %vm770_vm7, %v1185_v59, 0.0  ;;  %v1191_v51 = vmul.f32 %v1159_v56, %v5134_v57  ;;  %v1195_v59 = vsel %vm770_vm7, %v1179_v53, 0.0 }
 0x33b   :  { %v1224_v27 = vadd.f32 %v1223_v16, %v1222_v46  ;;  %v1197_v60 = vadd.f32 %v1196_v32, %v1195_v59  ;;  %v1219_v2 = vadd.f32 %v1218_v48, %v1217_v31 }
 0x33c   :  { %v1249_v29 = vsel %vm770_vm7, %v1191_v51, 0.0 }
 0x33d   :  { %v1225_v35 = vrot.slane %v1224_v27, 4  ;;  %v1198_v56 = vrot.slane %v1197_v60, 4 }
 0x33e   :  { %v1178_v59 = vpop.permute.xlu2 %1177 }
 0x33f   :  { %v1226_v46 = vadd.f32 %v1225_v35, %v1224_v27  ;;  %v1199_v32 = vadd.f32 %v1198_v56, %v1197_v60  ;;  %v4907_v60 = vpop.eup %3465  ;;  %v1194_v35 = vmul.f32 %v1178_v59, %v5137_v37 }
 0x340   :  { %v1269_v31 = vrot.slane %v4907_v60, 1 }
 0x341   :  { %v1227_v16 = vrot.slane %v1226_v46, 2  ;;  %v1200_v27 = vrot.slane %v1199_v32, 2 }
 0x343   :  { %v1228_v49 = vadd.f32 %v1227_v16, %v1226_v46  ;;  %v1259_v46 = vsel %vm770_vm7, %v1194_v35, 0.0 }
 0x347   :  { %v1139_v21 = vpop.permute.xlu1 %1138 }
 0x348   :  { %v1188_v10 = vmul.f32 %v1139_v21, %v5131_v8  ;;  %v1251_v21 = vadd.f32 %v1250_v1, %v1249_v29  ;;  %v1220_v1 = vrot.slane %v1219_v2, 1 }
 0x34a   :  { %v1232_v34 = vsel %vm770_vm7, %v1188_v10, 0.0  ;;  %v1209_v10 = vrot.slane %v1208_v41, 2  ;;  %v1252_v3 = vrot.slane %v1251_v21, 4 }
 0x34b   :  { %v1233_v0 = vadd.f32 %v1232_v34, %v1231_v11 }
 0x34c   :  { %v1210_v34 = vadd.f32 %v1209_v10, %v1208_v41  ;;  %v1253_v57 = vadd.f32 %v1252_v3, %v1251_v21  ;;  %v1229_v41 = vrot.slane %v1228_v49, 1  ;;  %v1270_v3 = vrot.slane %v4907_v60, 2 }
 0x34d   :  { %v1234_v42 = vrot.slane %v1233_v0, 4 }
 0x34e   :  { %v1254_v29 = vrot.slane %v1253_v57, 2  ;;  %v1230_v10 = vadd.f32 %v1229_v41, %v1228_v49 }
 0x34f   :  { %v1152_v26 = vpop.permute.xlu1 %1151  ;;  %v1235_v9 = vadd.f32 %v1234_v42, %v1233_v0  ;;  %v1211_v0 = vrot.slane %v1210_v34, 1 }
 0x350   :  { %v1190_v24 = vmul.f32 %v1152_v26, %v5136_v22  ;;  %v1201_v26 = vadd.f32 %v1200_v27, %v1199_v32  ;;  %v1255_v56 = vadd.f32 %v1254_v29, %v1253_v57  ;;  %v1273_v27 = vrot.slane %v4907_v60, 5 }
 0x351   :  { %v1236_v11 = vrot.slane %v1235_v9, 2  ;;  %v1212_v22 = vadd.f32 %v1211_v0, %v1210_v34 }
 0x352   :  { %v1241_v6 = vsel %vm770_vm7, %v1190_v24, 0.0  ;;  %v5138_v24 = vmax.f32 %v4267_v5, 0.0  ;;  %v1202_v52 = vrot.slane %v1201_v26, 1  ;;  %v1271_v5 = vrot.slane %v4907_v60, 3 }
 0x353   :  { %v1242_v8 = vadd.f32 %v1241_v6, %v1240_v20  ;;  %v1237_v7 = vadd.f32 %v1236_v11, %v1235_v9  ;;  %v1221_v6 = vadd.f32 %v1220_v1, %v1219_v2  ;;  %v1285_v48 = vmul.f32 %v1269_v31, %v1212_v22 }
 0x354   :  { %v1272_v2 = vrot.slane %v4907_v60, 4  ;;  %v1203_v57 = vadd.f32 %v1202_v52, %v1201_v26 }
 0x355   :  { %v1243_v53 = vrot.slane %v1242_v8, 4  ;;  %v1300_v0 = vrot.slane %v1285_v48, 7 }
 0x356   :  { %v1284_v29 = vmul.f32 %v4907_v60, %v1203_v57 }
 0x357   :  { %v1244_v4 = vadd.f32 %v1243_v53, %v1242_v8 }
 0x359   :  { %v1245_v50 = vrot.slane %v1244_v4, 2  ;;  %v2703_v28 = vpop.xlane.xlu0 %2702 }
 0x35a   :  { %v2704_v51 = vsub.f32 %v4851_v36, %v2703_v28  ;;  %v1238_v36 = vrot.slane %v1237_v7, 1  ;;  %v1256_v28 = vrot.slane %v1255_v56, 1 }
 0x35b   :  { %v1246_v12 = vadd.f32 %v1245_v50, %v1244_v4  ;;  %v1286_v50 = vmul.f32 %v1270_v3, %v1221_v6  ;;  %v1275_v6 = vrot.slane %v4907_v60, 7 }
 0x35c   :  { %v2705_v38 = vmul.f32 1.442695, %v2704_v51  ;;  %v1239_v32 = vadd.f32 %v1238_v36, %v1237_v7  ;;  %v1287_v51 = vmul.f32 %v1271_v5, %v1230_v10  ;;  %v1257_v1 = vadd.f32 %v1256_v28, %v1255_v56 }
 0x35d   :  { %v1247_v21 = vrot.slane %v1246_v12, 1  ;;  %v1301_v36 = vsel %vm935_vm11, %v1300_v0, %v1284_v29 }
 0x35e   :  { %3467 = vpow2.f32 %v2705_v38  ;;  %v1288_v59 = vmul.f32 %v1272_v2, %v1239_v32  ;;  %v1304_v37 = vrot.slane %v1287_v51, 5 }
 0x35f   :  { %v1172_v42 = vpop.permute.xlu1 %1171  ;;  %v1248_v16 = vadd.f32 %v1247_v21, %v1246_v12  ;;  %v1302_v12 = vrot.slane %v1286_v50, 6 }
 0x360   :  { %v1193_v20 = vmul.f32 %v1172_v42, %v5138_v24  ;;  %v1306_v41 = vrot.slane %v1288_v59, 4  ;;  %v1274_v42 = vrot.slane %v4907_v60, 6 }
 0x361   :  { %v1289_v7 = vmul.f32 %v1273_v27, %v1248_v16  ;;  %v1303_v31 = vsel %vm936_vm12, %v1302_v12, %v1301_v36  ;;  %v5141_v27 = vmax.f32 %v4406_v54, 0.0  ;;  %v5143_v54 = vmax.f32 %v4475_v18, 0.0 }
 0x362   :  { %v1258_v8 = vsel %vm770_vm7, %v1193_v20, 0.0  ;;  %v1290_v20 = vmul.f32 %v1274_v42, %v1257_v1  ;;  %v1305_v56 = vsel %vm938_vm13, %v1304_v37, %v1303_v31 }
 0x363   :  { %v1260_v9 = vadd.f32 %v1259_v46, %v1258_v8  ;;  %v1308_v24 = vrot.slane %v1289_v7, 3  ;;  %v1307_v46 = vsel %vm940_vm14, %v1306_v41, %v1305_v56 }
 0x364   :  { %v4916_v53 = vpop.eup %3467  ;;  %v1310_v10 = vrot.slane %v1290_v20, 2 }
 0x365   :  { %v1261_v4 = vrot.slane %v1260_v9, 4  ;;  %v2707_v34 = vsel %vm2700_vm5, %v4916_v53, 0.0  ;;  %v2710_v11 = vperm.slane %v4916_v53, 0  ;;  %v2729_v22 = vperm.slane %v4916_v53, 1 }
 0x366   :  { %2708 = vadd.xlane.f32.xlu1 %v2707_v34  ;;  %v1309_v52 = vsel %vm942_vm15, %v1308_v24, %v1307_v46  ;;  %v2748_v3 = vperm.slane %v4916_v53, 2  ;;  %v2786_v60 = vperm.slane %v4916_v53, 4  ;;  %v2824_v32 = vperm.slane %v4916_v53, 6 }
 0x367   :  { %v1262_v49 = vadd.f32 %v1261_v4, %v1260_v9  ;;  %2721 = vperm.xlu0 %3360, %v2710_v11   ;;  %2715 = vperm.xlu2 %3363, %v2710_v11   ;;  %v1311_v48 = vsel %vm944_vm0, %v1310_v10, %v1309_v52  ;;  %v2843_v16 = vperm.slane %v4916_v53, 7  ;;  %v2767_v4 = vperm.slane %v4916_v53, 3 }
 0x368   :  { %v2805_v34 = vperm.slane %v4916_v53, 5  ;;  %v5144_v24 = vmax.f32 %v4457_v30, 0.0 }
 0x369   :  { %v1263_v38 = vrot.slane %v1262_v49, 2 }
 0x36b   :  { %v1264_v35 = vadd.f32 %v1263_v38, %v1262_v49 }
 0x36d   :  { %v1265_v26 = vrot.slane %v1264_v35, 1 }
 0x36f   :  { %v1266_v21 = vadd.f32 %v1265_v26, %v1264_v35  ;;  %3369 = vset.pattern.permute.xlu0 %v4898_v62  ;;  %2734 = vperm.xlu2 %3363, %v2729_v22   ;;  %v5142_v35 = vmax.f32 %v4435_v33, 0.0 }
 0x371   :  { %v1291_v8 = vmul.f32 %v1275_v6, %v1266_v21 }
 0x373   :  { %v1312_v9 = vrot.slane %v1291_v8, 1 }
 0x375   :  { %v1313_v5 = vsel %vm946_vm1, %v1312_v9, %v1311_v48 }
 0x376   :  { %1315 = vst.msk [vmem:[#allocation2] sm:$0xff] %vm770_vm7, %v1313_v5 }
 0x377   :  { %2765 = vperm.xlu0 %3369, %v2748_v3   ;;  %3366 = vset.pattern.permute.xlu2 %v4898_v62  ;;  %3033 = dma.vmem_to_hbm [thread:$0]  %s3029_s24, 128, %s3031_s6, [#allocation3]  }
 0x37f   :  { %3372 = vset.pattern.permute.xlu0 %v4798_v55  ;;  %2746 = vperm.xlu2 %3366, %v2729_v22  }
 0x380   :  { %2727 = vperm.xlu1 %3364, %v2710_v11  }
 0x387   :  { %2797 = vperm.xlu0 %3372, %v2786_v60   ;;  %3368 = vset.pattern.permute.xlu2 %v4798_v55 }
 0x388   :  { %3365 = vset.pattern.permute.xlu1 %v4798_v55 }
 0x38f   :  { %2835 = vperm.xlu0 %3372, %v2824_v32   ;;  %2759 = vperm.xlu2 %3368, %v2748_v3  }
 0x390   :  { %2740 = vperm.xlu1 %3365, %v2729_v22  }
 0x397   :  { %2854 = vperm.xlu0 %3372, %v2843_v16   ;;  %2778 = vperm.xlu2 %3368, %v2767_v4  }
 0x398   :  { %3367 = vset.pattern.permute.xlu1 %v4793_v23 }
 0x39f   :  { %3371 = vset.pattern.permute.xlu2 %v4793_v23  ;;  %3378 = vset.pattern.permute.xlu0 %v4898_v62 }
 0x3a0   :  { %2753 = vperm.xlu1 %3367, %v2748_v3   ;;  %v5145_v3 = vmax.f32 %v4497_v17, 0.0 }
 0x3a7   :  { %2791 = vperm.xlu2 %3371, %v2786_v60  }
 0x3a8   :  { %2772 = vperm.xlu1 %3367, %v2767_v4  }
 0x3af   :  { %3374 = vset.pattern.permute.xlu2 %v4798_v55 }
 0x3b0   :  { %3370 = vset.pattern.permute.xlu1 %v4898_v62 }
 0x3b7   :  { %2816 = vperm.xlu2 %3374, %v2805_v34  }
 0x3b8   :  { %2784 = vperm.xlu1 %3370, %v2767_v4   ;;  %v5147_v4 = vmax.f32 %v4487_v58, 0.0 }
 0x3bf   :  { %3376 = vset.pattern.permute.xlu2 %v4793_v23 }
 0x3c0   :  { %3373 = vset.pattern.permute.xlu1 %v4793_v23  ;;  %v5139_v23 = vmax.f32 %v4373_v13, 0.0 }
 0x3c1   :  { %v2716_v53 = vpop.permute.xlu2 %2715 }
 0x3c7   :  { %2829 = vperm.xlu2 %3376, %v2824_v32  }
 0x3c8   :  { %2810 = vperm.xlu1 %3373, %v2805_v34  }
 0x3c9   :  { %v2735_v7 = vpop.permute.xlu2 %2734 }
 0x3ca   :  { %v2865_v41 = vmul.f32 %v2735_v7, %v5142_v35 }
 0x3cc   :  { %v2897_v21 = vsel %vm770_vm7, %v2865_v41, 0.0 }
 0x3cf   :  { %2848 = vperm.xlu2 %3376, %v2843_v16  }
 0x3d0   :  { %3375 = vset.pattern.permute.xlu1 %v4898_v62 }
 0x3d7   :  { %3377 = vset.pattern.permute.xlu2 %v4898_v62  ;;  %v5140_v62 = vmax.f32 %v4327_v63, 0.0 }
 0x3d8   :  { %2803 = vperm.xlu1 %3375, %v2786_v60  }
 0x3d9   :  { %v2722_v55 = vpop.permute.xlu0 %2721  ;;  %v2709_v11 = vpop.xlane.xlu1 %2708  ;;  %v2862_v28 = vmul.f32 %v2716_v53, %v5140_v62 }
 0x3da   :  { %v2863_v50 = vmul.f32 %v2722_v55, %v5139_v23  ;;  %3469 = vrcp.f32 %v2709_v11  ;;  %v2747_v29 = vpop.permute.xlu2 %2746 }
 0x3db   :  { %v2886_v51 = vsel %vm770_vm7, %v2862_v28, 0.0  ;;  %v2867_v36 = vmul.f32 %v2747_v29, %v5143_v54  ;;  %v5149_v29 = vmax.f32 %v4527_v45, 0.0 }
 0x3dc   :  { %v2887_v2 = vsel %vm770_vm7, %v2863_v50, 0.0 }
 0x3dd   :  { %v2888_v59 = vadd.f32 %v2887_v2, %v2886_v51  ;;  %v2900_v33 = vsel %vm770_vm7, %v2867_v36, 0.0 }
 0x3df   :  { %2860 = vperm.xlu2 %3377, %v2843_v16  }
 0x3e0   :  { %2822 = vperm.xlu1 %3375, %v2805_v34   ;;  %v4971_v22 = vpop.eup %3469 }
 0x3e1   :  { %v2976_v55 = vrot.slane %v4971_v22, 1  ;;  %v2977_v7 = vrot.slane %v4971_v22, 2 }
 0x3e8   :  { %2841 = vperm.xlu1 %3375, %v2824_v32   ;;  %v5146_v32 = vmax.f32 %v4507_v40, 0.0 }
 0x3e9   :  { %v2760_v10 = vpop.permute.xlu2 %2759  ;;  %v2766_v48 = vpop.permute.xlu0 %2765 }
 0x3ea   :  { %v2869_v30 = vmul.f32 %v2760_v10, %v5145_v3  ;;  %v2870_v16 = vmul.f32 %v2766_v48, %v5146_v32  ;;  %v2978_v10 = vrot.slane %v4971_v22, 3 }
 0x3ec   :  { %v2909_v53 = vsel %vm770_vm7, %v2869_v30, 0.0  ;;  %v2911_v17 = vsel %vm770_vm7, %v2870_v16, 0.0 }
 0x3f1   :  { %v2779_v51 = vpop.permute.xlu2 %2778 }
 0x3f2   :  { %v2728_v57 = vpop.permute.xlu1 %2727 }
 0x3f3   :  { %v2864_v49 = vmul.f32 %v2728_v57, %v5141_v27 }
 0x3f5   :  { %v2889_v13 = vsel %vm770_vm7, %v2864_v49, 0.0 }
 0x3f6   :  { %v2890_v0 = vadd.f32 %v2889_v13, %v2888_v59 }
 0x3f8   :  { %v2891_v38 = vrot.slane %v2890_v0, 4 }
 0x3fa   :  { %v2892_v12 = vadd.f32 %v2891_v38, %v2890_v0 }
 0x3fc   :  { %v2893_v1 = vrot.slane %v2892_v12, 2 }
 0x3fe   :  { %v2894_v63 = vadd.f32 %v2893_v1, %v2892_v12  ;;  %v5148_v12 = vmax.f32 %v4517_v39, 0.0 }
 0x400   :  { %v2895_v37 = vrot.slane %v2894_v63, 1 }
 0x401   :  { %v2792_v0 = vpop.permute.xlu2 %2791 }
 0x402   :  { %v2896_v42 = vadd.f32 %v2895_v37, %v2894_v63  ;;  %v2741_v26 = vpop.permute.xlu1 %2740  ;;  %v2872_v37 = vmul.f32 %v2779_v51, %v5149_v29 }
 0x403   :  { %v2866_v20 = vmul.f32 %v2741_v26, %v5144_v24  ;;  %v5150_v24 = vmax.f32 %v4537_v47, 0.0 }
 0x404   :  { %v2991_v31 = vmul.f32 %v4971_v22, %v2896_v42  ;;  %v2920_v54 = vsel %vm770_vm7, %v2872_v37, 0.0 }
 0x405   :  { %v2898_v6 = vsel %vm770_vm7, %v2866_v20, 0.0 }
 0x406   :  { %v2899_v56 = vadd.f32 %v2898_v6, %v2897_v21 }
 0x408   :  { %v2901_v46 = vadd.f32 %v2900_v33, %v2899_v56  ;;  %v2798_v56 = vpop.permute.xlu0 %2797 }
 0x40a   :  { %v2902_v8 = vrot.slane %v2901_v46, 4 }
 0x40c   :  { %v2903_v52 = vadd.f32 %v2902_v8, %v2901_v46 }
 0x40e   :  { %v2904_v9 = vrot.slane %v2903_v52, 2 }
 0x410   :  { %v2905_v18 = vadd.f32 %v2904_v9, %v2903_v52  ;;  %v2836_v48 = vpop.permute.xlu0 %2835 }
 0x411   :  { %v2817_v36 = vpop.permute.xlu2 %2816 }
 0x412   :  { %v2906_v5 = vrot.slane %v2905_v18, 1  ;;  %v2754_v60 = vpop.permute.xlu1 %2753 }
 0x413   :  { %v2868_v34 = vmul.f32 %v2754_v60, %v5147_v4  ;;  %v5151_v60 = vmax.f32 %v4547_v25, 0.0 }
 0x414   :  { %v2907_v11 = vadd.f32 %v2906_v5, %v2905_v18 }
 0x415   :  { %v2908_v23 = vsel %vm770_vm7, %v2868_v34, 0.0  ;;  %v2874_v32 = vmul.f32 %v2792_v0, %v5151_v60  ;;  %v5152_v34 = vmax.f32 %v4642_v44, 0.0 }
 0x416   :  { %v2992_v50 = vmul.f32 %v2976_v55, %v2907_v11  ;;  %v2910_v62 = vadd.f32 %v2909_v53, %v2908_v23  ;;  %v5153_v11 = vmax.f32 %v4557_v61, 0.0  ;;  %v5154_v23 = vmax.f32 %v4654_v14, 0.0 }
 0x418   :  { %v3007_v28 = vrot.slane %v2992_v50, 7  ;;  %v2912_v2 = vadd.f32 %v2911_v17, %v2910_v62  ;;  %v2855_v16 = vpop.permute.xlu0 %2854  ;;  %v2875_v53 = vmul.f32 %v2798_v56, %v5153_v11  ;;  %v5155_v62 = vmax.f32 %v4666_v15, 0.0 }
 0x419   :  { %v2884_v50 = vmul.f32 %v2855_v16, %v5154_v23 }
 0x41a   :  { %v2913_v57 = vrot.slane %v2912_v2, 4  ;;  %v3008_v40 = vsel %vm935_vm11, %v3007_v28, %v2991_v31  ;;  %v2773_v13 = vpop.permute.xlu1 %2772  ;;  %v2930_v28 = vsel %vm770_vm7, %v2874_v32, 0.0 }
 0x41b   :  { %v2871_v1 = vmul.f32 %v2773_v13, %v5148_v12  ;;  %v2964_v61 = vsel %vm770_vm7, %v2884_v50, 0.0  ;;  %v5158_v13 = vld [vmem:[#allocation8_spill] sm:$0xff] }
 0x41c   :  { %v2914_v27 = vadd.f32 %v2913_v57, %v2912_v2  ;;  %v2931_v57 = vsel %vm770_vm7, %v2875_v53, 0.0  ;;  %v5159_v0 = vmax.f32 %v5158_v13, 0.0 }
 0x41d   :  { %v2919_v41 = vsel %vm770_vm7, %v2871_v1, 0.0  ;;  %v2932_v51 = vadd.f32 %v2931_v57, %v2930_v28  ;;  %v2980_v28 = vrot.slane %v4971_v22, 5 }
 0x41e   :  { %v2915_v58 = vrot.slane %v2914_v27, 2  ;;  %v2921_v31 = vadd.f32 %v2920_v54, %v2919_v41  ;;  %v5162_v54 = vld [vmem:[#allocation10_spill] sm:$0xff] }
 0x420   :  { %v2916_v49 = vadd.f32 %v2915_v58, %v2914_v27  ;;  %v5157_v58 = vmax.f32 %v4577_v43, 0.0 }
 0x421   :  { %v2830_v33 = vpop.permute.xlu2 %2829 }
 0x422   :  { %v2917_v59 = vrot.slane %v2916_v49, 1 }
 0x424   :  { %v2918_v38 = vadd.f32 %v2917_v59, %v2916_v49 }
 0x426   :  { %v2993_v63 = vmul.f32 %v2977_v7, %v2918_v38  ;;  %v2878_v7 = vmul.f32 %v2817_v36, %v5159_v0 }
 0x428   :  { %v3009_v35 = vrot.slane %v2993_v63, 6  ;;  %v2942_v29 = vsel %vm770_vm7, %v2878_v7, 0.0 }
 0x429   :  { %v2849_v3 = vpop.permute.xlu2 %2848 }
 0x42a   :  { %v2785_v42 = vpop.permute.xlu1 %2784  ;;  %v3010_v26 = vsel %vm936_vm12, %v3009_v35, %v3008_v40  ;;  %v2883_v55 = vmul.f32 %v2849_v3, %v5152_v34  ;;  %v5156_v40 = vmax.f32 %v4567_v19, 0.0  ;;  %v5160_v35 = vld [vmem:[#allocation9_spill] sm:$0xff] }
 0x42b   :  { %v2873_v20 = vmul.f32 %v2785_v42, %v5150_v24  ;;  %v5161_v41 = vmax.f32 %v5160_v35, 0.0  ;;  %v5163_v24 = vmax.f32 %v5162_v54, 0.0 }
 0x42c   :  { %v2963_v2 = vsel %vm770_vm7, %v2883_v55, 0.0 }
 0x42d   :  { %v2922_v39 = vsel %vm770_vm7, %v2873_v20, 0.0  ;;  %v2965_v14 = vadd.f32 %v2964_v61, %v2963_v2  ;;  %v2880_v20 = vmul.f32 %v2830_v33, %v5163_v24 }
 0x42e   :  { %v2923_v21 = vadd.f32 %v2922_v39, %v2921_v31 }
 0x430   :  { %v2924_v6 = vrot.slane %v2923_v21, 4 }
 0x432   :  { %v2925_v45 = vadd.f32 %v2924_v6, %v2923_v21  ;;  %v5164_v21 = vld [vmem:[#allocation11_spill] sm:$0xff] }
 0x433   :  { %v5165_v6 = vmax.f32 %v5164_v21, 0.0 }
 0x434   :  { %v2926_v46 = vrot.slane %v2925_v45, 2 }
 0x435   :  { %v2881_v56 = vmul.f32 %v2836_v48, %v5165_v6 }
 0x436   :  { %v2927_v8 = vadd.f32 %v2926_v46, %v2925_v45 }
 0x438   :  { %v2928_v52 = vrot.slane %v2927_v8, 1 }
 0x439   :  { %v2861_v4 = vpop.permute.xlu2 %2860 }
 0x43a   :  { %v2929_v9 = vadd.f32 %v2928_v52, %v2927_v8  ;;  %v2811_v5 = vpop.permute.xlu1 %2810  ;;  %v2885_v17 = vmul.f32 %v2861_v4, %v5155_v62  ;;  %v2952_v52 = vsel %vm770_vm7, %v2880_v20, 0.0 }
 0x43b   :  { %v2877_v15 = vmul.f32 %v2811_v5, %v5157_v58  ;;  %v5166_v5 = vld [vmem:[#allocation12_spill] sm:$0xff] }
 0x43c   :  { %v2994_v18 = vmul.f32 %v2978_v10, %v2929_v9  ;;  %v2966_v27 = vsel %vm770_vm7, %v2885_v17, 0.0  ;;  %v2979_v10 = vrot.slane %v4971_v22, 4  ;;  %v5167_v60 = vmax.f32 %v5166_v5, 0.0 }
 0x43d   :  { %v2967_v38 = vadd.f32 %v2966_v27, %v2965_v14  ;;  %v2941_v19 = vsel %vm770_vm7, %v2877_v15, 0.0  ;;  %v2982_v15 = vrot.slane %v4971_v22, 7 }
 0x43e   :  { %v3011_v30 = vrot.slane %v2994_v18, 5  ;;  %v2943_v43 = vadd.f32 %v2942_v29, %v2941_v19 }
 0x43f   :  { %v2968_v37 = vrot.slane %v2967_v38, 4 }
 0x440   :  { %v3012_v47 = vsel %vm938_vm13, %v3011_v30, %v3010_v26  ;;  %v2953_v30 = vsel %vm770_vm7, %v2881_v56, 0.0 }
 0x441   :  { %v2969_v45 = vadd.f32 %v2968_v37, %v2967_v38  ;;  %v2954_v16 = vadd.f32 %v2953_v30, %v2952_v52 }
 0x443   :  { %v2970_v33 = vrot.slane %v2969_v45, 2 }
 0x445   :  { %v2971_v23 = vadd.f32 %v2970_v33, %v2969_v45 }
 0x447   :  { %v2972_v57 = vrot.slane %v2971_v23, 1 }
 0x449   :  { %v2973_v27 = vadd.f32 %v2972_v57, %v2971_v23 }
 0x44a   :  { %v2804_v25 = vpop.permute.xlu1 %2803 }
 0x44b   :  { %v2876_v44 = vmul.f32 %v2804_v25, %v5156_v40  ;;  %v2998_v13 = vmul.f32 %v2982_v15, %v2973_v27 }
 0x44d   :  { %v2933_v49 = vsel %vm770_vm7, %v2876_v44, 0.0  ;;  %v3019_v7 = vrot.slane %v2998_v13, 1 }
 0x44e   :  { %v2934_v59 = vadd.f32 %v2933_v49, %v2932_v51  ;;  %v2981_v49 = vrot.slane %v4971_v22, 6 }
 0x450   :  { %v2935_v12 = vrot.slane %v2934_v59, 4 }
 0x452   :  { %v2936_v1 = vadd.f32 %v2935_v12, %v2934_v59  ;;  %v2823_v63 = vpop.permute.xlu1 %2822 }
 0x453   :  { %v2879_v42 = vmul.f32 %v2823_v63, %v5161_v41 }
 0x454   :  { %v2937_v26 = vrot.slane %v2936_v1, 2 }
 0x455   :  { %v2944_v31 = vsel %vm770_vm7, %v2879_v42, 0.0 }
 0x456   :  { %v2938_v36 = vadd.f32 %v2937_v26, %v2936_v1  ;;  %v2945_v39 = vadd.f32 %v2944_v31, %v2943_v43 }
 0x458   :  { %v2939_v46 = vrot.slane %v2938_v36, 1  ;;  %v2946_v8 = vrot.slane %v2945_v39, 4 }
 0x45a   :  { %v2940_v9 = vadd.f32 %v2939_v46, %v2938_v36  ;;  %v2947_v18 = vadd.f32 %v2946_v8, %v2945_v39  ;;  %v2842_v3 = vpop.permute.xlu1 %2841 }
 0x45b   :  { %v2882_v32 = vmul.f32 %v2842_v3, %v5167_v60 }
 0x45c   :  { %v2995_v4 = vmul.f32 %v2979_v10, %v2940_v9  ;;  %v2948_v34 = vrot.slane %v2947_v18, 2 }
 0x45d   :  { %v2955_v48 = vsel %vm770_vm7, %v2882_v32, 0.0 }
 0x45e   :  { %v3013_v55 = vrot.slane %v2995_v4, 4  ;;  %v2949_v11 = vadd.f32 %v2948_v34, %v2947_v18  ;;  %v2956_v53 = vadd.f32 %v2955_v48, %v2954_v16 }
 0x460   :  { %v2950_v50 = vrot.slane %v2949_v11, 1  ;;  %v2957_v62 = vrot.slane %v2956_v53, 4  ;;  %v3014_v17 = vsel %vm940_vm14, %v3013_v55, %v3012_v47 }
 0x462   :  { %v2951_v2 = vadd.f32 %v2950_v50, %v2949_v11  ;;  %v2958_v25 = vadd.f32 %v2957_v62, %v2956_v53 }
 0x464   :  { %v2996_v40 = vmul.f32 %v2980_v28, %v2951_v2  ;;  %v2959_v44 = vrot.slane %v2958_v25, 2 }
 0x466   :  { %v3015_v51 = vrot.slane %v2996_v40, 3  ;;  %v2960_v61 = vadd.f32 %v2959_v44, %v2958_v25 }
 0x468   :  { %v2961_v14 = vrot.slane %v2960_v61, 1  ;;  %v3016_v58 = vsel %vm942_vm15, %v3015_v51, %v3014_v17 }
 0x46a   :  { %v2962_v59 = vadd.f32 %v2961_v14, %v2960_v61 }
 0x46c   :  { %v2997_v47 = vmul.f32 %v2981_v49, %v2962_v59 }
 0x46e   :  { %v3017_v0 = vrot.slane %v2997_v47, 2 }
 0x470   :  { %v3018_v38 = vsel %vm944_vm0, %v3017_v0, %v3016_v58 }
 0x471   :  { %v3020_v12 = vsel %vm946_vm1, %v3019_v7, %v3018_v38 }
 0x472   :  { %3022 = vst.msk [vmem:[#allocation4] sm:$0xff] %vm770_vm7, %v3020_v12 }
 0x473   :  { %3044 = dma.vmem_to_hbm [thread:$0]  %s3040_s3, 128, %s3042_s26, [#allocation5]  }
 0x474   :  { %3519 = dma.done.wait [#allocation3], 128  }
 0x475   :  { %3520 = vsyncadd [#allocation3], 4294967168 }
 0x476   :  { %3521 = dma.done.wait [#allocation5], 128  }
 0x477   :  { %3522 = vsyncadd [#allocation5], 4294967168 }
 0x478   :  { %3053 = vsyncpa [#allocation3], 1 }
 0x479   :  { %3054 = vsyncpa [#allocation5], 1 }

</bundles_post_ra>
